<compile_context>
chip_gen: v7x
topology: tpu7x:2x2x1
jax: 0.10.0
libtpu: 0.0.40
codegen_flags: <defaults>
</compile_context>

<pallas_src>
import functools

import jax
import jax.numpy as jnp
from jax.experimental import pallas as pl
from jax.experimental.pallas import tpu as pltpu


# ----------------------------------------------------------------------------
# Pallas kernel: encoder -> num_hidden GCN layers -> compact decoder, fused.
# One grid step handles tile_b samples (tile_b*N rows); weights / A_blk use
# constant-index blocks so they stay resident across the grid.
# ----------------------------------------------------------------------------
def _basemodel_kernel(num_hidden,
                      x_ref,      # [TBN, Cin]  bf16  flattened node features
                      ablk_ref,   # [TBN, TBN]  bf16  block-diag adjacency
                      wenc_ref,   # [Cin, H]    bf16
                      benc_ref,   # [1, H]      f32
                      wl_ref,     # [L, H, H]   bf16
                      bl_ref,     # [L, H]      f32
                      wdec_ref,   # [H, 1]      bf16
                      out_ref):   # [TB, N]     f32
    tb, n = out_ref.shape

    # encoder: x_0 = x @ W_enc + b_enc   (bf16 MXU inputs, f32 accumulate)
    x0 = jnp.dot(x_ref[...], wenc_ref[...],
                 preferred_element_type=jnp.float32) + benc_ref[...]

    h = x0
    # hidden GNN layers: static unroll (num_hidden is small).
    # TODO(synk): switch to lax.fori_loop(unroll=True) + dynamic wl_ref[l] if
    #             num_hidden grows enough for the unrolled weights to spill.
    for l in range(num_hidden):
        # message passing as ONE lane-dense matmul: kron(I, A) @ h
        agg = jnp.dot(ablk_ref[...], h.astype(jnp.bfloat16),
                      preferred_element_type=jnp.float32)
        w_l = wl_ref[l]                          # [H, H] bf16 (static index)
        b_l = bl_ref[pl.ds(l, 1), :]             # [1, H] f32
        h = jnp.maximum(
            jnp.dot(agg.astype(jnp.bfloat16), w_l,
                    preferred_element_type=jnp.float32) + b_l, 0.0)

    # decoder: compact [TBN,H] @ [H,1] -> reshape to (tile_b, N) block.
    dec = jnp.dot(h.astype(jnp.bfloat16), wdec_ref[...],
                  preferred_element_type=jnp.float32)        # [TBN, 1]
    out_ref[...] = dec.reshape(tb, n)


def basemodel_pallas(x_flat2d, a_blk, w_enc, b_enc, w_layers, b_layers,
                     w_dec_col, *, tile_b, num_nodes):
    bn, cin = x_flat2d.shape
    n = num_nodes
    b = bn // n
    num_hidden, hidden, _ = w_layers.shape
    assert b % tile_b == 0, "batch must be divisible by tile_b"
    tbn = tile_b * n
    assert tbn % 8 == 0, "tile_b * num_nodes must be sublane aligned"
    assert tile_b % 8 == 0 or tile_b == b, "output block needs 8-row alignment"
    assert a_blk.shape == (tbn, tbn)
    grid = (b // tile_b,)

    # explicit VMEM budget: 2x (pipelined x/out blocks + default-double-
    # buffered resident weights / adjacency) + f32 intermediates + headroom.
    x_bytes = tbn * cin * 2                       # x block (bf16)
    out_bytes = tbn * 4                           # out block (f32)
    ablk_bytes = tbn * tbn * 2                    # block-diag adjacency (bf16)
    w_bytes = (cin * hidden * 2 + hidden * 4
               + num_hidden * hidden * hidden * 2 + num_hidden * hidden * 4
               + hidden * 2)
    scratch_bytes = 6 * tbn * hidden * 4          # x0 / h / agg + bf16 casts
    budget = 2 * (x_bytes + out_bytes + ablk_bytes + w_bytes) \
        + scratch_bytes + (2 << 20)
    vmem_limit = int(min(max(budget, 8 << 20), 40 << 20))

    kernel = functools.partial(_basemodel_kernel, num_hidden)
    return pl.pallas_call(
        kernel,
        out_shape=jax.ShapeDtypeStruct((b, n), jnp.float32),
        grid_spec=pltpu.PrefetchScalarGridSpec(
            num_scalar_prefetch=0,
            grid=grid,
            in_specs=[
                pl.BlockSpec((tbn, cin), lambda i: (i, 0)),
                pl.BlockSpec((tbn, tbn), lambda i: (0, 0)),
                pl.BlockSpec((cin, hidden), lambda i: (0, 0)),
                pl.BlockSpec((1, hidden), lambda i: (0, 0)),
                pl.BlockSpec((num_hidden, hidden, hidden), lambda i: (0, 0, 0)),
                pl.BlockSpec((num_hidden, hidden), lambda i: (0, 0)),
                pl.BlockSpec((hidden, 1), lambda i: (0, 0)),
            ],
            out_specs=pl.BlockSpec((tile_b, n), lambda i: (i, 0)),
        ),
        compiler_params=pltpu.CompilerParams(
            dimension_semantics=("parallel",),   # v7x: both TCs split the batch
            vmem_limit_bytes=vmem_limit,
        ),
    )(x_flat2d, a_blk, w_enc, b_enc, w_layers, b_layers, w_dec_col)


# ----------------------------------------------------------------------------
# Batch-tile selection: biggest tile <= 32 (block-diag adjacency stays small),
# sublane-aligned, and keeping grid >= 2 so v7x megacore still splits work.
# On v5e/v6e a grid of 1-2 steps is equally fine (overhead amortization).
# ----------------------------------------------------------------------------
def pick_tile_b(batch, num_nodes, max_tile=32):
    def ok(t):
        return (batch % t == 0 and (t * num_nodes) % 8 == 0
                and (t % 8 == 0 or t == batch))
    cands = [t for t in range(1, min(batch, max_tile) + 1) if ok(t)]
    pref = [t for t in cands if batch // t >= 2]    # keep >= 2 grid steps
    if pref:
        return max(pref)
    if cands:
        return max(cands)
    return batch


# ----------------------------------------------------------------------------
# Glue (plain JAX, jit-safe): edge orientation, |w|, self loops, densify graph.
# Mirrors the preprocessing in BaseModel.forward (single graph, num_graphs=1).
# ----------------------------------------------------------------------------
def preprocess_graph(edge_index, edge_weights, edge_orientation, num_nodes):
    ew = jnp.abs(edge_weights.astype(jnp.float32))
    src, dst = edge_index[0], edge_index[1]
    if edge_orientation == 'upstream':
        src, dst = dst, src
    elif edge_orientation == 'bidirectional':
        src = jnp.concatenate([edge_index[0], edge_index[1]])
        dst = jnp.concatenate([edge_index[1], edge_index[0]])
        ew = jnp.concatenate([ew, ew])
    elif edge_orientation not in (None, 'downstream'):
        raise ValueError('unknown edge direction', edge_orientation)

    # add_self_loops: fill_value = 1.0 if all stored weights are zero, else
    # 'mean' of incoming-edge weights per node (0 if none).  Both variants are
    # computed on device and selected with jnp.where -> no host sync, jittable.
    w_sum = jnp.zeros((num_nodes,), jnp.float32).at[dst].add(ew)
    cnt = jnp.zeros((num_nodes,), jnp.float32).at[dst].add(1.0)
    mean_loop = jnp.where(cnt > 0, w_sum / jnp.maximum(cnt, 1.0), 0.0)
    all_zero = jnp.all(edge_weights == 0)
    loop_w = jnp.where(all_zero, jnp.ones((num_nodes,), jnp.float32), mean_loop)

    # densify: A[dst, src] = w (summed over duplicates) + self loops
    adj = jnp.zeros((num_nodes, num_nodes), jnp.float32).at[dst, src].add(ew)
    return adj + jnp.diag(loop_w)


@functools.partial(jax.jit, static_argnames=('edge_orientation', 'tile_b'))
def basemodel_forward(x, edge_index, edge_weights, params, *,
                      edge_orientation, tile_b=None):
    b, n = x.shape[0], x.shape[1]
    if tile_b is None:
        tile_b = pick_tile_b(b, n)

    # per-sample flatten(1); bf16 halves the dominant HBM read / x VMEM block.
    x_flat = x.reshape(b * n, -1).astype(jnp.bfloat16)
    adj = preprocess_graph(edge_index, edge_weights, edge_orientation, n)
    # block-diagonal adjacency: one lane-dense [TBN,TBN]@[TBN,H] matmul/layer.
    a_blk = jnp.kron(jnp.eye(tile_b, dtype=jnp.float32), adj).astype(jnp.bfloat16)

    out = basemodel_pallas(
        x_flat, a_blk,
        params['w_enc'].astype(jnp.bfloat16), params['b_enc'].reshape(1, -1),
        params['w_layers'].astype(jnp.bfloat16), params['b_layers'],
        params['w_dec'].astype(jnp.bfloat16),
        tile_b=tile_b, num_nodes=n)

    # decoder bias folded here (scalar -> keeps a (1,1) tile/DMA out of VMEM)
    return out.reshape(b, n, 1) + params['b_dec']


# Pure-JAX f32 reference (same math, no bf16) for a correctness sanity check.
def basemodel_reference(x, edge_index, edge_weights, params, edge_orientation):
    b, n = x.shape[0], x.shape[1]
    xf = x.reshape(b, n, -1).astype(jnp.float32)
    adj = preprocess_graph(edge_index, edge_weights, edge_orientation, n)
    h = jnp.einsum('bnc,ch->bnh', xf, params['w_enc']) + params['b_enc']
    for l in range(params['w_layers'].shape[0]):
        agg = jnp.einsum('nm,bmh->bnh', adj, h)
        h = jax.nn.relu(jnp.einsum('bnh,hk->bnk', agg, params['w_layers'][l])
                        + params['b_layers'][l])
    return jnp.einsum('bnh,ho->bno', h, params['w_dec']) + params['b_dec']


# ----------------------------------------------------------------------------
# Deterministic parameter init (kaiming-uniform-style bounds).
# param_sharing=True would simply tile the same layer weights L times.
# ----------------------------------------------------------------------------
def init_params(key, in_channels, hidden_channels, num_hidden):
    ks = jax.random.split(key, 3)

    def ku(k, fan_in, shape):
        bound = jnp.sqrt(6.0 / fan_in)
        return jax.random.uniform(k, shape, jnp.float32, -bound, bound)

    return {
        'w_enc': ku(ks[0], in_channels, (in_channels, hidden_channels)),
        'b_enc': jnp.zeros((hidden_channels,), jnp.float32),
        'w_layers': ku(ks[1], hidden_channels,
                       (num_hidden, hidden_channels, hidden_channels)),
        'b_layers': jnp.zeros((num_hidden, hidden_channels), jnp.float32),
        'w_dec': ku(ks[2], hidden_channels, (hidden_channels, 1)),
        'b_dec': jnp.zeros((1,), jnp.float32),
    }


if __name__ == "__main__":
    key = jax.random.PRNGKey(0)
    k_x, k_w, k_ew = jax.random.split(key, 3)

    # small but MXU/lane-friendly shapes
    batch = 64              # independent samples sharing one graph
    num_nodes = 16          # graph nodes
    seq_len = 16            # time steps per node
    feat = 8                # features per step
    in_channels = seq_len * feat        # 128 (lane-dense)
    hidden_channels = 128               # multiple of 128
    num_hidden = 2
    edge_orientation = 'bidirectional'
    # tile_b auto-picked: 32 -> grid=(2,), M = 512 rows per matmul

    # node features [B, N, seq, feat]
    x = jax.random.normal(k_x, (batch, num_nodes, seq_len, feat), jnp.float32)

    # a simple chain graph 0->1->...->15
    srcs = jnp.arange(num_nodes - 1, dtype=jnp.int32)
    dsts = srcs + 1
    edge_index = jnp.stack([srcs, dsts], axis=0)                     # [2, E]
    edge_weights = jax.random.uniform(k_ew, (num_nodes - 1,), jnp.float32)

    params = init_params(k_w, in_channels, hidden_channels, num_hidden)

    out = basemodel_forward(x, edge_index, edge_weights, params,
                            edge_orientation=edge_orientation)
    out = jax.block_until_ready(out)
    assert out.shape == (batch, num_nodes, 1) and out.dtype == jnp.float32

    ref = basemodel_reference(x, edge_index, edge_weights, params,
                              edge_orientation)
    max_err = float(jnp.max(jnp.abs(out - ref)))
    assert jnp.allclose(out, ref, rtol=0.15, atol=0.15), max_err

    print("KERNEL_OK")
</pallas_src>

<mosaic_0001>
module attributes {stable_mosaic.version = 11 : i64} {
  func.func @_basemodel_kernel(%arg0: i32, %arg1: memref<512x128xbf16, #tpu.memory_space<vmem>>, %arg2: memref<512x512xbf16, #tpu.memory_space<vmem>>, %arg3: memref<128x128xbf16, #tpu.memory_space<vmem>>, %arg4: memref<1x128xf32, #tpu.memory_space<vmem>>, %arg5: memref<2x128x128xbf16, #tpu.memory_space<vmem>>, %arg6: memref<2x128xf32, #tpu.memory_space<vmem>>, %arg7: memref<128x1xbf16, #tpu.memory_space<vmem>>, %arg8: memref<32x16xf32, #tpu.memory_space<vmem>>) attributes {dimension_semantics = [#tpu.dimension_semantics<parallel>], iteration_bounds = array<i64: 2>, scalar_prefetch = 0 : i64, scratch_operands = 0 : i64, tpu.core_type = #tpu.core_type<tc>, window_params = [{transform_indices = @transform_0, window_bounds = array<i64: 512, 128>}, {pipeline_mode = #tpu.pipeline_mode<synchronous>, transform_indices = @transform_1, window_bounds = array<i64: 512, 512>}, {pipeline_mode = #tpu.pipeline_mode<synchronous>, transform_indices = @transform_2, window_bounds = array<i64: 128, 128>}, {pipeline_mode = #tpu.pipeline_mode<synchronous>, transform_indices = @transform_3, window_bounds = array<i64: 1, 128>}, {pipeline_mode = #tpu.pipeline_mode<synchronous>, transform_indices = @transform_4, window_bounds = array<i64: 2, 128, 128>}, {pipeline_mode = #tpu.pipeline_mode<synchronous>, transform_indices = @transform_5, window_bounds = array<i64: 2, 128>}, {pipeline_mode = #tpu.pipeline_mode<synchronous>, transform_indices = @transform_6, window_bounds = array<i64: 128, 1>}, {transform_indices = @transform_7, window_bounds = array<i64: 32, 16>}]} {
    %c0 = arith.constant 0 : index
    %c0_0 = arith.constant 0 : index
    %0 = vector.load %arg1[%c0, %c0_0] : memref<512x128xbf16, #tpu.memory_space<vmem>>, vector<512x128xbf16>
    %c0_1 = arith.constant 0 : index
    %c0_2 = arith.constant 0 : index
    %1 = vector.load %arg3[%c0_1, %c0_2] : memref<128x128xbf16, #tpu.memory_space<vmem>>, vector<128x128xbf16>
    %cst = arith.constant dense<0.000000e+00> : vector<512x128xf32>
    %2 = tpu.matmul %0, %1, %cst {dimension_numbers = #tpu.dot_dimension_numbers<[1], [0], [0], [1], [0, 0, 1, 1], [], []>} : vector<512x128xbf16>, vector<128x128xbf16>, vector<512x128xf32> -> vector<512x128xf32>
    %c0_3 = arith.constant 0 : index
    %c0_4 = arith.constant 0 : index
    %3 = vector.load %arg4[%c0_3, %c0_4] : memref<1x128xf32, #tpu.memory_space<vmem>>, vector<1x128xf32>
    %4 = vector.broadcast %3 : vector<1x128xf32> to vector<512x128xf32>
    %5 = arith.addf %2, %4 : vector<512x128xf32>
    %c0_5 = arith.constant 0 : index
    %c0_6 = arith.constant 0 : index
    %6 = vector.load %arg2[%c0_5, %c0_6] : memref<512x512xbf16, #tpu.memory_space<vmem>>, vector<512x512xbf16>
    %7 = arith.truncf %5 : vector<512x128xf32> to vector<512x128xbf16>
    %cst_7 = arith.constant dense<0.000000e+00> : vector<512x128xf32>
    %8 = tpu.matmul %6, %7, %cst_7 {dimension_numbers = #tpu.dot_dimension_numbers<[1], [0], [0], [1], [0, 0, 1, 1], [], []>} : vector<512x512xbf16>, vector<512x128xbf16>, vector<512x128xf32> -> vector<512x128xf32>
    %c0_8 = arith.constant 0 : index
    %c0_9 = arith.constant 0 : index
    %c0_10 = arith.constant 0 : index
    %9 = vector.load %arg5[%c0_8, %c0_9, %c0_10] : memref<2x128x128xbf16, #tpu.memory_space<vmem>>, vector<1x128x128xbf16>
    %10 = vector.shape_cast %9 : vector<1x128x128xbf16> to vector<128x128xbf16>
    %c0_11 = arith.constant 0 : index
    %c0_12 = arith.constant 0 : index
    %11 = vector.load %arg6[%c0_11, %c0_12] : memref<2x128xf32, #tpu.memory_space<vmem>>, vector<1x128xf32>
    %12 = arith.truncf %8 : vector<512x128xf32> to vector<512x128xbf16>
    %cst_13 = arith.constant dense<0.000000e+00> : vector<512x128xf32>
    %13 = tpu.matmul %12, %10, %cst_13 {dimension_numbers = #tpu.dot_dimension_numbers<[1], [0], [0], [1], [0, 0, 1, 1], [], []>} : vector<512x128xbf16>, vector<128x128xbf16>, vector<512x128xf32> -> vector<512x128xf32>
    %14 = vector.broadcast %11 : vector<1x128xf32> to vector<512x128xf32>
    %15 = arith.addf %13, %14 : vector<512x128xf32>
    %cst_14 = arith.constant 0.000000e+00 : f32
    %16 = vector.broadcast %cst_14 : f32 to vector<512x128xf32>
    %17 = arith.maximumf %15, %16 : vector<512x128xf32>
    %c0_15 = arith.constant 0 : index
    %c0_16 = arith.constant 0 : index
    %18 = vector.load %arg2[%c0_15, %c0_16] : memref<512x512xbf16, #tpu.memory_space<vmem>>, vector<512x512xbf16>
    %19 = arith.truncf %17 : vector<512x128xf32> to vector<512x128xbf16>
    %cst_17 = arith.constant dense<0.000000e+00> : vector<512x128xf32>
    %20 = tpu.matmul %18, %19, %cst_17 {dimension_numbers = #tpu.dot_dimension_numbers<[1], [0], [0], [1], [0, 0, 1, 1], [], []>} : vector<512x512xbf16>, vector<512x128xbf16>, vector<512x128xf32> -> vector<512x128xf32>
    %c1 = arith.constant 1 : index
    %c0_18 = arith.constant 0 : index
    %c0_19 = arith.constant 0 : index
    %21 = vector.load %arg5[%c1, %c0_18, %c0_19] : memref<2x128x128xbf16, #tpu.memory_space<vmem>>, vector<1x128x128xbf16>
    %22 = vector.shape_cast %21 : vector<1x128x128xbf16> to vector<128x128xbf16>
    %c1_20 = arith.constant 1 : index
    %c0_21 = arith.constant 0 : index
    %23 = vector.load %arg6[%c1_20, %c0_21] : memref<2x128xf32, #tpu.memory_space<vmem>>, vector<1x128xf32>
    %24 = arith.truncf %20 : vector<512x128xf32> to vector<512x128xbf16>
    %cst_22 = arith.constant dense<0.000000e+00> : vector<512x128xf32>
    %25 = tpu.matmul %24, %22, %cst_22 {dimension_numbers = #tpu.dot_dimension_numbers<[1], [0], [0], [1], [0, 0, 1, 1], [], []>} : vector<512x128xbf16>, vector<128x128xbf16>, vector<512x128xf32> -> vector<512x128xf32>
    %26 = vector.broadcast %23 : vector<1x128xf32> to vector<512x128xf32>
    %27 = arith.addf %25, %26 : vector<512x128xf32>
    %cst_23 = arith.constant 0.000000e+00 : f32
    %28 = vector.broadcast %cst_23 : f32 to vector<512x128xf32>
    %29 = arith.maximumf %27, %28 : vector<512x128xf32>
    %30 = arith.truncf %29 : vector<512x128xf32> to vector<512x128xbf16>
    %c0_24 = arith.constant 0 : index
    %c0_25 = arith.constant 0 : index
    %31 = vector.load %arg7[%c0_24, %c0_25] : memref<128x1xbf16, #tpu.memory_space<vmem>>, vector<128x1xbf16>
    %cst_26 = arith.constant dense<0.000000e+00> : vector<512x1xf32>
    %32 = tpu.matmul %30, %31, %cst_26 {dimension_numbers = #tpu.dot_dimension_numbers<[1], [0], [0], [1], [0, 0, 1, 1], [], []>} : vector<512x128xbf16>, vector<128x1xbf16>, vector<512x1xf32> -> vector<512x1xf32>
    %33 = vector.shape_cast %32 : vector<512x1xf32> to vector<32x16xf32>
    %c0_27 = arith.constant 0 : index
    %c0_28 = arith.constant 0 : index
    %34 = vector.load %arg8[%c0_27, %c0_28] : memref<32x16xf32, #tpu.memory_space<vmem>>, vector<32x16xf32>
    tpu.vector_store %arg8[%c0_27, %c0_28], %33 {strides = array<i32>} : memref<32x16xf32, #tpu.memory_space<vmem>>, vector<32x16xf32>,
    return
  }
  func.func @transform_0(%arg0: i32) -> (i32, i32) {
    %c0_i32 = arith.constant 0 : i32
    %c0_i32_0 = arith.constant 0 : i32
    return %arg0, %c0_i32 : i32, i32
  }
  func.func @transform_1(%arg0: i32) -> (i32, i32) {
    %c0_i32 = arith.constant 0 : i32
    %c0_i32_0 = arith.constant 0 : i32
    %c0_i32_1 = arith.constant 0 : i32
    return %c0_i32, %c0_i32_0 : i32, i32
  }
  func.func @transform_2(%arg0: i32) -> (i32, i32) {
    %c0_i32 = arith.constant 0 : i32
    %c0_i32_0 = arith.constant 0 : i32
    %c0_i32_1 = arith.constant 0 : i32
    return %c0_i32, %c0_i32_0 : i32, i32
  }
  func.func @transform_3(%arg0: i32) -> (i32, i32) {
    %c0_i32 = arith.constant 0 : i32
    %c0_i32_0 = arith.constant 0 : i32
    %c0_i32_1 = arith.constant 0 : i32
    return %c0_i32, %c0_i32_0 : i32, i32
  }
  func.func @transform_4(%arg0: i32) -> (i32, i32, i32) {
    %c0_i32 = arith.constant 0 : i32
    %c0_i32_0 = arith.constant 0 : i32
    %c0_i32_1 = arith.constant 0 : i32
    %c0_i32_2 = arith.constant 0 : i32
    return %c0_i32, %c0_i32_0, %c0_i32_1 : i32, i32, i32
  }
  func.func @transform_5(%arg0: i32) -> (i32, i32) {
    %c0_i32 = arith.constant 0 : i32
    %c0_i32_0 = arith.constant 0 : i32
    %c0_i32_1 = arith.constant 0 : i32
    return %c0_i32, %c0_i32_0 : i32, i32
  }
  func.func @transform_6(%arg0: i32) -> (i32, i32) {
    %c0_i32 = arith.constant 0 : i32
    %c0_i32_0 = arith.constant 0 : i32
    %c0_i32_1 = arith.constant 0 : i32
    return %c0_i32, %c0_i32_0 : i32, i32
  }
  func.func @transform_7(%arg0: i32) -> (i32, i32) {
    %c0_i32 = arith.constant 0 : i32
    %c0_i32_0 = arith.constant 0 : i32
    return %arg0, %c0_i32 : i32, i32
  }
}

</mosaic_0001>

<bundles_post_ra>
// kernel: basemodel_forward.1
= control target key start
LH: loop header
LB: loop body
LE: loop exit
PB: predicated region body
PF: predicated region fallthrough
CT: control target
= control target key end

     0   :  { %s6247_s24 = smov 0   ;;  %s7577_s0 = inlined_call_operand.vmem [shape: bf16[1024,128], index: 0, kind: input, shape index: {}]   ;;  %s7578_s1 = inlined_call_operand.vmem [shape: bf16[512,512], index: 1, kind: input, shape index: {}]   ;;  %s7579_s2 = inlined_call_operand.vmem [shape: bf16[128,128], index: 2, kind: input, shape index: {}]   ;;  %s7580_s3 = inlined_call_operand.vmem [shape: f32[1,128], index: 3, kind: input, shape index: {}]   ;;  %s7581_s4 = inlined_call_operand.vmem [shape: bf16[2,128,128], index: 4, kind: input, shape index: {}]   ;;  %s7582_s5 = inlined_call_operand.vmem [shape: f32[2,128], index: 5, kind: input, shape index: {}]   ;;  %s7583_s6 = inlined_call_operand.vmem [shape: bf16[128,1], index: 6, kind: input, shape index: {}]   ;;  %s7584_s7 = inlined_call_operand.vmem [shape: f32[64,16], index: 7, kind: output, shape index: {}]  }
   0x1 LB: > { %s4829_s25 = sadd.s32 4294967295, %s6204_s24   ;;  %p4833_p0 = scmp.ge.s32.totalorder %s6204_s24, 1  ;;  %s6204_s24 = sphi %s6247_s24, %s17_s24  }
   0x2   : > { %p238_p1 = scmp.lt.s32.totalorder %s6204_s24, 3 }
   0x4   : > { %p239_p2 = pnand %p4833_p0, %p238_p1 }
   0x5   : > { %v5814_v0 = vld [vmem:[%s7579_s2] sm:$0xff] (!%p239_p2)   ;;  %s4834_s28 = sshll.u32 (!%p239_p2), %s4829_s25, 6  ;;  %v5815_v1 = vld [vmem:[%s7579_s2 + $0x8] sm:$0xff] (!%p239_p2)   ;;  %v5816_v2 = vld [vmem:[%s7579_s2 + $0x10] sm:$0xff] (!%p239_p2)   ;;  %v6206_v33 = vmov (!%p239_p2), 0   ;;  %vm4448_vm0 = vcmask (!%p239_p2), 130112  }
   0x6   : > { %242 = sbr.rel (%p239_p2) target bundleno = 2434 (0x982), region = 48  ;;  %p271_p3 = scmp.lt.s32.totalorder (!%p239_p2), %s4834_s28, 127  ;;  %5211 = vmatprep.subr.bf16.mxu0 (!%p239_p2), %v5814_v0  ;;  %v5817_v3 = vld [vmem:[%s7579_s2 + $0x18] sm:$0xff] (!%p239_p2)   ;;  %v5818_v5 = vld [vmem:[%s7579_s2 + $0x20] sm:$0xff] (!%p239_p2)   ;;  %v5819_v6 = vld [vmem:[%s7579_s2 + $0x28] sm:$0xff] (!%p239_p2)   ;;  %1699 = vmatprep.subr.bf16.mxu1 (!%p239_p2), %v6206_v33  ;;  %vm4729_vm1 = vcmask (!%p239_p2), 1041409  }
   0x7   : > { %5212 = vmatpush3.bf16.msra.mxu0 (!%p239_p2), %v5814_v0  ;;  %v5820_v7 = vld [vmem:[%s7579_s2 + $0x30] sm:$0xff] (!%p239_p2)   ;;  %v5821_v8 = vld [vmem:[%s7579_s2 + $0x38] sm:$0xff] (!%p239_p2)   ;;  %5812 = vset.pattern.permute.xlu1 (!%p239_p2), %v6206_v33  ;;  %v6327_v43 = vld [vmem:[%s7580_s3] ss:$0 sm:$0xff] (!%p239_p2)  ;;  %s4836_s23 = sshll.u32 (!%p239_p2), %s4829_s25, 2  ;;  %vm4731_vm2 = vcmask (!%p239_p2), 1042434  }
   0x8   : > { %5213 = vmatprep.subr.bf16.mxu0 (!%p239_p2), %v5815_v1  ;;  %5813 = vset.pattern.permute.xlu0 (!%p239_p2), %v6206_v33  ;;  %v5854_v39 = vld [vmem:[%s7578_s1 + $0x4] ss:$16 sps:$4 sm:$0xff] (!%p239_p2)   ;;  %p277_p4 = scmp.lt.s32.totalorder (!%p239_p2), %s4836_s23, 7  ;;  %vm4733_vm3 = vcmask (!%p239_p2), 1043459   ;;  %vm4735_vm4 = vcmask (!%p239_p2), 1044484   ;;  %vm4737_vm5 = vcmask (!%p239_p2), 1045509  }
   0x9   : > { %1731 = vmatprep.mubr.bf16.mxu1 (!%p239_p2), %v5854_v39  ;;  %vm4739_vm6 = vcmask (!%p239_p2), 1046534   ;;  %vm4741_vm7 = vcmask (!%p239_p2), 1047559   ;;  %vm4768_vm8 = vcmask (!%p239_p2), 130048  }
   0xb   : > { %5214 = vmatpush3.bf16.msra.mxu0 (!%p239_p2), %v5815_v1 }
   0xc   : > { %5215 = vmatprep.subr.bf16.mxu0 (!%p239_p2), %v5816_v2 }
   0xd   : > { %s7586_s28 = smov (!%p271_p3, %s4834_s28), 127  ;;  %s7588_s23 = smov (!%p277_p4, %s4836_s23), 7 }
   0xe   : > { %s4835_s10 = sshll.u32 %s7586_s28, 2  ;;  %s4837_s25 = sshll.u32 %s7588_s23, 3 }
   0xf   : > { %s6269_s13 = scalar_lea.vmem %s7577_s0, %s4835_s10  ;;  %5216 = vmatpush3.bf16.msra.mxu0 %v5816_v2  ;;  %s7466_s28 = scalar_lea.vmem %s7584_s7, %s4837_s25 }
  0x10   : > { %v5822_v4 = vld [vmem:[%s6269_s13] sm:$0xff]   ;;  %5217 = vmatprep.subr.bf16.mxu0 %v5817_v3  ;;  %v5823_v9 = vld [vmem:[%s6269_s13 + $0x8] sm:$0xff]   ;;  %v5824_v10 = vld [vmem:[%s6269_s13 + $0x10] sm:$0xff]  }
  0x11   : > { %5227 = vmatprep.mubr.bf16.mxu0 %v5822_v4  ;;  %v5825_v11 = vld [vmem:[%s6269_s13 + $0x18] sm:$0xff]   ;;  %v5826_v12 = vld [vmem:[%s6269_s13 + $0x20] sm:$0xff]   ;;  %v5827_v13 = vld [vmem:[%s6269_s13 + $0x28] sm:$0xff]  }
  0x12   : > { %v5828_v14 = vld [vmem:[%s6269_s13 + $0x30] sm:$0xff]   ;;  %v5829_v15 = vld [vmem:[%s6269_s13 + $0x38] sm:$0xff]   ;;  %v5830_v16 = vld [vmem:[%s6269_s13 + $0x40] sm:$0xff]  }
  0x13   : > { %5218 = vmatpush3.bf16.msra.mxu0 %v5817_v3  ;;  %v5831_v17 = vld [vmem:[%s6269_s13 + $0x48] sm:$0xff]   ;;  %v5832_v18 = vld [vmem:[%s6269_s13 + $0x50] sm:$0xff]   ;;  %v5833_v19 = vld [vmem:[%s6269_s13 + $0x58] sm:$0xff]  }
  0x14   : > { %5219 = vmatprep.subr.bf16.mxu0 %v5818_v5  ;;  %v5834_v20 = vld [vmem:[%s6269_s13 + $0x60] sm:$0xff]   ;;  %v5835_v21 = vld [vmem:[%s6269_s13 + $0x68] sm:$0xff]   ;;  %v5836_v22 = vld [vmem:[%s6269_s13 + $0x70] sm:$0xff]  }
  0x15   : > { %v5837_v23 = vld [vmem:[%s6269_s13 + $0x78] sm:$0xff]   ;;  %v5838_v24 = vld [vmem:[%s6269_s13 + $0x80] sm:$0xff]   ;;  %v5839_v25 = vld [vmem:[%s6269_s13 + $0x88] sm:$0xff]  }
  0x16   : > { %v5840_v26 = vld [vmem:[%s6269_s13 + $0x90] sm:$0xff]   ;;  %v5841_v27 = vld [vmem:[%s6269_s13 + $0x98] sm:$0xff]   ;;  %v5842_v28 = vld [vmem:[%s6269_s13 + $0xa0] sm:$0xff]  }
  0x17   : > { %5220 = vmatpush3.bf16.msra.mxu0 %v5818_v5  ;;  %v5843_v29 = vld [vmem:[%s6269_s13 + $0xa8] sm:$0xff]   ;;  %v5844_v30 = vld [vmem:[%s6269_s13 + $0xb0] sm:$0xff]   ;;  %v5845_v31 = vld [vmem:[%s6269_s13 + $0xb8] sm:$0xff]  }
  0x18   : > { %5221 = vmatprep.subr.bf16.mxu0 %v5819_v6  ;;  %v5846_v32 = vld [vmem:[%s6269_s13 + $0xc0] sm:$0xff]   ;;  %v5847_v34 = vld [vmem:[%s6269_s13 + $0xc8] sm:$0xff]   ;;  %v5848_v35 = vld [vmem:[%s6269_s13 + $0xd0] sm:$0xff]  }
  0x19   : > { %v5849_v36 = vld [vmem:[%s6269_s13 + $0xd8] sm:$0xff]   ;;  %v5850_v37 = vld [vmem:[%s6269_s13 + $0xe0] sm:$0xff]   ;;  %v5851_v38 = vld [vmem:[%s6269_s13 + $0xe8] sm:$0xff]  }
  0x1a   : > { %v5855_v40 = vld [vmem:[%s6269_s13 + $0xf0] sm:$0xff]   ;;  %v5856_v41 = vld [vmem:[%s6269_s13 + $0xf8] sm:$0xff]  }
  0x1b   : > { %5222 = vmatpush3.bf16.msra.mxu0 %v5819_v6 }
  0x1c   : > { %5223 = vmatprep.subr.bf16.mxu0 %v5820_v7 }
  0x1f   : > { %5224 = vmatpush3.bf16.msra.mxu0 %v5820_v7 }
  0x20   : > { %5225 = vmatprep.subr.bf16.mxu0 %v5821_v8 }
  0x23   : > { %5226 = vmatpush3.bf16.msra.mxu0 %v5821_v8 }
  0x26   : > { %5228 = vmatmul.mubr.bf16.vlgmr.msra.gmra.mrb[0].mxu0 %v5823_v9 }
  0x27   : > { %5231 = vmatprep.mubr.bf16.mxu0 %v5824_v10 }
  0x2e   : > { %5232 = vmatmul.mubr.bf16.gmra.mrb[4].mxu0 %v5825_v11 }
  0x2f   : > { %5235 = vmatprep.mubr.bf16.mxu0 %v5826_v12 }
  0x36   : > { %5236 = vmatmul.mubr.bf16.gmra.mrb[8].mxu0 %v5827_v13 }
  0x37   : > { %5239 = vmatprep.mubr.bf16.mxu0 %v5828_v14 }
  0x3e   : > { %5240 = vmatmul.mubr.bf16.gmra.mrb[12].mxu0 %v5829_v15 }
  0x3f   : > { %5243 = vmatprep.mubr.bf16.mxu0 %v5830_v16 }
  0x46   : > { %5244 = vmatmul.mubr.bf16.gmra.mrb[16].mxu0 %v5831_v17 }
  0x47   : > { %5247 = vmatprep.mubr.bf16.mxu0 %v5832_v18 }
  0x4e   : > { %5248 = vmatmul.mubr.bf16.gmra.mrb[20].mxu0 %v5833_v19 }
  0x4f   : > { %5251 = vmatprep.mubr.bf16.mxu0 %v5834_v20 }
  0x56   : > { %5252 = vmatmul.mubr.bf16.gmra.mrb[24].mxu0 %v5835_v21 }
  0x57   : > { %5255 = vmatprep.mubr.bf16.mxu0 %v5836_v22 }
  0x5e   : > { %5256 = vmatmul.mubr.bf16.gmra.mrb[28].mxu0 %v5837_v23 }
  0x5f   : > { %5259 = vmatprep.mubr.bf16.mxu0 %v5838_v24 }
  0x66   : > { %5260 = vmatmul.mubr.bf16.gmra.mrb[32].mxu0 %v5839_v25 }
  0x67   : > { %5263 = vmatprep.mubr.bf16.mxu0 %v5840_v26 }
  0x6e   : > { %5264 = vmatmul.mubr.bf16.gmra.mrb[36].mxu0 %v5841_v27 }
  0x6f   : > { %5267 = vmatprep.mubr.bf16.mxu0 %v5842_v28 }
  0x76   : > { %5268 = vmatmul.mubr.bf16.gmra.mrb[40].mxu0 %v5843_v29 }
  0x77   : > { %5271 = vmatprep.mubr.bf16.mxu0 %v5844_v30 }
  0x7e   : > { %5272 = vmatmul.mubr.bf16.gmra.mrb[44].mxu0 %v5845_v31 }
  0x7f   : > { %5275 = vmatprep.mubr.bf16.mxu0 %v5846_v32 }
  0x86   : > { %5276 = vmatmul.mubr.bf16.gmra.mrb[48].mxu0 %v5847_v34 }
  0x87   : > { %5279 = vmatprep.mubr.bf16.mxu0 %v5848_v35 }
  0x8e   : > { %5280 = vmatmul.mubr.bf16.gmra.mrb[52].mxu0 %v5849_v36 }
  0x8f   : > { %5283 = vmatprep.mubr.bf16.mxu0 %v5850_v37 }
  0x96   : > { %5284 = vmatmul.mubr.bf16.gmra.mrb[56].mxu0 %v5851_v38 }
  0x97   : > { %5287 = vmatprep.mubr.bf16.mxu0 %v5855_v40 }
  0x9e   : > { %5288 = vmatmul.mubr.bf16.gmra.mrb[60].mxu0 %v5856_v41 }
  0xf9   : > { %v5229_v42 = vpop.f32.mrb[0].mxu0 }
  0xfa   : > { %v644_v44 = vpop.f32.mrb[1].mxu0  ;;  %v653_v46 = vadd.f32 %v5229_v42, %v6327_v43 }
  0xfb   : > { %v5230_v45 = vpop.f32.mrb[2].mxu0  ;;  %v645_v49 = vadd.f32 %v6327_v43, %v644_v44 }
  0xfc   : > { %v656_v47 = vadd.f32 %v5230_v45, %v6327_v43  ;;  %v647_v48 = vpop.f32.mrb[3].mxu0 }
  0xfd   : > { %v648_v50 = vadd.f32 %v6327_v43, %v647_v48 }
  0xfe   : > { %v1028_v51 = vpack.c.bf16 %v656_v47, %v653_v46 }
  0xff   : > { %v1027_v52 = vpack.c.bf16 %v648_v50, %v645_v49 }
 0x101   : > { %v5233_v53 = vpop.f32.mrb[4].mxu0  ;;  %1700 = vmatpush1.bf16.msra.mxu1 %v1027_v52 }
 0x102   : > { %v660_v54 = vpop.f32.mrb[5].mxu0  ;;  %1701 = vmatprep.subr.bf16.mxu1 %v6206_v33  ;;  %v669_v56 = vadd.f32 %v5233_v53, %v6327_v43 }
 0x103   : > { %v5234_v55 = vpop.f32.mrb[6].mxu0  ;;  %v661_v59 = vadd.f32 %v6327_v43, %v660_v54 }
 0x104   : > { %v672_v57 = vadd.f32 %v5234_v55, %v6327_v43  ;;  %v663_v58 = vpop.f32.mrb[7].mxu0 }
 0x105   : > { %v664_v60 = vadd.f32 %v6327_v43, %v663_v58  ;;  %1702 = vmatpush1.bf16.msra.mxu1 %v1028_v51 }
 0x106   : > { %1703 = vmatprep.subr.bf16.mxu1 %v6206_v33  ;;  %v1030_v61 = vpack.c.bf16 %v672_v57, %v669_v56 }
 0x107   : > { %v1029_v62 = vpack.c.bf16 %v664_v60, %v661_v59 }
 0x109   : > { %v5237_v63 = vpop.f32.mrb[8].mxu0  ;;  %1704 = vmatpush1.bf16.msra.mxu1 %v1029_v62 }
 0x10a   : > { %v676_v0 = vpop.f32.mrb[9].mxu0  ;;  %1705 = vmatprep.subr.bf16.mxu1 %v6206_v33  ;;  %v685_v2 = vadd.f32 %v5237_v63, %v6327_v43 }
 0x10b   : > { %v5238_v1 = vpop.f32.mrb[10].mxu0  ;;  %v677_v5 = vadd.f32 %v6327_v43, %v676_v0 }
 0x10c   : > { %v688_v3 = vadd.f32 %v5238_v1, %v6327_v43  ;;  %v679_v4 = vpop.f32.mrb[11].mxu0 }
 0x10d   : > { %v680_v6 = vadd.f32 %v6327_v43, %v679_v4  ;;  %1706 = vmatpush1.bf16.msra.mxu1 %v1030_v61  ;;  %v5852_v4 = vld [vmem:[%s7578_s1] ss:$16 sps:$4 sm:$0xff]  }
 0x10e   : > { %v1032_v7 = vpack.c.bf16 %v688_v3, %v685_v2  ;;  %1707 = vmatprep.subr.bf16.mxu1 %v6206_v33 }
 0x10f   : > { %v1031_v8 = vpack.c.bf16 %v680_v6, %v677_v5  ;;  %v5857_v6 = vld [vmem:[%s7578_s1 + $0x24] ss:$16 sps:$4 sm:$0xff]  }
 0x111   : > { %v5241_v9 = vpop.f32.mrb[12].mxu0  ;;  %1708 = vmatpush1.bf16.msra.mxu1 %v1031_v8 }
 0x112   : > { %v692_v10 = vpop.f32.mrb[13].mxu0  ;;  %1709 = vmatprep.subr.bf16.mxu1 %v6206_v33  ;;  %v701_v12 = vadd.f32 %v5241_v9, %v6327_v43 }
 0x113   : > { %v5242_v11 = vpop.f32.mrb[14].mxu0  ;;  %v693_v15 = vadd.f32 %v6327_v43, %v692_v10 }
 0x114   : > { %v704_v13 = vadd.f32 %v5242_v11, %v6327_v43  ;;  %v695_v14 = vpop.f32.mrb[15].mxu0 }
 0x115   : > { %v696_v16 = vadd.f32 %v6327_v43, %v695_v14  ;;  %1710 = vmatpush1.bf16.msra.mxu1 %v1032_v7  ;;  %v5859_v14 = vld [vmem:[%s7578_s1 + $0x20] ss:$16 sps:$4 sm:$0xff]  }
 0x116   : > { %v1034_v17 = vpack.c.bf16 %v704_v13, %v701_v12  ;;  %1711 = vmatprep.subr.bf16.mxu1 %v6206_v33 }
 0x117   : > { %v1033_v18 = vpack.c.bf16 %v696_v16, %v693_v15 }
 0x119   : > { %v5245_v19 = vpop.f32.mrb[16].mxu0  ;;  %1712 = vmatpush1.bf16.msra.mxu1 %v1033_v18 }
 0x11a   : > { %v708_v20 = vpop.f32.mrb[17].mxu0  ;;  %1713 = vmatprep.subr.bf16.mxu1 %v6206_v33  ;;  %v717_v22 = vadd.f32 %v5245_v19, %v6327_v43 }
 0x11b   : > { %v5246_v21 = vpop.f32.mrb[18].mxu0  ;;  %v709_v25 = vadd.f32 %v6327_v43, %v708_v20 }
 0x11c   : > { %v720_v23 = vadd.f32 %v5246_v21, %v6327_v43  ;;  %v711_v24 = vpop.f32.mrb[19].mxu0 }
 0x11d   : > { %v712_v26 = vadd.f32 %v6327_v43, %v711_v24  ;;  %1714 = vmatpush1.bf16.msra.mxu1 %v1034_v17  ;;  %v5860_v17 = vld [vmem:[%s7578_s1 + $0x44] ss:$16 sps:$4 sm:$0xff]  }
 0x11e   : > { %v1036_v27 = vpack.c.bf16 %v720_v23, %v717_v22  ;;  %1715 = vmatprep.subr.bf16.mxu1 %v6206_v33 }
 0x11f   : > { %v1035_v28 = vpack.c.bf16 %v712_v26, %v709_v25  ;;  %v5862_v26 = vld [vmem:[%s7578_s1 + $0x40] ss:$16 sps:$4 sm:$0xff]  }
 0x121   : > { %v5249_v29 = vpop.f32.mrb[20].mxu0  ;;  %1716 = vmatpush1.bf16.msra.mxu1 %v1035_v28 }
 0x122   : > { %v724_v30 = vpop.f32.mrb[21].mxu0  ;;  %1717 = vmatprep.subr.bf16.mxu1 %v6206_v33  ;;  %v733_v32 = vadd.f32 %v5249_v29, %v6327_v43  ;;  %v5863_v29 = vld [vmem:[%s7578_s1 + $0x64] ss:$16 sps:$4 sm:$0xff]  }
 0x123   : > { %v5250_v31 = vpop.f32.mrb[22].mxu0  ;;  %v725_v36 = vadd.f32 %v6327_v43, %v724_v30 }
 0x124   : > { %v736_v34 = vadd.f32 %v5250_v31, %v6327_v43  ;;  %v727_v35 = vpop.f32.mrb[23].mxu0 }
 0x125   : > { %v728_v37 = vadd.f32 %v6327_v43, %v727_v35  ;;  %1718 = vmatpush1.bf16.msra.mxu1 %v1036_v27 }
 0x126   : > { %v1038_v38 = vpack.c.bf16 %v736_v34, %v733_v32  ;;  %1719 = vmatprep.subr.bf16.mxu1 %v6206_v33 }
 0x127   : > { %v1037_v39 = vpack.c.bf16 %v728_v37, %v725_v36 }
 0x129   : > { %v5253_v40 = vpop.f32.mrb[24].mxu0  ;;  %1720 = vmatpush1.bf16.msra.mxu1 %v1037_v39  ;;  %v5865_v39 = vld [vmem:[%s7578_s1 + $0x60] ss:$16 sps:$4 sm:$0xff]  }
 0x12a   : > { %v740_v41 = vpop.f32.mrb[25].mxu0  ;;  %1721 = vmatprep.subr.bf16.mxu1 %v6206_v33  ;;  %v749_v44 = vadd.f32 %v5253_v40, %v6327_v43 }
 0x12b   : > { %v5254_v42 = vpop.f32.mrb[26].mxu0  ;;  %v741_v47 = vadd.f32 %v6327_v43, %v740_v41 }
 0x12c   : > { %v752_v45 = vadd.f32 %v5254_v42, %v6327_v43  ;;  %v743_v46 = vpop.f32.mrb[27].mxu0  ;;  %v5866_v42 = vld [vmem:[%s7578_s1 + $0x84] ss:$16 sps:$4 sm:$0xff]  }
 0x12d   : > { %v744_v48 = vadd.f32 %v6327_v43, %v743_v46  ;;  %1722 = vmatpush1.bf16.msra.mxu1 %v1038_v38 }
 0x12e   : > { %v1040_v49 = vpack.c.bf16 %v752_v45, %v749_v44  ;;  %1723 = vmatprep.subr.bf16.mxu1 %v6206_v33 }
 0x12f   : > { %v1039_v50 = vpack.c.bf16 %v744_v48, %v741_v47 }
 0x131   : > { %v5257_v51 = vpop.f32.mrb[28].mxu0  ;;  %1724 = vmatpush1.bf16.msra.mxu1 %v1039_v50 }
 0x132   : > { %v756_v52 = vpop.f32.mrb[29].mxu0  ;;  %1725 = vmatprep.subr.bf16.mxu1 %v6206_v33  ;;  %v765_v54 = vadd.f32 %v5257_v51, %v6327_v43 }
 0x133   : > { %v5258_v53 = vpop.f32.mrb[30].mxu0  ;;  %v757_v57 = vadd.f32 %v6327_v43, %v756_v52  ;;  %v5868_v52 = vld [vmem:[%s7578_s1 + $0x80] ss:$16 sps:$4 sm:$0xff]  }
 0x134   : > { %v768_v55 = vadd.f32 %v5258_v53, %v6327_v43  ;;  %v759_v56 = vpop.f32.mrb[31].mxu0 }
 0x135   : > { %v760_v58 = vadd.f32 %v6327_v43, %v759_v56  ;;  %1726 = vmatpush1.bf16.msra.mxu1 %v1040_v49 }
 0x136   : > { %v1042_v59 = vpack.c.bf16 %v768_v55, %v765_v54  ;;  %1727 = vmatprep.subr.bf16.mxu1 %v6206_v33  ;;  %v5869_v55 = vld [vmem:[%s7578_s1 + $0xa4] ss:$16 sps:$4 sm:$0xff]  }
 0x137   : > { %v1041_v60 = vpack.c.bf16 %v760_v58, %v757_v57 }
 0x139   : > { %1728 = vmatpush1.bf16.msra.mxu1 %v1041_v60  ;;  %v5261_v61 = vpop.f32.mrb[32].mxu0 }
 0x13a   : > { %v781_v62 = vadd.f32 %v5261_v61, %v6327_v43  ;;  %v772_v63 = vpop.f32.mrb[33].mxu0  ;;  %1729 = vmatprep.subr.bf16.mxu1 %v6206_v33 }
 0x13b   : > { %v773_v0 = vadd.f32 %v6327_v43, %v772_v63  ;;  %v5262_v1 = vpop.f32.mrb[34].mxu0 }
 0x13c   : > { %v784_v2 = vadd.f32 %v5262_v1, %v6327_v43  ;;  %v775_v3 = vpop.f32.mrb[35].mxu0 }
 0x13d   : > { %v776_v5 = vadd.f32 %v6327_v43, %v775_v3  ;;  %1730 = vmatpush1.bf16.msra.mxu1 %v1042_v59  ;;  %v5872_v3 = vld [vmem:[%s7578_s1 + $0xc4] ss:$16 sps:$4 sm:$0xff]  }
 0x13e   : > { %v1044_v7 = vpack.c.bf16 %v784_v2, %v781_v62  ;;  %1988 = vmatprep.subr.bf16.mxu1 %v6206_v33 }
 0x13f   : > { %v1043_v8 = vpack.c.bf16 %v776_v5, %v773_v0  ;;  %v5871_v0 = vld [vmem:[%s7578_s1 + $0xa0] ss:$16 sps:$4 sm:$0xff]  }
 0x140   : > { %1732 = vmatmul.mubr.bf16.vlgmr.msra.gmra.mrb[0].mxu1 %v5852_v4 }
 0x141   : > { %1989 = vmatpush1.bf16.msra.mxu1 %v1043_v8  ;;  %1739 = vmatprep.mubr.bf16.mxu1 %v5857_v6  ;;  %v5265_v9 = vpop.f32.mrb[36].mxu0  ;;  %v5875_v8 = vld [vmem:[%s7578_s1 + $0xe4] ss:$16 sps:$4 sm:$0xff]  }
 0x142   : > { %1990 = vmatprep.subr.bf16.mxu1 %v6206_v33  ;;  %v797_v10 = vadd.f32 %v5265_v9, %v6327_v43  ;;  %v788_v11 = vpop.f32.mrb[37].mxu0  ;;  %v5877_v9 = vld [vmem:[%s7578_s1 + $0xe0] ss:$16 sps:$4 sm:$0xff]  }
 0x143   : > { %v789_v12 = vadd.f32 %v6327_v43, %v788_v11  ;;  %v5266_v13 = vpop.f32.mrb[38].mxu0  ;;  %v5880_v11 = vld [vmem:[%s7578_s1 + $0x100] ss:$16 sps:$4 sm:$0xff]  }
 0x144   : > { %v800_v15 = vadd.f32 %v5266_v13, %v6327_v43  ;;  %v791_v16 = vpop.f32.mrb[39].mxu0 }
 0x145   : > { %1991 = vmatpush1.bf16.msra.mxu1 %v1044_v7  ;;  %v792_v18 = vadd.f32 %v6327_v43, %v791_v16  ;;  %v5874_v7 = vld [vmem:[%s7578_s1 + $0xc0] ss:$16 sps:$4 sm:$0xff]  }
 0x146   : > { %v1046_v19 = vpack.c.bf16 %v800_v15, %v797_v10  ;;  %1992 = vmatprep.subr.bf16.mxu1 %v6206_v33  ;;  %v5878_v10 = vld [vmem:[%s7578_s1 + $0x104] ss:$16 sps:$4 sm:$0xff]  }
 0x147   : > { %v1045_v20 = vpack.c.bf16 %v792_v18, %v789_v12  ;;  %v5881_v12 = vld [vmem:[%s7578_s1 + $0x124] ss:$16 sps:$4 sm:$0xff]  }
 0x148   : > { %1740 = vmatmul.mubr.bf16.gmra.mrb[4].mxu1 %v5859_v14 }
 0x149   : > { %1747 = vmatprep.mubr.bf16.mxu1 %v5860_v17  ;;  %1993 = vmatpush1.bf16.msra.mxu1 %v1045_v20  ;;  %v5269_v21 = vpop.f32.mrb[40].mxu0 }
 0x14a   : > { %1994 = vmatprep.subr.bf16.mxu1 %v6206_v33  ;;  %v813_v22 = vadd.f32 %v5269_v21, %v6327_v43  ;;  %v804_v23 = vpop.f32.mrb[41].mxu0 }
 0x14b   : > { %v805_v24 = vadd.f32 %v6327_v43, %v804_v23  ;;  %v5270_v25 = vpop.f32.mrb[42].mxu0  ;;  %v5883_v23 = vld [vmem:[%s7578_s1 + $0x120] ss:$16 sps:$4 sm:$0xff]  }
 0x14c   : > { %v816_v27 = vadd.f32 %v5270_v25, %v6327_v43  ;;  %v807_v28 = vpop.f32.mrb[43].mxu0  ;;  %v5886_v25 = vld [vmem:[%s7578_s1 + $0x140] ss:$16 sps:$4 sm:$0xff]  }
 0x14d   : > { %1995 = vmatpush1.bf16.msra.mxu1 %v1046_v19  ;;  %v808_v30 = vadd.f32 %v6327_v43, %v807_v28  ;;  %v5890_v28 = vld [vmem:[%s7578_s1 + $0x184] ss:$16 sps:$4 sm:$0xff]  }
 0x14e   : > { %v1048_v31 = vpack.c.bf16 %v816_v27, %v813_v22  ;;  %1996 = vmatprep.subr.bf16.mxu1 %v6206_v33  ;;  %v5889_v27 = vld [vmem:[%s7578_s1 + $0x160] ss:$16 sps:$4 sm:$0xff]  }
 0x14f   : > { %v1047_v32 = vpack.c.bf16 %v808_v30, %v805_v24  ;;  %v5884_v24 = vld [vmem:[%s7578_s1 + $0x144] ss:$16 sps:$4 sm:$0xff]  }
 0x150   : > { %1748 = vmatmul.mubr.bf16.gmra.mrb[8].mxu1 %v5862_v26  ;;  %v5887_v26 = vld [vmem:[%s7578_s1 + $0x164] ss:$16 sps:$4 sm:$0xff]  }
 0x151   : > { %1755 = vmatprep.mubr.bf16.mxu1 %v5863_v29  ;;  %1997 = vmatpush1.bf16.msra.mxu1 %v1047_v32  ;;  %v5273_v34 = vpop.f32.mrb[44].mxu0  ;;  %v5892_v32 = vld [vmem:[%s7578_s1 + $0x180] ss:$16 sps:$4 sm:$0xff]  }
 0x152   : > { %1998 = vmatprep.subr.bf16.mxu1 %v6206_v33  ;;  %v829_v35 = vadd.f32 %v5273_v34, %v6327_v43  ;;  %v820_v36 = vpop.f32.mrb[45].mxu0 }
 0x153   : > { %v821_v37 = vadd.f32 %v6327_v43, %v820_v36  ;;  %v5274_v38 = vpop.f32.mrb[46].mxu0  ;;  %v5893_v36 = vld [vmem:[%s7578_s1 + $0x1a4] ss:$16 sps:$4 sm:$0xff]  }
 0x154   : > { %v832_v40 = vadd.f32 %v5274_v38, %v6327_v43  ;;  %v823_v41 = vpop.f32.mrb[47].mxu0 }
 0x155   : > { %1999 = vmatpush1.bf16.msra.mxu1 %v1048_v31  ;;  %v824_v44 = vadd.f32 %v6327_v43, %v823_v41 }
 0x156   : > { %v1050_v45 = vpack.c.bf16 %v832_v40, %v829_v35  ;;  %2000 = vmatprep.subr.bf16.mxu1 %v6206_v33 }
 0x157   : > { %v1049_v46 = vpack.c.bf16 %v824_v44, %v821_v37  ;;  %v5896_v44 = vld [vmem:[%s7578_s1 + $0x1c4] ss:$16 sps:$4 sm:$0xff]  }
 0x158   : > { %1756 = vmatmul.mubr.bf16.gmra.mrb[12].mxu1 %v5865_v39 }
 0x159   : > { %1763 = vmatprep.mubr.bf16.mxu1 %v5866_v42  ;;  %2001 = vmatpush1.bf16.msra.mxu1 %v1049_v46  ;;  %v5277_v47 = vpop.f32.mrb[48].mxu0  ;;  %v5895_v42 = vld [vmem:[%s7578_s1 + $0x1a0] ss:$16 sps:$4 sm:$0xff]  }
 0x15a   : > { %2002 = vmatprep.subr.bf16.mxu1 %v6206_v33  ;;  %v845_v48 = vadd.f32 %v5277_v47, %v6327_v43  ;;  %v836_v49 = vpop.f32.mrb[49].mxu0  ;;  %v5901_v46 = vld [vmem:[%s7578_s1 + $0x1e0] ss:$16 sps:$4 sm:$0xff]   ;;  %v5902_v47 = vld [vmem:[%s7578_s1 + $0x204] ss:$16 sps:$4 sm:$0xff]  }
 0x15b   : > { %v837_v50 = vadd.f32 %v6327_v43, %v836_v49  ;;  %v5278_v51 = vpop.f32.mrb[50].mxu0  ;;  %v5905_v49 = vld [vmem:[%s7578_s1 + $0x224] ss:$16 sps:$4 sm:$0xff]  }
 0x15c   : > { %v848_v53 = vadd.f32 %v5278_v51, %v6327_v43  ;;  %v839_v54 = vpop.f32.mrb[51].mxu0  ;;  %v5908_v51 = vld [vmem:[%s7578_s1 + $0x244] ss:$16 sps:$4 sm:$0xff]  }
 0x15d   : > { %2003 = vmatpush1.bf16.msra.mxu1 %v1050_v45  ;;  %v840_v56 = vadd.f32 %v6327_v43, %v839_v54  ;;  %v5899_v45 = vld [vmem:[%s7578_s1 + $0x1e4] ss:$16 sps:$4 sm:$0xff]   ;;  %v5913_v54 = vld [vmem:[%s7578_s1 + $0x260] ss:$16 sps:$4 sm:$0xff]  }
 0x15e   : > { %v1052_v57 = vpack.c.bf16 %v848_v53, %v845_v48  ;;  %2004 = vmatprep.subr.bf16.mxu1 %v6206_v33  ;;  %v5904_v48 = vld [vmem:[%s7578_s1 + $0x200] ss:$16 sps:$4 sm:$0xff]   ;;  %v5911_v53 = vld [vmem:[%s7578_s1 + $0x264] ss:$16 sps:$4 sm:$0xff]  }
 0x15f   : > { %v1051_v58 = vpack.c.bf16 %v840_v56, %v837_v50  ;;  %v5907_v50 = vld [vmem:[%s7578_s1 + $0x220] ss:$16 sps:$4 sm:$0xff]  }
 0x160   : > { %1764 = vmatmul.mubr.bf16.gmra.mrb[16].mxu1 %v5868_v52  ;;  %v5910_v52 = vld [vmem:[%s7578_s1 + $0x240] ss:$16 sps:$4 sm:$0xff]  }
 0x161   : > { %1771 = vmatprep.mubr.bf16.mxu1 %v5869_v55  ;;  %2005 = vmatpush1.bf16.msra.mxu1 %v1051_v58  ;;  %v5281_v59 = vpop.f32.mrb[52].mxu0  ;;  %v5914_v55 = vld [vmem:[%s7578_s1 + $0x284] ss:$16 sps:$4 sm:$0xff]   ;;  %v5916_v56 = vld [vmem:[%s7578_s1 + $0x280] ss:$16 sps:$4 sm:$0xff]  }
 0x162   : > { %2006 = vmatprep.subr.bf16.mxu1 %v6206_v33  ;;  %v861_v60 = vadd.f32 %v5281_v59, %v6327_v43  ;;  %v852_v61 = vpop.f32.mrb[53].mxu0  ;;  %v5919_v58 = vld [vmem:[%s7578_s1 + $0x2a0] ss:$16 sps:$4 sm:$0xff]   ;;  %v5920_v59 = vld [vmem:[%s7578_s1 + $0x2c4] ss:$16 sps:$4 sm:$0xff]  }
 0x163   : > { %v853_v62 = vadd.f32 %v6327_v43, %v852_v61  ;;  %v5282_v63 = vpop.f32.mrb[54].mxu0  ;;  %v5923_v61 = vld [vmem:[%s7578_s1 + $0x2e4] ss:$16 sps:$4 sm:$0xff]  }
 0x164   : > { %v864_v1 = vadd.f32 %v5282_v63, %v6327_v43  ;;  %v855_v2 = vpop.f32.mrb[55].mxu0  ;;  %v5926_v63 = vld [vmem:[%s7578_s1 + $0x304] ss:$16 sps:$4 sm:$0xff]  }
 0x165   : > { %2007 = vmatpush1.bf16.msra.mxu1 %v1052_v57  ;;  %v856_v4 = vadd.f32 %v6327_v43, %v855_v2  ;;  %v5917_v57 = vld [vmem:[%s7578_s1 + $0x2a4] ss:$16 sps:$4 sm:$0xff]   ;;  %v5931_v2 = vld [vmem:[%s7578_s1 + $0x320] ss:$16 sps:$4 sm:$0xff]  }
 0x166   : > { %v1054_v5 = vpack.c.bf16 %v864_v1, %v861_v60  ;;  %2008 = vmatprep.subr.bf16.mxu1 %v6206_v33  ;;  %v5922_v60 = vld [vmem:[%s7578_s1 + $0x2c0] ss:$16 sps:$4 sm:$0xff]   ;;  %v5929_v1 = vld [vmem:[%s7578_s1 + $0x324] ss:$16 sps:$4 sm:$0xff]  }
 0x167   : > { %v1053_v6 = vpack.c.bf16 %v856_v4, %v853_v62  ;;  %v5925_v62 = vld [vmem:[%s7578_s1 + $0x2e0] ss:$16 sps:$4 sm:$0xff]  }
 0x168   : > { %1772 = vmatmul.mubr.bf16.gmra.mrb[20].mxu1 %v5871_v0  ;;  %v5928_v0 = vld [vmem:[%s7578_s1 + $0x300] ss:$16 sps:$4 sm:$0xff]  }
 0x169   : > { %1779 = vmatprep.mubr.bf16.mxu1 %v5872_v3  ;;  %2009 = vmatpush1.bf16.msra.mxu1 %v1053_v6  ;;  %v5285_v13 = vpop.f32.mrb[56].mxu0  ;;  %v5932_v3 = vld [vmem:[%s7578_s1 + $0x344] ss:$16 sps:$4 sm:$0xff]   ;;  %v5934_v4 = vld [vmem:[%s7578_s1 + $0x340] ss:$16 sps:$4 sm:$0xff]  }
 0x16a   : > { %2010 = vmatprep.subr.bf16.mxu1 %v6206_v33  ;;  %v877_v14 = vadd.f32 %v5285_v13, %v6327_v43  ;;  %v868_v15 = vpop.f32.mrb[57].mxu0  ;;  %v5937_v6 = vld [vmem:[%s7578_s1 + $0x360] ss:$16 sps:$4 sm:$0xff]   ;;  %v5947_v13 = vld [vmem:[%s7578_s1 + $0x3e4] ss:$16 sps:$4 sm:$0xff]  }
 0x16b   : > { %v869_v16 = vadd.f32 %v6327_v43, %v868_v15  ;;  %v5286_v17 = vpop.f32.mrb[58].mxu0  ;;  %v5952_v15 = vld [vmem:[%s7578_s1 + $0xc] ss:$16 sps:$4 sm:$0xff]  }
 0x16c   : > { %v880_v18 = vadd.f32 %v5286_v17, %v6327_v43  ;;  %v871_v19 = vpop.f32.mrb[59].mxu0  ;;  %v5953_v17 = vld [vmem:[%s7578_s1 + $0x2c] ss:$16 sps:$4 sm:$0xff]  }
 0x16d   : > { %2011 = vmatpush1.bf16.msra.mxu1 %v1054_v5  ;;  %v872_v20 = vadd.f32 %v6327_v43, %v871_v19  ;;  %v5935_v5 = vld [vmem:[%s7578_s1 + $0x364] ss:$16 sps:$4 sm:$0xff]   ;;  %v5956_v19 = vld [vmem:[%s7578_s1 + $0x4c] ss:$16 sps:$4 sm:$0xff]  }
 0x16e   : > { %2012 = vmatprep.subr.bf16.mxu1 %v6206_v33  ;;  %v1056_v21 = vpack.c.bf16 %v880_v18, %v877_v14  ;;  %v5949_v14 = vld [vmem:[%s7578_s1 + $0x3e0] ss:$16 sps:$4 sm:$0xff]   ;;  %v5955_v18 = vld [vmem:[%s7578_s1 + $0x28] ss:$16 sps:$4 sm:$0xff]  }
 0x16f   : > { %v1055_v22 = vpack.c.bf16 %v872_v20, %v869_v16  ;;  %v5950_v16 = vld [vmem:[%s7578_s1 + $0x8] ss:$16 sps:$4 sm:$0xff]  }
 0x170   : > { %1780 = vmatmul.mubr.bf16.gmra.mrb[24].mxu1 %v5874_v7  ;;  %v5938_v7 = vld [vmem:[%s7578_s1 + $0x384] ss:$16 sps:$4 sm:$0xff]   ;;  %v5958_v20 = vld [vmem:[%s7578_s1 + $0x48] ss:$16 sps:$4 sm:$0xff]  }
 0x171   : > { %1787 = vmatprep.mubr.bf16.mxu1 %v5875_v8  ;;  %2013 = vmatpush1.bf16.msra.mxu1 %v1055_v22  ;;  %v5289_v29 = vpop.f32.mrb[60].mxu0  ;;  %v5940_v8 = vld [vmem:[%s7578_s1 + $0x380] ss:$16 sps:$4 sm:$0xff]   ;;  %v5961_v22 = vld [vmem:[%s7578_s1 + $0x68] ss:$16 sps:$4 sm:$0xff]  }
 0x172   : > { %2014 = vmatprep.subr.bf16.mxu1 %v6206_v33  ;;  %v893_v30 = vadd.f32 %v5289_v29, %v6327_v43  ;;  %v884_v31 = vpop.f32.mrb[61].mxu0  ;;  %v5970_v29 = vld [vmem:[%s7578_s1 + $0xc8] ss:$16 sps:$4 sm:$0xff]  }
 0x173   : > { %v885_v34 = vadd.f32 %v6327_v43, %v884_v31  ;;  %v5290_v35 = vpop.f32.mrb[62].mxu0  ;;  %v6020_v31 = vld [vmem:[%s7581_s4 + $0x8] sm:$0xff]  }
 0x174   : > { %v896_v37 = vadd.f32 %v5290_v35, %v6327_v43  ;;  %v887_v38 = vpop.f32.mrb[63].mxu0  ;;  %v5976_v35 = vld [vmem:[%s7578_s1 + $0x108] ss:$16 sps:$4 sm:$0xff]  }
 0x175   : > { %2015 = vmatpush1.bf16.msra.mxu1 %v1056_v21  ;;  %v888_v39 = vadd.f32 %v6327_v43, %v887_v38  ;;  %v5898_v43 = vld [vmem:[%s7578_s1 + $0x1c0] ss:$16 sps:$4 sm:$0xff]   ;;  %v5959_v21 = vld [vmem:[%s7578_s1 + $0x6c] ss:$16 sps:$4 sm:$0xff]   ;;  %v5979_v38 = vld [vmem:[%s7578_s1 + $0x128] ss:$16 sps:$4 sm:$0xff]  }
 0x176   : > { %2016 = vmatprep.subr.bf16.mxu1 %v6206_v33  ;;  %v1058_v40 = vpack.c.bf16 %v896_v37, %v893_v30  ;;  %v5971_v30 = vld [vmem:[%s7578_s1 + $0xec] ss:$16 sps:$4 sm:$0xff]   ;;  %v6027_v37 = vld [vmem:[%s7581_s4 + $0x10] sm:$0xff]  }
 0x177   : > { %v1057_v41 = vpack.c.bf16 %v888_v39, %v885_v34  ;;  %v5974_v34 = vld [vmem:[%s7578_s1 + $0x10c] ss:$16 sps:$4 sm:$0xff]  }
 0x178   : > { %1788 = vmatmul.mubr.bf16.gmra.mrb[28].mxu1 %v5877_v9  ;;  %v5941_v9 = vld [vmem:[%s7578_s1 + $0x3a4] ss:$16 sps:$4 sm:$0xff]   ;;  %v5980_v39 = vld [vmem:[%s7578_s1 + $0x14c] ss:$16 sps:$4 sm:$0xff]  }
 0x179   : > { %1795 = vmatprep.mubr.bf16.mxu1 %v5878_v10  ;;  %2017 = vmatpush1.bf16.msra.mxu1 %v1057_v41  ;;  %v5943_v10 = vld [vmem:[%s7578_s1 + $0x3a0] ss:$16 sps:$4 sm:$0xff]   ;;  %v5982_v41 = vld [vmem:[%s7578_s1 + $0x148] ss:$16 sps:$4 sm:$0xff]  }
 0x17a   : > { %2018 = vmatprep.subr.bf16.mxu1 %v6206_v33 }
 0x17d   : > { %2019 = vmatpush1.bf16.msra.mxu1 %v1058_v40  ;;  %v6031_v40 = vld [vmem:[%s7581_s4 + $0x18] sm:$0xff]  }
 0x180   : > { %1796 = vmatmul.mubr.bf16.gmra.mrb[32].mxu1 %v5880_v11  ;;  %v5944_v11 = vld [vmem:[%s7578_s1 + $0x3c4] ss:$16 sps:$4 sm:$0xff]  }
 0x181   : > { %1803 = vmatprep.mubr.bf16.mxu1 %v5881_v12  ;;  %v5946_v12 = vld [vmem:[%s7578_s1 + $0x3c0] ss:$16 sps:$4 sm:$0xff]  }
 0x188   : > { %1804 = vmatmul.mubr.bf16.gmra.mrb[36].mxu1 %v5883_v23  ;;  %v5962_v23 = vld [vmem:[%s7578_s1 + $0x8c] ss:$16 sps:$4 sm:$0xff]  }
 0x189   : > { %1811 = vmatprep.mubr.bf16.mxu1 %v5884_v24  ;;  %v5964_v24 = vld [vmem:[%s7578_s1 + $0x88] ss:$16 sps:$4 sm:$0xff]  }
 0x190   : > { %1812 = vmatmul.mubr.bf16.gmra.mrb[40].mxu1 %v5886_v25  ;;  %v5965_v25 = vld [vmem:[%s7578_s1 + $0xac] ss:$16 sps:$4 sm:$0xff]  }
 0x191   : > { %1819 = vmatprep.mubr.bf16.mxu1 %v5887_v26  ;;  %v6013_v26 = vld [vmem:[%s7581_s4] sm:$0xff]  }
 0x192   : > { %5291 = vmatprep.subr.bf16.mxu0 %v6013_v26 }
 0x193   : > { %5292 = vmatpush3.bf16.msra.mxu0 %v6013_v26  ;;  %v6045_v26 = vld [vmem:[%s7578_s1 + $0x3ac] ss:$16 sps:$4 sm:$0xff]  }
 0x194   : > { %5293 = vmatprep.subr.bf16.mxu0 %v6020_v31 }
 0x197   : > { %5294 = vmatpush3.bf16.msra.mxu0 %v6020_v31  ;;  %v6047_v31 = vld [vmem:[%s7578_s1 + $0x3a8] ss:$16 sps:$4 sm:$0xff]  }
 0x198   : > { %1820 = vmatmul.mubr.bf16.gmra.mrb[44].mxu1 %v5889_v27  ;;  %v5967_v27 = vld [vmem:[%s7578_s1 + $0xa8] ss:$16 sps:$4 sm:$0xff]   ;;  %5295 = vmatprep.subr.bf16.mxu0 %v6027_v37 }
 0x199   : > { %1827 = vmatprep.mubr.bf16.mxu1 %v5890_v28  ;;  %v5968_v28 = vld [vmem:[%s7578_s1 + $0xcc] ss:$16 sps:$4 sm:$0xff]  }
 0x19b   : > { %5296 = vmatpush3.bf16.msra.mxu0 %v6027_v37 }
 0x19c   : > { %5297 = vmatprep.subr.bf16.mxu0 %v6031_v40 }
 0x19f   : > { %5298 = vmatpush3.bf16.msra.mxu0 %v6031_v40 }
 0x1a0   : > { %1828 = vmatmul.mubr.bf16.gmra.mrb[48].mxu1 %v5892_v32  ;;  %v5973_v32 = vld [vmem:[%s7578_s1 + $0xe8] ss:$16 sps:$4 sm:$0xff]  }
 0x1a1   : > { %1835 = vmatprep.mubr.bf16.mxu1 %v5893_v36  ;;  %v5977_v36 = vld [vmem:[%s7578_s1 + $0x12c] ss:$16 sps:$4 sm:$0xff]  }
 0x1a8   : > { %1836 = vmatmul.mubr.bf16.gmra.mrb[52].mxu1 %v5895_v42  ;;  %v5983_v42 = vld [vmem:[%s7578_s1 + $0x16c] ss:$16 sps:$4 sm:$0xff]  }
 0x1a9   : > { %1843 = vmatprep.mubr.bf16.mxu1 %v5896_v44  ;;  %v6035_v44 = vld [vmem:[%s7581_s4 + $0x20] sm:$0xff]  }
 0x1aa   : > { %5299 = vmatprep.subr.bf16.mxu0 %v6035_v44 }
 0x1ab   : > { %5300 = vmatpush3.bf16.msra.mxu0 %v6035_v44 }
 0x1b0   : > { %1844 = vmatmul.mubr.bf16.gmra.mrb[56].mxu1 %v5898_v43  ;;  %v6036_v43 = vld [vmem:[%s7581_s4 + $0x28] sm:$0xff]  }
 0x1b1   : > { %1851 = vmatprep.mubr.bf16.mxu1 %v5899_v45  ;;  %v5985_v45 = vld [vmem:[%s7578_s1 + $0x168] ss:$16 sps:$4 sm:$0xff]   ;;  %5301 = vmatprep.subr.bf16.mxu0 %v6036_v43 }
 0x1b2   : > { %5302 = vmatpush3.bf16.msra.mxu0 %v6036_v43 }
 0x1b8   : > { %1852 = vmatmul.mubr.bf16.gmra.mrb[60].mxu1 %v5901_v46  ;;  %v5986_v46 = vld [vmem:[%s7578_s1 + $0x18c] ss:$16 sps:$4 sm:$0xff]  }
 0x1b9   : > { %1859 = vmatprep.mubr.bf16.mxu1 %v5902_v47  ;;  %v6040_v47 = vld [vmem:[%s7581_s4 + $0x30] sm:$0xff]  }
 0x1ba   : > { %5303 = vmatprep.subr.bf16.mxu0 %v6040_v47 }
 0x1bb   : > { %5304 = vmatpush3.bf16.msra.mxu0 %v6040_v47 }
 0x1c0   : > { %1860 = vmatmul.mubr.bf16.gmra.mrb[64].mxu1 %v5904_v48  ;;  %v6041_v48 = vld [vmem:[%s7581_s4 + $0x38] sm:$0xff]  }
 0x1c1   : > { %1867 = vmatprep.mubr.bf16.mxu1 %v5905_v49  ;;  %v5988_v49 = vld [vmem:[%s7578_s1 + $0x188] ss:$16 sps:$4 sm:$0xff]   ;;  %5305 = vmatprep.subr.bf16.mxu0 %v6041_v48 }
 0x1c2   : > { %5306 = vmatpush3.bf16.msra.mxu0 %v6041_v48 }
 0x1c3   : > { %2763 = vmatprep.subr.bf16.mxu0 %v6206_v33 }
 0x1c8   : > { %1868 = vmatmul.mubr.bf16.gmra.mrb[68].mxu1 %v5907_v50  ;;  %v5989_v50 = vld [vmem:[%s7578_s1 + $0x1ac] ss:$16 sps:$4 sm:$0xff]  }
 0x1c9   : > { %1875 = vmatprep.mubr.bf16.mxu1 %v5908_v51  ;;  %v5991_v51 = vld [vmem:[%s7578_s1 + $0x1a8] ss:$16 sps:$4 sm:$0xff]  }
 0x1d0   : > { %1876 = vmatmul.mubr.bf16.gmra.mrb[72].mxu1 %v5910_v52  ;;  %v5992_v52 = vld [vmem:[%s7578_s1 + $0x1cc] ss:$16 sps:$4 sm:$0xff]  }
 0x1d1   : > { %1883 = vmatprep.mubr.bf16.mxu1 %v5911_v53  ;;  %v5994_v53 = vld [vmem:[%s7578_s1 + $0x1c8] ss:$16 sps:$4 sm:$0xff]  }
 0x1d8   : > { %1884 = vmatmul.mubr.bf16.gmra.mrb[76].mxu1 %v5913_v54  ;;  %v5995_v54 = vld [vmem:[%s7578_s1 + $0x1ec] ss:$16 sps:$4 sm:$0xff]  }
 0x1d9   : > { %1891 = vmatprep.mubr.bf16.mxu1 %v5914_v55  ;;  %v5997_v55 = vld [vmem:[%s7578_s1 + $0x1e8] ss:$16 sps:$4 sm:$0xff]  }
 0x1e0   : > { %1892 = vmatmul.mubr.bf16.gmra.mrb[80].mxu1 %v5916_v56  ;;  %v5998_v56 = vld [vmem:[%s7578_s1 + $0x20c] ss:$16 sps:$4 sm:$0xff]  }
 0x1e1   : > { %1899 = vmatprep.mubr.bf16.mxu1 %v5917_v57  ;;  %v6000_v57 = vld [vmem:[%s7578_s1 + $0x208] ss:$16 sps:$4 sm:$0xff]  }
 0x1e8   : > { %1900 = vmatmul.mubr.bf16.gmra.mrb[84].mxu1 %v5919_v58  ;;  %v6001_v58 = vld [vmem:[%s7578_s1 + $0x22c] ss:$16 sps:$4 sm:$0xff]  }
 0x1e9   : > { %1907 = vmatprep.mubr.bf16.mxu1 %v5920_v59  ;;  %v6003_v59 = vld [vmem:[%s7578_s1 + $0x228] ss:$16 sps:$4 sm:$0xff]  }
 0x1f0   : > { %1908 = vmatmul.mubr.bf16.gmra.mrb[88].mxu1 %v5922_v60  ;;  %v6004_v60 = vld [vmem:[%s7578_s1 + $0x24c] ss:$16 sps:$4 sm:$0xff]  }
 0x1f1   : > { %1915 = vmatprep.mubr.bf16.mxu1 %v5923_v61  ;;  %v6006_v61 = vld [vmem:[%s7578_s1 + $0x248] ss:$16 sps:$4 sm:$0xff]  }
 0x1f8   : > { %1916 = vmatmul.mubr.bf16.gmra.mrb[92].mxu1 %v5925_v62  ;;  %v6007_v62 = vld [vmem:[%s7578_s1 + $0x26c] ss:$16 sps:$4 sm:$0xff]  }
 0x1f9   : > { %1923 = vmatprep.mubr.bf16.mxu1 %v5926_v63  ;;  %v6009_v63 = vld [vmem:[%s7578_s1 + $0x268] ss:$16 sps:$4 sm:$0xff]  }
 0x200   : > { %1924 = vmatmul.mubr.bf16.gmra.mrb[96].mxu1 %v5928_v0  ;;  %v6010_v0 = vld [vmem:[%s7578_s1 + $0x28c] ss:$16 sps:$4 sm:$0xff]  }
 0x201   : > { %1931 = vmatprep.mubr.bf16.mxu1 %v5929_v1  ;;  %v6012_v1 = vld [vmem:[%s7578_s1 + $0x288] ss:$16 sps:$4 sm:$0xff]  }
 0x208   : > { %1932 = vmatmul.mubr.bf16.gmra.mrb[100].mxu1 %v5931_v2  ;;  %v6014_v2 = vld [vmem:[%s7578_s1 + $0x2ac] ss:$16 sps:$4 sm:$0xff]  }
 0x209   : > { %1939 = vmatprep.mubr.bf16.mxu1 %v5932_v3  ;;  %v6016_v3 = vld [vmem:[%s7578_s1 + $0x2a8] ss:$16 sps:$4 sm:$0xff]  }
 0x210   : > { %1940 = vmatmul.mubr.bf16.gmra.mrb[104].mxu1 %v5934_v4  ;;  %v6017_v4 = vld [vmem:[%s7578_s1 + $0x2cc] ss:$16 sps:$4 sm:$0xff]  }
 0x211   : > { %1947 = vmatprep.mubr.bf16.mxu1 %v5935_v5  ;;  %v6019_v5 = vld [vmem:[%s7578_s1 + $0x2c8] ss:$16 sps:$4 sm:$0xff]  }
 0x218   : > { %1948 = vmatmul.mubr.bf16.gmra.mrb[108].mxu1 %v5937_v6  ;;  %v6021_v6 = vld [vmem:[%s7578_s1 + $0x2ec] ss:$16 sps:$4 sm:$0xff]  }
 0x219   : > { %1955 = vmatprep.mubr.bf16.mxu1 %v5938_v7  ;;  %v6023_v7 = vld [vmem:[%s7578_s1 + $0x2e8] ss:$16 sps:$4 sm:$0xff]  }
 0x220   : > { %1956 = vmatmul.mubr.bf16.gmra.mrb[112].mxu1 %v5940_v8  ;;  %v6024_v8 = vld [vmem:[%s7578_s1 + $0x30c] ss:$16 sps:$4 sm:$0xff]  }
 0x221   : > { %1963 = vmatprep.mubr.bf16.mxu1 %v5941_v9  ;;  %v6026_v9 = vld [vmem:[%s7578_s1 + $0x308] ss:$16 sps:$4 sm:$0xff]  }
 0x228   : > { %1964 = vmatmul.mubr.bf16.gmra.mrb[116].mxu1 %v5943_v10  ;;  %v6028_v10 = vld [vmem:[%s7578_s1 + $0x32c] ss:$16 sps:$4 sm:$0xff]  }
 0x229   : > { %1971 = vmatprep.mubr.bf16.mxu1 %v5944_v11  ;;  %v6030_v11 = vld [vmem:[%s7578_s1 + $0x328] ss:$16 sps:$4 sm:$0xff]  }
 0x230   : > { %1972 = vmatmul.mubr.bf16.gmra.mrb[120].mxu1 %v5946_v12  ;;  %v6032_v12 = vld [vmem:[%s7578_s1 + $0x34c] ss:$16 sps:$4 sm:$0xff]  }
 0x231   : > { %1979 = vmatprep.mubr.bf16.mxu1 %v5947_v13  ;;  %v6034_v13 = vld [vmem:[%s7578_s1 + $0x348] ss:$16 sps:$4 sm:$0xff]  }
 0x238   : > { %1980 = vmatmul.mubr.bf16.gmra.mrb[124].mxu1 %v5949_v14  ;;  %v6037_v14 = vld [vmem:[%s7578_s1 + $0x36c] ss:$16 sps:$4 sm:$0xff]  }
 0x239   : > { %2020 = vmatprep.mubr.bf16.mxu1 %v5952_v15 }
 0x240   : > { %2021 = vmatmul.mubr.bf16.vlgmr.msra.gmra.mrb[0].mxu1 %v5950_v16 }
 0x241   : > { %2028 = vmatprep.mubr.bf16.mxu1 %v5953_v17  ;;  %v6039_v17 = vld [vmem:[%s7578_s1 + $0x368] ss:$16 sps:$4 sm:$0xff]  }
 0x248   : > { %2029 = vmatmul.mubr.bf16.gmra.mrb[4].mxu1 %v5955_v18 }
 0x249   : > { %2036 = vmatprep.mubr.bf16.mxu1 %v5956_v19  ;;  %v6042_v19 = vld [vmem:[%s7578_s1 + $0x38c] ss:$16 sps:$4 sm:$0xff]  }
 0x250   : > { %2037 = vmatmul.mubr.bf16.gmra.mrb[8].mxu1 %v5958_v20 }
 0x251   : > { %2044 = vmatprep.mubr.bf16.mxu1 %v5959_v21 }
 0x258   : > { %2045 = vmatmul.mubr.bf16.gmra.mrb[12].mxu1 %v5961_v22 }
 0x259   : > { %2052 = vmatprep.mubr.bf16.mxu1 %v5962_v23 }
 0x260   : > { %2053 = vmatmul.mubr.bf16.gmra.mrb[16].mxu1 %v5964_v24  ;;  %v6044_v24 = vld [vmem:[%s7578_s1 + $0x388] ss:$16 sps:$4 sm:$0xff]  }
 0x261   : > { %2060 = vmatprep.mubr.bf16.mxu1 %v5965_v25 }
 0x268   : > { %2061 = vmatmul.mubr.bf16.gmra.mrb[20].mxu1 %v5967_v27 }
 0x269   : > { %2068 = vmatprep.mubr.bf16.mxu1 %v5968_v28 }
 0x270   : > { %2069 = vmatmul.mubr.bf16.gmra.mrb[24].mxu1 %v5970_v29 }
 0x271   : > { %2076 = vmatprep.mubr.bf16.mxu1 %v5971_v30 }
 0x278   : > { %2077 = vmatmul.mubr.bf16.gmra.mrb[28].mxu1 %v5973_v32 }
 0x279   : > { %2084 = vmatprep.mubr.bf16.mxu1 %v5974_v34  ;;  %v6048_v34 = vld [vmem:[%s7578_s1 + $0x3cc] ss:$16 sps:$4 sm:$0xff]  }
 0x280   : > { %2085 = vmatmul.mubr.bf16.gmra.mrb[32].mxu1 %v5976_v35 }
 0x281   : > { %2092 = vmatprep.mubr.bf16.mxu1 %v5977_v36 }
 0x288   : > { %2093 = vmatmul.mubr.bf16.gmra.mrb[36].mxu1 %v5979_v38 }
 0x289   : > { %2100 = vmatprep.mubr.bf16.mxu1 %v5980_v39  ;;  %v6050_v39 = vld [vmem:[%s7578_s1 + $0x3c8] ss:$16 sps:$4 sm:$0xff]  }
 0x290   : > { %2101 = vmatmul.mubr.bf16.gmra.mrb[40].mxu1 %v5982_v41  ;;  %v6051_v41 = vld [vmem:[%s7578_s1 + $0x3ec] ss:$16 sps:$4 sm:$0xff]  }
 0x291   : > { %2108 = vmatprep.mubr.bf16.mxu1 %v5983_v42 }
 0x298   : > { %2109 = vmatmul.mubr.bf16.gmra.mrb[44].mxu1 %v5985_v45 }
 0x299   : > { %2116 = vmatprep.mubr.bf16.mxu1 %v5986_v46  ;;  %v6053_v46 = vld [vmem:[%s7578_s1 + $0x3e8] ss:$16 sps:$4 sm:$0xff]  }
 0x2a0   : > { %2117 = vmatmul.mubr.bf16.gmra.mrb[48].mxu1 %v5988_v49 }
 0x2a1   : > { %2124 = vmatprep.mubr.bf16.mxu1 %v5989_v50 }
 0x2a8   : > { %2125 = vmatmul.mubr.bf16.gmra.mrb[52].mxu1 %v5991_v51 }
 0x2a9   : > { %2132 = vmatprep.mubr.bf16.mxu1 %v5992_v52 }
 0x2b0   : > { %2133 = vmatmul.mubr.bf16.gmra.mrb[56].mxu1 %v5994_v53 }
 0x2b1   : > { %2140 = vmatprep.mubr.bf16.mxu1 %v5995_v54 }
 0x2b8   : > { %2141 = vmatmul.mubr.bf16.gmra.mrb[60].mxu1 %v5997_v55 }
 0x2b9   : > { %2148 = vmatprep.mubr.bf16.mxu1 %v5998_v56 }
 0x2c0   : > { %2149 = vmatmul.mubr.bf16.gmra.mrb[64].mxu1 %v6000_v57 }
 0x2c1   : > { %2156 = vmatprep.mubr.bf16.mxu1 %v6001_v58 }
 0x2c8   : > { %2157 = vmatmul.mubr.bf16.gmra.mrb[68].mxu1 %v6003_v59 }
 0x2c9   : > { %2164 = vmatprep.mubr.bf16.mxu1 %v6004_v60 }
 0x2d0   : > { %2165 = vmatmul.mubr.bf16.gmra.mrb[72].mxu1 %v6006_v61 }
 0x2d1   : > { %2172 = vmatprep.mubr.bf16.mxu1 %v6007_v62 }
 0x2d8   : > { %2173 = vmatmul.mubr.bf16.gmra.mrb[76].mxu1 %v6009_v63 }
 0x2d9   : > { %2180 = vmatprep.mubr.bf16.mxu1 %v6010_v0 }
 0x2e0   : > { %2181 = vmatmul.mubr.bf16.gmra.mrb[80].mxu1 %v6012_v1 }
 0x2e1   : > { %2188 = vmatprep.mubr.bf16.mxu1 %v6014_v2 }
 0x2e8   : > { %2189 = vmatmul.mubr.bf16.gmra.mrb[84].mxu1 %v6016_v3 }
 0x2e9   : > { %2196 = vmatprep.mubr.bf16.mxu1 %v6017_v4 }
 0x2f0   : > { %2197 = vmatmul.mubr.bf16.gmra.mrb[88].mxu1 %v6019_v5 }
 0x2f1   : > { %2204 = vmatprep.mubr.bf16.mxu1 %v6021_v6 }
 0x2f8   : > { %2205 = vmatmul.mubr.bf16.gmra.mrb[92].mxu1 %v6023_v7 }
 0x2f9   : > { %2212 = vmatprep.mubr.bf16.mxu1 %v6024_v8 }
 0x300   : > { %2213 = vmatmul.mubr.bf16.gmra.mrb[96].mxu1 %v6026_v9 }
 0x301   : > { %2220 = vmatprep.mubr.bf16.mxu1 %v6028_v10 }
 0x308   : > { %2221 = vmatmul.mubr.bf16.gmra.mrb[100].mxu1 %v6030_v11 }
 0x309   : > { %2228 = vmatprep.mubr.bf16.mxu1 %v6032_v12 }
 0x310   : > { %2229 = vmatmul.mubr.bf16.gmra.mrb[104].mxu1 %v6034_v13 }
 0x311   : > { %2236 = vmatprep.mubr.bf16.mxu1 %v6037_v14 }
 0x313   : > { %v2022_v15 = vpop.f32.mrb[0].mxu1 }
 0x314   : > { %v2024_v16 = vpop.f32.mrb[1].mxu1 }
 0x315   : > { %v2025_v18 = vpop.f32.mrb[2].mxu1 }
 0x316   : > { %v2294_v20 = vpack.c.bf16 %v2025_v18, %v2022_v15  ;;  %v2027_v21 = vpop.f32.mrb[3].mxu1 }
 0x318   : > { %2237 = vmatmul.mubr.bf16.gmra.mrb[108].mxu1 %v6039_v17  ;;  %5307 = vmatprep.mubr.bf16.mxu0 %v2294_v20 }
 0x319   : > { %2244 = vmatprep.mubr.bf16.mxu1 %v6042_v19 }
 0x31b   : > { %v2030_v22 = vpop.f32.mrb[4].mxu1 }
 0x31c   : > { %v2032_v23 = vpop.f32.mrb[5].mxu1 }
 0x31d   : > { %v2033_v25 = vpop.f32.mrb[6].mxu1 }
 0x31e   : > { %v2295_v27 = vpack.c.bf16 %v2033_v25, %v2030_v22  ;;  %v2035_v28 = vpop.f32.mrb[7].mxu1 }
 0x320   : > { %2245 = vmatmul.mubr.bf16.gmra.mrb[112].mxu1 %v6044_v24  ;;  %5308 = vmatmul.mubr.bf16.vlgmr.msra.gmra.mrb[64].mxu0 %v2295_v27 }
 0x321   : > { %2252 = vmatprep.mubr.bf16.mxu1 %v6045_v26 }
 0x323   : > { %v2038_v29 = vpop.f32.mrb[8].mxu1 }
 0x324   : > { %v2040_v30 = vpop.f32.mrb[9].mxu1 }
 0x325   : > { %v2041_v32 = vpop.f32.mrb[10].mxu1 }
 0x326   : > { %v2296_v35 = vpack.c.bf16 %v2041_v32, %v2038_v29  ;;  %v2043_v36 = vpop.f32.mrb[11].mxu1 }
 0x328   : > { %2253 = vmatmul.mubr.bf16.gmra.mrb[116].mxu1 %v6047_v31  ;;  %5311 = vmatprep.mubr.bf16.mxu0 %v2296_v35 }
 0x329   : > { %2260 = vmatprep.mubr.bf16.mxu1 %v6048_v34 }
 0x32b   : > { %v2046_v37 = vpop.f32.mrb[12].mxu1 }
 0x32c   : > { %v2048_v38 = vpop.f32.mrb[13].mxu1 }
 0x32d   : > { %v2049_v40 = vpop.f32.mrb[14].mxu1 }
 0x32e   : > { %v2297_v42 = vpack.c.bf16 %v2049_v40, %v2046_v37  ;;  %v2051_v44 = vpop.f32.mrb[15].mxu1 }
 0x330   : > { %2261 = vmatmul.mubr.bf16.gmra.mrb[120].mxu1 %v6050_v39  ;;  %5312 = vmatmul.mubr.bf16.gmra.mrb[68].mxu0 %v2297_v42 }
 0x331   : > { %2268 = vmatprep.mubr.bf16.mxu1 %v6051_v41 }
 0x333   : > { %v2054_v43 = vpop.f32.mrb[16].mxu1 }
 0x334   : > { %v2056_v45 = vpop.f32.mrb[17].mxu1 }
 0x335   : > { %v2057_v47 = vpop.f32.mrb[18].mxu1 }
 0x336   : > { %v2298_v48 = vpack.c.bf16 %v2057_v47, %v2054_v43  ;;  %v2059_v49 = vpop.f32.mrb[19].mxu1 }
 0x338   : > { %2269 = vmatmul.mubr.bf16.gmra.mrb[124].mxu1 %v6053_v46  ;;  %5315 = vmatprep.mubr.bf16.mxu0 %v2298_v48 }
 0x33b   : > { %v2062_v50 = vpop.f32.mrb[20].mxu1 }
 0x33c   : > { %v2064_v51 = vpop.f32.mrb[21].mxu1 }
 0x33d   : > { %v2065_v52 = vpop.f32.mrb[22].mxu1 }
 0x33e   : > { %v2299_v53 = vpack.c.bf16 %v2065_v52, %v2062_v50  ;;  %v2067_v54 = vpop.f32.mrb[23].mxu1 }
 0x340   : > { %5316 = vmatmul.mubr.bf16.gmra.mrb[72].mxu0 %v2299_v53 }
 0x343   : > { %v2070_v55 = vpop.f32.mrb[24].mxu1 }
 0x344   : > { %v2072_v56 = vpop.f32.mrb[25].mxu1 }
 0x345   : > { %v2073_v57 = vpop.f32.mrb[26].mxu1 }
 0x346   : > { %v2300_v58 = vpack.c.bf16 %v2073_v57, %v2070_v55  ;;  %v2075_v59 = vpop.f32.mrb[27].mxu1 }
 0x348   : > { %5319 = vmatprep.mubr.bf16.mxu0 %v2300_v58 }
 0x34b   : > { %v2078_v60 = vpop.f32.mrb[28].mxu1 }
 0x34c   : > { %v2080_v61 = vpop.f32.mrb[29].mxu1 }
 0x34d   : > { %v2081_v62 = vpop.f32.mrb[30].mxu1 }
 0x34e   : > { %v2301_v63 = vpack.c.bf16 %v2081_v62, %v2078_v60  ;;  %v2083_v0 = vpop.f32.mrb[31].mxu1 }
 0x350   : > { %5320 = vmatmul.mubr.bf16.gmra.mrb[76].mxu0 %v2301_v63 }
 0x353   : > { %v2086_v1 = vpop.f32.mrb[32].mxu1 }
 0x354   : > { %v2088_v2 = vpop.f32.mrb[33].mxu1 }
 0x355   : > { %v2089_v3 = vpop.f32.mrb[34].mxu1 }
 0x356   : > { %v2302_v4 = vpack.c.bf16 %v2089_v3, %v2086_v1  ;;  %v2091_v5 = vpop.f32.mrb[35].mxu1 }
 0x358   : > { %5323 = vmatprep.mubr.bf16.mxu0 %v2302_v4 }
 0x35b   : > { %v2094_v6 = vpop.f32.mrb[36].mxu1 }
 0x35c   : > { %v2096_v7 = vpop.f32.mrb[37].mxu1 }
 0x35d   : > { %v2097_v8 = vpop.f32.mrb[38].mxu1 }
 0x35e   : > { %v2303_v9 = vpack.c.bf16 %v2097_v8, %v2094_v6  ;;  %v2099_v10 = vpop.f32.mrb[39].mxu1 }
 0x360   : > { %5324 = vmatmul.mubr.bf16.gmra.mrb[80].mxu0 %v2303_v9 }
 0x363   : > { %v2102_v11 = vpop.f32.mrb[40].mxu1 }
 0x364   : > { %v2104_v12 = vpop.f32.mrb[41].mxu1 }
 0x365   : > { %v2105_v13 = vpop.f32.mrb[42].mxu1 }
 0x366   : > { %v2304_v14 = vpack.c.bf16 %v2105_v13, %v2102_v11  ;;  %v2107_v15 = vpop.f32.mrb[43].mxu1 }
 0x368   : > { %5327 = vmatprep.mubr.bf16.mxu0 %v2304_v14 }
 0x36b   : > { %v2110_v16 = vpop.f32.mrb[44].mxu1 }
 0x36c   : > { %v2112_v17 = vpop.f32.mrb[45].mxu1 }
 0x36d   : > { %v2113_v18 = vpop.f32.mrb[46].mxu1 }
 0x36e   : > { %v2305_v19 = vpack.c.bf16 %v2113_v18, %v2110_v16  ;;  %v2115_v20 = vpop.f32.mrb[47].mxu1 }
 0x370   : > { %5328 = vmatmul.mubr.bf16.gmra.mrb[84].mxu0 %v2305_v19 }
 0x373   : > { %v2118_v21 = vpop.f32.mrb[48].mxu1 }
 0x374   : > { %v2120_v22 = vpop.f32.mrb[49].mxu1 }
 0x375   : > { %v2121_v23 = vpop.f32.mrb[50].mxu1 }
 0x376   : > { %v2306_v24 = vpack.c.bf16 %v2121_v23, %v2118_v21  ;;  %v2123_v25 = vpop.f32.mrb[51].mxu1 }
 0x378   : > { %5331 = vmatprep.mubr.bf16.mxu0 %v2306_v24 }
 0x37b   : > { %v2126_v26 = vpop.f32.mrb[52].mxu1 }
 0x37c   : > { %v2128_v27 = vpop.f32.mrb[53].mxu1 }
 0x37d   : > { %v2129_v28 = vpop.f32.mrb[54].mxu1 }
 0x37e   : > { %v2307_v29 = vpack.c.bf16 %v2129_v28, %v2126_v26  ;;  %v2131_v30 = vpop.f32.mrb[55].mxu1 }
 0x380   : > { %5332 = vmatmul.mubr.bf16.gmra.mrb[88].mxu0 %v2307_v29 }
 0x383   : > { %v2134_v31 = vpop.f32.mrb[56].mxu1 }
 0x384   : > { %v2136_v32 = vpop.f32.mrb[57].mxu1 }
 0x385   : > { %v2137_v34 = vpop.f32.mrb[58].mxu1 }
 0x386   : > { %v2308_v35 = vpack.c.bf16 %v2137_v34, %v2134_v31  ;;  %v2139_v36 = vpop.f32.mrb[59].mxu1 }
 0x388   : > { %5335 = vmatprep.mubr.bf16.mxu0 %v2308_v35 }
 0x38b   : > { %v2142_v37 = vpop.f32.mrb[60].mxu1 }
 0x38c   : > { %v2144_v38 = vpop.f32.mrb[61].mxu1 }
 0x38d   : > { %v2145_v39 = vpop.f32.mrb[62].mxu1 }
 0x38e   : > { %v2309_v40 = vpack.c.bf16 %v2145_v39, %v2142_v37  ;;  %v2147_v41 = vpop.f32.mrb[63].mxu1  ;;  %v6833_v39 = vld [vmem:[%s7582_s5] ss:$0 sm:$0xff] }
 0x390   : > { %5336 = vmatmul.mubr.bf16.gmra.mrb[92].mxu0 %v2309_v40 }
 0x393   : > { %v2150_v42 = vpop.f32.mrb[64].mxu1 }
 0x394   : > { %v2152_v44 = vpop.f32.mrb[65].mxu1 }
 0x395   : > { %v2153_v43 = vpop.f32.mrb[66].mxu1 }
 0x396   : > { %v2310_v45 = vpack.c.bf16 %v2153_v43, %v2150_v42  ;;  %v2155_v46 = vpop.f32.mrb[67].mxu1 }
 0x398   : > { %5339 = vmatprep.mubr.bf16.mxu0 %v2310_v45 }
 0x39b   : > { %v2158_v47 = vpop.f32.mrb[68].mxu1 }
 0x39c   : > { %v2160_v48 = vpop.f32.mrb[69].mxu1 }
 0x39d   : > { %v2161_v49 = vpop.f32.mrb[70].mxu1 }
 0x39e   : > { %v2311_v50 = vpack.c.bf16 %v2161_v49, %v2158_v47  ;;  %v2163_v51 = vpop.f32.mrb[71].mxu1 }
 0x3a0   : > { %5340 = vmatmul.mubr.bf16.gmra.mrb[96].mxu0 %v2311_v50 }
 0x3a3   : > { %v2166_v52 = vpop.f32.mrb[72].mxu1 }
 0x3a4   : > { %v2168_v53 = vpop.f32.mrb[73].mxu1 }
 0x3a5   : > { %v2169_v54 = vpop.f32.mrb[74].mxu1 }
 0x3a6   : > { %v2312_v55 = vpack.c.bf16 %v2169_v54, %v2166_v52  ;;  %v2171_v56 = vpop.f32.mrb[75].mxu1 }
 0x3a8   : > { %5343 = vmatprep.mubr.bf16.mxu0 %v2312_v55 }
 0x3ab   : > { %v2174_v57 = vpop.f32.mrb[76].mxu1 }
 0x3ac   : > { %v2176_v58 = vpop.f32.mrb[77].mxu1 }
 0x3ad   : > { %v2177_v59 = vpop.f32.mrb[78].mxu1 }
 0x3ae   : > { %v2313_v60 = vpack.c.bf16 %v2177_v59, %v2174_v57  ;;  %v2179_v61 = vpop.f32.mrb[79].mxu1 }
 0x3b0   : > { %5344 = vmatmul.mubr.bf16.gmra.mrb[100].mxu0 %v2313_v60 }
 0x3b3   : > { %v2182_v62 = vpop.f32.mrb[80].mxu1 }
 0x3b4   : > { %v2184_v63 = vpop.f32.mrb[81].mxu1 }
 0x3b5   : > { %v2185_v0 = vpop.f32.mrb[82].mxu1 }
 0x3b6   : > { %v2314_v1 = vpack.c.bf16 %v2185_v0, %v2182_v62  ;;  %v2187_v2 = vpop.f32.mrb[83].mxu1 }
 0x3b8   : > { %5347 = vmatprep.mubr.bf16.mxu0 %v2314_v1 }
 0x3bb   : > { %v2190_v3 = vpop.f32.mrb[84].mxu1 }
 0x3bc   : > { %v2192_v4 = vpop.f32.mrb[85].mxu1 }
 0x3bd   : > { %v2193_v5 = vpop.f32.mrb[86].mxu1 }
 0x3be   : > { %v2315_v6 = vpack.c.bf16 %v2193_v5, %v2190_v3  ;;  %v2195_v7 = vpop.f32.mrb[87].mxu1 }
 0x3c0   : > { %5348 = vmatmul.mubr.bf16.gmra.mrb[104].mxu0 %v2315_v6 }
 0x3c3   : > { %v2198_v8 = vpop.f32.mrb[88].mxu1 }
 0x3c4   : > { %v2200_v9 = vpop.f32.mrb[89].mxu1 }
 0x3c5   : > { %v2201_v10 = vpop.f32.mrb[90].mxu1 }
 0x3c6   : > { %v2316_v11 = vpack.c.bf16 %v2201_v10, %v2198_v8  ;;  %v2203_v12 = vpop.f32.mrb[91].mxu1 }
 0x3c8   : > { %5351 = vmatprep.mubr.bf16.mxu0 %v2316_v11 }
 0x3cb   : > { %v2206_v13 = vpop.f32.mrb[92].mxu1 }
 0x3cc   : > { %v2208_v14 = vpop.f32.mrb[93].mxu1 }
 0x3cd   : > { %v2209_v15 = vpop.f32.mrb[94].mxu1 }
 0x3ce   : > { %v2317_v16 = vpack.c.bf16 %v2209_v15, %v2206_v13  ;;  %v2211_v17 = vpop.f32.mrb[95].mxu1 }
 0x3d0   : > { %5352 = vmatmul.mubr.bf16.gmra.mrb[108].mxu0 %v2317_v16 }
 0x3d3   : > { %v2214_v18 = vpop.f32.mrb[96].mxu1 }
 0x3d4   : > { %v2216_v19 = vpop.f32.mrb[97].mxu1 }
 0x3d5   : > { %v2217_v20 = vpop.f32.mrb[98].mxu1 }
 0x3d6   : > { %v2318_v21 = vpack.c.bf16 %v2217_v20, %v2214_v18  ;;  %v2219_v22 = vpop.f32.mrb[99].mxu1 }
 0x3d8   : > { %5355 = vmatprep.mubr.bf16.mxu0 %v2318_v21 }
 0x3db   : > { %v2222_v23 = vpop.f32.mrb[100].mxu1 }
 0x3dc   : > { %v2224_v24 = vpop.f32.mrb[101].mxu1 }
 0x3dd   : > { %v2225_v25 = vpop.f32.mrb[102].mxu1  ;;  %v6070_v24 = vld [vmem:[%s7578_s1 + $0x4] ss:$16 sps:$4 sm:$0xff]  }
 0x3de   : > { %v2319_v26 = vpack.c.bf16 %v2225_v25, %v2222_v23  ;;  %v2227_v27 = vpop.f32.mrb[103].mxu1 }
 0x3e0   : > { %5356 = vmatmul.mubr.bf16.gmra.mrb[112].mxu0 %v2319_v26 }
 0x3e3   : > { %v2230_v28 = vpop.f32.mrb[104].mxu1 }
 0x3e4   : > { %v2232_v29 = vpop.f32.mrb[105].mxu1 }
 0x3e5   : > { %v2233_v30 = vpop.f32.mrb[106].mxu1 }
 0x3e6   : > { %v2320_v31 = vpack.c.bf16 %v2233_v30, %v2230_v28  ;;  %v2235_v32 = vpop.f32.mrb[107].mxu1 }
 0x3e8   : > { %5359 = vmatprep.mubr.bf16.mxu0 %v2320_v31 }
 0x3eb   : > { %v2238_v34 = vpop.f32.mrb[108].mxu1 }
 0x3ec   : > { %v2240_v35 = vpop.f32.mrb[109].mxu1 }
 0x3ed   : > { %v2241_v36 = vpop.f32.mrb[110].mxu1 }
 0x3ee   : > { %v2321_v37 = vpack.c.bf16 %v2241_v36, %v2238_v34  ;;  %v2243_v38 = vpop.f32.mrb[111].mxu1 }
 0x3f0   : > { %5360 = vmatmul.mubr.bf16.gmra.mrb[116].mxu0 %v2321_v37 }
 0x3f3   : > { %v2246_v40 = vpop.f32.mrb[112].mxu1  ;;  %v5309_v41 = vpop.f32.mrb[64].mxu0 }
 0x3f4   : > { %v2421_v42 = vadd.f32 %v5309_v41, %v6833_v39  ;;  %v2248_v44 = vpop.f32.mrb[113].mxu1  ;;  %v2412_v43 = vpop.f32.mrb[65].mxu0 }
 0x3f5   : > { %v2413_v45 = vadd.f32 %v6833_v39, %v2412_v43  ;;  %v2249_v46 = vpop.f32.mrb[114].mxu1  ;;  %v5310_v47 = vpop.f32.mrb[66].mxu0 }
 0x3f6   : > { %v2322_v48 = vpack.c.bf16 %v2249_v46, %v2246_v40  ;;  %v2424_v49 = vadd.f32 %v5310_v47, %v6833_v39  ;;  %v2251_v50 = vpop.f32.mrb[115].mxu1  ;;  %v2415_v51 = vpop.f32.mrb[67].mxu0  ;;  %v2669_v53 = vmax.f32 %v2421_v42, 0.0 }
 0x3f7   : > { %v2416_v52 = vadd.f32 %v6833_v39, %v2415_v51  ;;  %v2667_v55 = vmax.f32 %v2413_v45, 0.0 }
 0x3f8   : > { %v2670_v54 = vmax.f32 %v2424_v49, 0.0  ;;  %5363 = vmatprep.mubr.bf16.mxu0 %v2322_v48 }
 0x3f9   : > { %v2668_v56 = vmax.f32 %v2416_v52, 0.0 }
 0x3fa   : > { %v2732_v57 = vpack.c.bf16 %v2670_v54, %v2669_v53 }
 0x3fb   : > { %v2731_v58 = vpack.c.bf16 %v2668_v56, %v2667_v55  ;;  %v2254_v59 = vpop.f32.mrb[116].mxu1 }
 0x3fc   : > { %v2256_v60 = vpop.f32.mrb[117].mxu1 }
 0x3fd   : > { %v2257_v61 = vpop.f32.mrb[118].mxu1  ;;  %2764 = vmatpush1.bf16.msra.mxu0 %v2731_v58 }
 0x3fe   : > { %v2323_v62 = vpack.c.bf16 %v2257_v61, %v2254_v59  ;;  %v2259_v63 = vpop.f32.mrb[119].mxu1  ;;  %2765 = vmatprep.subr.bf16.mxu0 %v6206_v33 }
 0x400   : > { %5364 = vmatmul.mubr.bf16.gmra.mrb[120].mxu0 %v2323_v62 }
 0x401   : > { %2766 = vmatpush1.bf16.msra.mxu0 %v2732_v57 }
 0x402   : > { %2767 = vmatprep.subr.bf16.mxu0 %v6206_v33 }
 0x403   : > { %v2262_v0 = vpop.f32.mrb[120].mxu1  ;;  %v5313_v1 = vpop.f32.mrb[68].mxu0 }
 0x404   : > { %v2437_v2 = vadd.f32 %v5313_v1, %v6833_v39  ;;  %v2264_v3 = vpop.f32.mrb[121].mxu1  ;;  %v2428_v4 = vpop.f32.mrb[69].mxu0 }
 0x405   : > { %v2429_v5 = vadd.f32 %v6833_v39, %v2428_v4  ;;  %v2265_v6 = vpop.f32.mrb[122].mxu1  ;;  %v5314_v7 = vpop.f32.mrb[70].mxu0 }
 0x406   : > { %v2324_v8 = vpack.c.bf16 %v2265_v6, %v2262_v0  ;;  %v2440_v9 = vadd.f32 %v5314_v7, %v6833_v39  ;;  %v2267_v10 = vpop.f32.mrb[123].mxu1  ;;  %v2431_v11 = vpop.f32.mrb[71].mxu0  ;;  %v2673_v13 = vmax.f32 %v2437_v2, 0.0 }
 0x407   : > { %v2432_v12 = vadd.f32 %v6833_v39, %v2431_v11  ;;  %v2671_v15 = vmax.f32 %v2429_v5, 0.0 }
 0x408   : > { %v2674_v14 = vmax.f32 %v2440_v9, 0.0  ;;  %5367 = vmatprep.mubr.bf16.mxu0 %v2324_v8 }
 0x409   : > { %v2672_v16 = vmax.f32 %v2432_v12, 0.0 }
 0x40a   : > { %v2734_v17 = vpack.c.bf16 %v2674_v14, %v2673_v13 }
 0x40b   : > { %v2733_v18 = vpack.c.bf16 %v2672_v16, %v2671_v15  ;;  %v2270_v19 = vpop.f32.mrb[124].mxu1 }
 0x40c   : > { %v2272_v20 = vpop.f32.mrb[125].mxu1 }
 0x40d   : > { %v2273_v21 = vpop.f32.mrb[126].mxu1  ;;  %2768 = vmatpush1.bf16.msra.mxu0 %v2733_v18 }
 0x40e   : > { %v2325_v22 = vpack.c.bf16 %v2273_v21, %v2270_v19  ;;  %v2275_v23 = vpop.f32.mrb[127].mxu1  ;;  %2769 = vmatprep.subr.bf16.mxu0 %v6206_v33 }
 0x410   : > { %5368 = vmatmul.mubr.bf16.gmra.mrb[124].mxu0 %v2325_v22 }
 0x411   : > { %2770 = vmatpush1.bf16.msra.mxu0 %v2734_v17  ;;  %2795 = vmatprep.mubr.bf16.mxu0 %v6070_v24 }
 0x412   : > { %2771 = vmatprep.subr.bf16.mxu0 %v6206_v33 }
 0x413   : > { %v5317_v25 = vpop.f32.mrb[72].mxu0 }
 0x414   : > { %v2453_v26 = vadd.f32 %v5317_v25, %v6833_v39  ;;  %v2444_v27 = vpop.f32.mrb[73].mxu0 }
 0x415   : > { %v2445_v28 = vadd.f32 %v6833_v39, %v2444_v27  ;;  %v5318_v29 = vpop.f32.mrb[74].mxu0 }
 0x416   : > { %v2456_v30 = vadd.f32 %v5318_v29, %v6833_v39  ;;  %v2447_v31 = vpop.f32.mrb[75].mxu0  ;;  %v2677_v34 = vmax.f32 %v2453_v26, 0.0 }
 0x417   : > { %v2448_v32 = vadd.f32 %v6833_v39, %v2447_v31  ;;  %v2675_v36 = vmax.f32 %v2445_v28, 0.0 }
 0x418   : > { %v2678_v35 = vmax.f32 %v2456_v30, 0.0 }
 0x419   : > { %v2676_v37 = vmax.f32 %v2448_v32, 0.0 }
 0x41a   : > { %v2736_v38 = vpack.c.bf16 %v2678_v35, %v2677_v34 }
 0x41b   : > { %v2735_v40 = vpack.c.bf16 %v2676_v37, %v2675_v36 }
 0x41d   : > { %2772 = vmatpush1.bf16.msra.mxu0 %v2735_v40 }
 0x41e   : > { %2773 = vmatprep.subr.bf16.mxu0 %v6206_v33 }
 0x421   : > { %2774 = vmatpush1.bf16.msra.mxu0 %v2736_v38 }
 0x422   : > { %2775 = vmatprep.subr.bf16.mxu0 %v6206_v33 }
 0x423   : > { %v5321_v41 = vpop.f32.mrb[76].mxu0 }
 0x424   : > { %v2469_v42 = vadd.f32 %v5321_v41, %v6833_v39  ;;  %v2460_v44 = vpop.f32.mrb[77].mxu0 }
 0x425   : > { %v2461_v43 = vadd.f32 %v6833_v39, %v2460_v44  ;;  %v5322_v45 = vpop.f32.mrb[78].mxu0 }
 0x426   : > { %v2472_v46 = vadd.f32 %v5322_v45, %v6833_v39  ;;  %v2463_v47 = vpop.f32.mrb[79].mxu0  ;;  %v2681_v49 = vmax.f32 %v2469_v42, 0.0 }
 0x427   : > { %v2464_v48 = vadd.f32 %v6833_v39, %v2463_v47  ;;  %v2679_v51 = vmax.f32 %v2461_v43, 0.0 }
 0x428   : > { %v2682_v50 = vmax.f32 %v2472_v46, 0.0 }
 0x429   : > { %v2680_v52 = vmax.f32 %v2464_v48, 0.0 }
 0x42a   : > { %v2738_v53 = vpack.c.bf16 %v2682_v50, %v2681_v49 }
 0x42b   : > { %v2737_v54 = vpack.c.bf16 %v2680_v52, %v2679_v51  ;;  %v6071_v52 = vld [vmem:[%s7578_s1] ss:$16 sps:$4 sm:$0xff]  }
 0x42d   : > { %2776 = vmatpush1.bf16.msra.mxu0 %v2737_v54 }
 0x42e   : > { %2777 = vmatprep.subr.bf16.mxu0 %v6206_v33 }
 0x431   : > { %2778 = vmatpush1.bf16.msra.mxu0 %v2738_v53 }
 0x432   : > { %2779 = vmatprep.subr.bf16.mxu0 %v6206_v33 }
 0x433   : > { %v5325_v55 = vpop.f32.mrb[80].mxu0 }
 0x434   : > { %v2485_v56 = vadd.f32 %v5325_v55, %v6833_v39  ;;  %v2476_v57 = vpop.f32.mrb[81].mxu0  ;;  %v6072_v55 = vld [vmem:[%s7578_s1 + $0x24] ss:$16 sps:$4 sm:$0xff]  }
 0x435   : > { %v2477_v58 = vadd.f32 %v6833_v39, %v2476_v57  ;;  %v5326_v59 = vpop.f32.mrb[82].mxu0 }
 0x436   : > { %v2488_v60 = vadd.f32 %v5326_v59, %v6833_v39  ;;  %v2479_v61 = vpop.f32.mrb[83].mxu0  ;;  %v2685_v63 = vmax.f32 %v2485_v56, 0.0 }
 0x437   : > { %v2480_v62 = vadd.f32 %v6833_v39, %v2479_v61  ;;  %v2683_v1 = vmax.f32 %v2477_v58, 0.0 }
 0x438   : > { %v2686_v0 = vmax.f32 %v2488_v60, 0.0 }
 0x439   : > { %v2684_v2 = vmax.f32 %v2480_v62, 0.0 }
 0x43a   : > { %v2740_v3 = vpack.c.bf16 %v2686_v0, %v2685_v63 }
 0x43b   : > { %v2739_v4 = vpack.c.bf16 %v2684_v2, %v2683_v1  ;;  %v6073_v1 = vld [vmem:[%s7578_s1 + $0x20] ss:$16 sps:$4 sm:$0xff]   ;;  %v6074_v2 = vld [vmem:[%s7578_s1 + $0x44] ss:$16 sps:$4 sm:$0xff]  }
 0x43d   : > { %2780 = vmatpush1.bf16.msra.mxu0 %v2739_v4 }
 0x43e   : > { %2781 = vmatprep.subr.bf16.mxu0 %v6206_v33 }
 0x441   : > { %2782 = vmatpush1.bf16.msra.mxu0 %v2740_v3 }
 0x442   : > { %2783 = vmatprep.subr.bf16.mxu0 %v6206_v33 }
 0x443   : > { %v5329_v5 = vpop.f32.mrb[84].mxu0 }
 0x444   : > { %v2501_v6 = vadd.f32 %v5329_v5, %v6833_v39  ;;  %v2492_v7 = vpop.f32.mrb[85].mxu0 }
 0x445   : > { %v2493_v8 = vadd.f32 %v6833_v39, %v2492_v7  ;;  %v5330_v9 = vpop.f32.mrb[86].mxu0 }
 0x446   : > { %v2504_v10 = vadd.f32 %v5330_v9, %v6833_v39  ;;  %v2495_v11 = vpop.f32.mrb[87].mxu0  ;;  %v2689_v13 = vmax.f32 %v2501_v6, 0.0  ;;  %v6075_v6 = vld [vmem:[%s7578_s1 + $0x40] ss:$16 sps:$4 sm:$0xff]   ;;  %v6076_v9 = vld [vmem:[%s7578_s1 + $0x64] ss:$16 sps:$4 sm:$0xff]  }
 0x447   : > { %v2496_v12 = vadd.f32 %v6833_v39, %v2495_v11  ;;  %v2687_v15 = vmax.f32 %v2493_v8, 0.0 }
 0x448   : > { %v2690_v14 = vmax.f32 %v2504_v10, 0.0 }
 0x449   : > { %v2688_v16 = vmax.f32 %v2496_v12, 0.0 }
 0x44a   : > { %v2742_v17 = vpack.c.bf16 %v2690_v14, %v2689_v13 }
 0x44b   : > { %v2741_v18 = vpack.c.bf16 %v2688_v16, %v2687_v15 }
 0x44d   : > { %2784 = vmatpush1.bf16.msra.mxu0 %v2741_v18 }
 0x44e   : > { %2785 = vmatprep.subr.bf16.mxu0 %v6206_v33 }
 0x451   : > { %2786 = vmatpush1.bf16.msra.mxu0 %v2742_v17 }
 0x452   : > { %2787 = vmatprep.subr.bf16.mxu0 %v6206_v33 }
 0x453   : > { %v5333_v19 = vpop.f32.mrb[88].mxu0 }
 0x454   : > { %v2517_v20 = vadd.f32 %v5333_v19, %v6833_v39  ;;  %v2508_v21 = vpop.f32.mrb[89].mxu0  ;;  %v6077_v19 = vld [vmem:[%s7578_s1 + $0x60] ss:$16 sps:$4 sm:$0xff]  }
 0x455   : > { %v2509_v22 = vadd.f32 %v6833_v39, %v2508_v21  ;;  %v5334_v23 = vpop.f32.mrb[90].mxu0 }
 0x456   : > { %v2520_v24 = vadd.f32 %v5334_v23, %v6833_v39  ;;  %v2511_v25 = vpop.f32.mrb[91].mxu0  ;;  %v2693_v27 = vmax.f32 %v2517_v20, 0.0  ;;  %v6078_v20 = vld [vmem:[%s7578_s1 + $0x84] ss:$16 sps:$4 sm:$0xff]  }
 0x457   : > { %v2512_v26 = vadd.f32 %v6833_v39, %v2511_v25  ;;  %v2691_v29 = vmax.f32 %v2509_v22, 0.0 }
 0x458   : > { %v2694_v28 = vmax.f32 %v2520_v24, 0.0  ;;  %v6079_v24 = vld [vmem:[%s7578_s1 + $0x80] ss:$16 sps:$4 sm:$0xff]  }
 0x459   : > { %v2692_v30 = vmax.f32 %v2512_v26, 0.0 }
 0x45a   : > { %v2744_v31 = vpack.c.bf16 %v2694_v28, %v2693_v27  ;;  %v6080_v27 = vld [vmem:[%s7578_s1 + $0xa4] ss:$16 sps:$4 sm:$0xff]  }
 0x45b   : > { %v2743_v32 = vpack.c.bf16 %v2692_v30, %v2691_v29 }
 0x45d   : > { %2788 = vmatpush1.bf16.msra.mxu0 %v2743_v32 }
 0x45e   : > { %2789 = vmatprep.subr.bf16.mxu0 %v6206_v33 }
 0x461   : > { %2790 = vmatpush1.bf16.msra.mxu0 %v2744_v31 }
 0x462   : > { %2791 = vmatprep.subr.bf16.mxu0 %v6206_v33 }
 0x463   : > { %v5337_v34 = vpop.f32.mrb[92].mxu0 }
 0x464   : > { %v2533_v35 = vadd.f32 %v5337_v34, %v6833_v39  ;;  %v2524_v36 = vpop.f32.mrb[93].mxu0 }
 0x465   : > { %v2525_v37 = vadd.f32 %v6833_v39, %v2524_v36  ;;  %v5338_v38 = vpop.f32.mrb[94].mxu0 }
 0x466   : > { %v2536_v40 = vadd.f32 %v5338_v38, %v6833_v39  ;;  %v2527_v41 = vpop.f32.mrb[95].mxu0  ;;  %v2697_v44 = vmax.f32 %v2533_v35, 0.0  ;;  %v6081_v38 = vld [vmem:[%s7578_s1 + $0xa0] ss:$16 sps:$4 sm:$0xff]  }
 0x467   : > { %v2528_v42 = vadd.f32 %v6833_v39, %v2527_v41  ;;  %v2695_v45 = vmax.f32 %v2525_v37, 0.0 }
 0x468   : > { %v2698_v43 = vmax.f32 %v2536_v40, 0.0  ;;  %v6082_v40 = vld [vmem:[%s7578_s1 + $0xc4] ss:$16 sps:$4 sm:$0xff]  }
 0x469   : > { %v2696_v46 = vmax.f32 %v2528_v42, 0.0 }
 0x46a   : > { %v2746_v47 = vpack.c.bf16 %v2698_v43, %v2697_v44  ;;  %v6083_v43 = vld [vmem:[%s7578_s1 + $0xc0] ss:$16 sps:$4 sm:$0xff]  }
 0x46b   : > { %v2745_v48 = vpack.c.bf16 %v2696_v46, %v2695_v45 }
 0x46d   : > { %2792 = vmatpush1.bf16.msra.mxu0 %v2745_v48 }
 0x46e   : > { %2793 = vmatprep.subr.bf16.mxu0 %v6206_v33 }
 0x471   : > { %2794 = vmatpush1.bf16.msra.mxu0 %v2746_v47  ;;  %v6084_v47 = vld [vmem:[%s7578_s1 + $0xe4] ss:$16 sps:$4 sm:$0xff]  }
 0x472   : > { %3052 = vmatprep.subr.bf16.mxu0 %v6206_v33 }
 0x473   : > { %v5341_v49 = vpop.f32.mrb[96].mxu0 }
 0x474   : > { %v2549_v50 = vadd.f32 %v5341_v49, %v6833_v39  ;;  %v2540_v51 = vpop.f32.mrb[97].mxu0  ;;  %2796 = vmatmul.mubr.bf16.vlgmr.msra.gmra.mrb[128].mxu0 %v6071_v52 }
 0x475   : > { %v2541_v53 = vadd.f32 %v6833_v39, %v2540_v51  ;;  %v5342_v54 = vpop.f32.mrb[98].mxu0  ;;  %2803 = vmatprep.mubr.bf16.mxu0 %v6072_v55 }
 0x476   : > { %v2552_v56 = vadd.f32 %v5342_v54, %v6833_v39  ;;  %v2543_v57 = vpop.f32.mrb[99].mxu0  ;;  %v2701_v59 = vmax.f32 %v2549_v50, 0.0 }
 0x477   : > { %v2544_v58 = vadd.f32 %v6833_v39, %v2543_v57  ;;  %v2699_v61 = vmax.f32 %v2541_v53, 0.0  ;;  %v6085_v57 = vld [vmem:[%s7578_s1 + $0xe0] ss:$16 sps:$4 sm:$0xff]  }
 0x478   : > { %v2702_v60 = vmax.f32 %v2552_v56, 0.0 }
 0x479   : > { %v2700_v62 = vmax.f32 %v2544_v58, 0.0  ;;  %v6086_v58 = vld [vmem:[%s7578_s1 + $0x104] ss:$16 sps:$4 sm:$0xff]  }
 0x47a   : > { %v2748_v63 = vpack.c.bf16 %v2702_v60, %v2701_v59 }
 0x47b   : > { %v2747_v0 = vpack.c.bf16 %v2700_v62, %v2699_v61  ;;  %v6087_v62 = vld [vmem:[%s7578_s1 + $0x100] ss:$16 sps:$4 sm:$0xff]  }
 0x47c   : > { %2804 = vmatmul.mubr.bf16.gmra.mrb[132].mxu0 %v6073_v1  ;;  %v6088_v1 = vld [vmem:[%s7578_s1 + $0x124] ss:$16 sps:$4 sm:$0xff]  }
 0x47d   : > { %3053 = vmatpush1.bf16.msra.mxu0 %v2747_v0  ;;  %2811 = vmatprep.mubr.bf16.mxu0 %v6074_v2 }
 0x47e   : > { %3054 = vmatprep.subr.bf16.mxu0 %v6206_v33 }
 0x481   : > { %3055 = vmatpush1.bf16.msra.mxu0 %v2748_v63 }
 0x482   : > { %3056 = vmatprep.subr.bf16.mxu0 %v6206_v33 }
 0x483   : > { %v5345_v3 = vpop.f32.mrb[100].mxu0 }
 0x484   : > { %v2565_v4 = vadd.f32 %v5345_v3, %v6833_v39  ;;  %v2556_v5 = vpop.f32.mrb[101].mxu0  ;;  %2812 = vmatmul.mubr.bf16.gmra.mrb[136].mxu0 %v6075_v6 }
 0x485   : > { %v2557_v7 = vadd.f32 %v6833_v39, %v2556_v5  ;;  %v5346_v8 = vpop.f32.mrb[102].mxu0  ;;  %2819 = vmatprep.mubr.bf16.mxu0 %v6076_v9 }
 0x486   : > { %v2568_v10 = vadd.f32 %v5346_v8, %v6833_v39  ;;  %v2559_v11 = vpop.f32.mrb[103].mxu0  ;;  %v2705_v13 = vmax.f32 %v2565_v4, 0.0 }
 0x487   : > { %v2560_v12 = vadd.f32 %v6833_v39, %v2559_v11  ;;  %v2703_v15 = vmax.f32 %v2557_v7, 0.0  ;;  %v6089_v11 = vld [vmem:[%s7578_s1 + $0x120] ss:$16 sps:$4 sm:$0xff]  }
 0x488   : > { %v2706_v14 = vmax.f32 %v2568_v10, 0.0 }
 0x489   : > { %v2704_v16 = vmax.f32 %v2560_v12, 0.0  ;;  %v6090_v12 = vld [vmem:[%s7578_s1 + $0x144] ss:$16 sps:$4 sm:$0xff]  }
 0x48a   : > { %v2750_v17 = vpack.c.bf16 %v2706_v14, %v2705_v13 }
 0x48b   : > { %v2749_v18 = vpack.c.bf16 %v2704_v16, %v2703_v15  ;;  %v6091_v16 = vld [vmem:[%s7578_s1 + $0x140] ss:$16 sps:$4 sm:$0xff]  }
 0x48c   : > { %2820 = vmatmul.mubr.bf16.gmra.mrb[140].mxu0 %v6077_v19  ;;  %v6092_v19 = vld [vmem:[%s7578_s1 + $0x164] ss:$16 sps:$4 sm:$0xff]  }
 0x48d   : > { %3057 = vmatpush1.bf16.msra.mxu0 %v2749_v18  ;;  %2827 = vmatprep.mubr.bf16.mxu0 %v6078_v20 }
 0x48e   : > { %3058 = vmatprep.subr.bf16.mxu0 %v6206_v33 }
 0x491   : > { %3059 = vmatpush1.bf16.msra.mxu0 %v2750_v17 }
 0x492   : > { %3060 = vmatprep.subr.bf16.mxu0 %v6206_v33 }
 0x493   : > { %v5349_v21 = vpop.f32.mrb[104].mxu0 }
 0x494   : > { %v2581_v22 = vadd.f32 %v5349_v21, %v6833_v39  ;;  %v2572_v23 = vpop.f32.mrb[105].mxu0  ;;  %2828 = vmatmul.mubr.bf16.gmra.mrb[144].mxu0 %v6079_v24 }
 0x495   : > { %v2573_v25 = vadd.f32 %v6833_v39, %v2572_v23  ;;  %v5350_v26 = vpop.f32.mrb[106].mxu0  ;;  %2835 = vmatprep.mubr.bf16.mxu0 %v6080_v27 }
 0x496   : > { %v2584_v28 = vadd.f32 %v5350_v26, %v6833_v39  ;;  %v2575_v29 = vpop.f32.mrb[107].mxu0  ;;  %v2709_v31 = vmax.f32 %v2581_v22, 0.0 }
 0x497   : > { %v2576_v30 = vadd.f32 %v6833_v39, %v2575_v29  ;;  %v2707_v34 = vmax.f32 %v2573_v25, 0.0  ;;  %v6093_v29 = vld [vmem:[%s7578_s1 + $0x160] ss:$16 sps:$4 sm:$0xff]  }
 0x498   : > { %v2710_v32 = vmax.f32 %v2584_v28, 0.0 }
 0x499   : > { %v2708_v35 = vmax.f32 %v2576_v30, 0.0  ;;  %v6094_v30 = vld [vmem:[%s7578_s1 + $0x184] ss:$16 sps:$4 sm:$0xff]  }
 0x49a   : > { %v2752_v36 = vpack.c.bf16 %v2710_v32, %v2709_v31 }
 0x49b   : > { %v2751_v37 = vpack.c.bf16 %v2708_v35, %v2707_v34  ;;  %v6095_v35 = vld [vmem:[%s7578_s1 + $0x180] ss:$16 sps:$4 sm:$0xff]  }
 0x49c   : > { %2836 = vmatmul.mubr.bf16.gmra.mrb[148].mxu0 %v6081_v38  ;;  %v6096_v38 = vld [vmem:[%s7578_s1 + $0x1a4] ss:$16 sps:$4 sm:$0xff]  }
 0x49d   : > { %3061 = vmatpush1.bf16.msra.mxu0 %v2751_v37  ;;  %2843 = vmatprep.mubr.bf16.mxu0 %v6082_v40 }
 0x49e   : > { %3062 = vmatprep.subr.bf16.mxu0 %v6206_v33 }
 0x4a1   : > { %3063 = vmatpush1.bf16.msra.mxu0 %v2752_v36 }
 0x4a2   : > { %3064 = vmatprep.subr.bf16.mxu0 %v6206_v33 }
 0x4a3   : > { %v5353_v41 = vpop.f32.mrb[108].mxu0 }
 0x4a4   : > { %v2597_v42 = vadd.f32 %v5353_v41, %v6833_v39  ;;  %v2588_v44 = vpop.f32.mrb[109].mxu0  ;;  %2844 = vmatmul.mubr.bf16.gmra.mrb[152].mxu0 %v6083_v43 }
 0x4a5   : > { %v2589_v45 = vadd.f32 %v6833_v39, %v2588_v44  ;;  %v5354_v46 = vpop.f32.mrb[110].mxu0  ;;  %2851 = vmatprep.mubr.bf16.mxu0 %v6084_v47 }
 0x4a6   : > { %v2600_v48 = vadd.f32 %v5354_v46, %v6833_v39  ;;  %v2591_v49 = vpop.f32.mrb[111].mxu0  ;;  %v2713_v51 = vmax.f32 %v2597_v42, 0.0 }
 0x4a7   : > { %v2592_v50 = vadd.f32 %v6833_v39, %v2591_v49  ;;  %v2711_v53 = vmax.f32 %v2589_v45, 0.0  ;;  %v6097_v49 = vld [vmem:[%s7578_s1 + $0x1a0] ss:$16 sps:$4 sm:$0xff]  }
 0x4a8   : > { %v2714_v52 = vmax.f32 %v2600_v48, 0.0 }
 0x4a9   : > { %v2712_v54 = vmax.f32 %v2592_v50, 0.0  ;;  %v6098_v50 = vld [vmem:[%s7578_s1 + $0x1c4] ss:$16 sps:$4 sm:$0xff]  }
 0x4aa   : > { %v2754_v55 = vpack.c.bf16 %v2714_v52, %v2713_v51 }
 0x4ab   : > { %v2753_v56 = vpack.c.bf16 %v2712_v54, %v2711_v53  ;;  %v6099_v54 = vld [vmem:[%s7578_s1 + $0x1c0] ss:$16 sps:$4 sm:$0xff]  }
 0x4ac   : > { %2852 = vmatmul.mubr.bf16.gmra.mrb[156].mxu0 %v6085_v57  ;;  %v6100_v57 = vld [vmem:[%s7578_s1 + $0x1e4] ss:$16 sps:$4 sm:$0xff]  }
 0x4ad   : > { %3065 = vmatpush1.bf16.msra.mxu0 %v2753_v56  ;;  %2859 = vmatprep.mubr.bf16.mxu0 %v6086_v58 }
 0x4ae   : > { %3066 = vmatprep.subr.bf16.mxu0 %v6206_v33 }
 0x4b1   : > { %3067 = vmatpush1.bf16.msra.mxu0 %v2754_v55 }
 0x4b2   : > { %3068 = vmatprep.subr.bf16.mxu0 %v6206_v33 }
 0x4b3   : > { %v5357_v59 = vpop.f32.mrb[112].mxu0 }
 0x4b4   : > { %v2613_v60 = vadd.f32 %v5357_v59, %v6833_v39  ;;  %v2604_v61 = vpop.f32.mrb[113].mxu0  ;;  %2860 = vmatmul.mubr.bf16.gmra.mrb[160].mxu0 %v6087_v62 }
 0x4b5   : > { %v2605_v63 = vadd.f32 %v6833_v39, %v2604_v61  ;;  %v5358_v0 = vpop.f32.mrb[114].mxu0  ;;  %2867 = vmatprep.mubr.bf16.mxu0 %v6088_v1 }
 0x4b6   : > { %v2616_v2 = vadd.f32 %v5358_v0, %v6833_v39  ;;  %v2607_v3 = vpop.f32.mrb[115].mxu0  ;;  %v2717_v5 = vmax.f32 %v2613_v60, 0.0 }
 0x4b7   : > { %v2608_v4 = vadd.f32 %v6833_v39, %v2607_v3  ;;  %v2715_v7 = vmax.f32 %v2605_v63, 0.0  ;;  %v6101_v3 = vld [vmem:[%s7578_s1 + $0x1e0] ss:$16 sps:$4 sm:$0xff]  }
 0x4b8   : > { %v2718_v6 = vmax.f32 %v2616_v2, 0.0 }
 0x4b9   : > { %v2716_v8 = vmax.f32 %v2608_v4, 0.0  ;;  %v6102_v4 = vld [vmem:[%s7578_s1 + $0x204] ss:$16 sps:$4 sm:$0xff]  }
 0x4ba   : > { %v2756_v9 = vpack.c.bf16 %v2718_v6, %v2717_v5  ;;  %v6104_v5 = vld [vmem:[%s7578_s1 + $0x224] ss:$16 sps:$4 sm:$0xff]   ;;  %v6105_v6 = vld [vmem:[%s7578_s1 + $0x220] ss:$16 sps:$4 sm:$0xff]  }
 0x4bb   : > { %v2755_v10 = vpack.c.bf16 %v2716_v8, %v2715_v7  ;;  %v6107_v7 = vld [vmem:[%s7578_s1 + $0x240] ss:$16 sps:$4 sm:$0xff]   ;;  %v6108_v8 = vld [vmem:[%s7578_s1 + $0x264] ss:$16 sps:$4 sm:$0xff]  }
 0x4bc   : > { %2868 = vmatmul.mubr.bf16.gmra.mrb[164].mxu0 %v6089_v11  ;;  %v6111_v11 = vld [vmem:[%s7578_s1 + $0x280] ss:$16 sps:$4 sm:$0xff]  }
 0x4bd   : > { %3069 = vmatpush1.bf16.msra.mxu0 %v2755_v10  ;;  %2875 = vmatprep.mubr.bf16.mxu0 %v6090_v12  ;;  %v6110_v10 = vld [vmem:[%s7578_s1 + $0x284] ss:$16 sps:$4 sm:$0xff]  }
 0x4be   : > { %3070 = vmatprep.subr.bf16.mxu0 %v6206_v33  ;;  %v6112_v12 = vld [vmem:[%s7578_s1 + $0x2a4] ss:$16 sps:$4 sm:$0xff]  }
 0x4c1   : > { %3071 = vmatpush1.bf16.msra.mxu0 %v2756_v9  ;;  %v6109_v9 = vld [vmem:[%s7578_s1 + $0x260] ss:$16 sps:$4 sm:$0xff]  }
 0x4c2   : > { %3072 = vmatprep.subr.bf16.mxu0 %v6206_v33 }
 0x4c3   : > { %v5361_v13 = vpop.f32.mrb[116].mxu0 }
 0x4c4   : > { %v2629_v14 = vadd.f32 %v5361_v13, %v6833_v39  ;;  %v2620_v15 = vpop.f32.mrb[117].mxu0  ;;  %2876 = vmatmul.mubr.bf16.gmra.mrb[168].mxu0 %v6091_v16  ;;  %v6113_v13 = vld [vmem:[%s7578_s1 + $0x2a0] ss:$16 sps:$4 sm:$0xff]   ;;  %v6116_v16 = vld [vmem:[%s7578_s1 + $0x2e4] ss:$16 sps:$4 sm:$0xff]  }
 0x4c5   : > { %v2621_v17 = vadd.f32 %v6833_v39, %v2620_v15  ;;  %v5362_v18 = vpop.f32.mrb[118].mxu0  ;;  %2883 = vmatprep.mubr.bf16.mxu0 %v6092_v19  ;;  %v6115_v15 = vld [vmem:[%s7578_s1 + $0x2c0] ss:$16 sps:$4 sm:$0xff]  }
 0x4c6   : > { %v2632_v20 = vadd.f32 %v5362_v18, %v6833_v39  ;;  %v2623_v21 = vpop.f32.mrb[119].mxu0  ;;  %v2721_v23 = vmax.f32 %v2629_v14, 0.0  ;;  %v6114_v14 = vld [vmem:[%s7578_s1 + $0x2c4] ss:$16 sps:$4 sm:$0xff]   ;;  %v6119_v19 = vld [vmem:[%s7578_s1 + $0x300] ss:$16 sps:$4 sm:$0xff]  }
 0x4c7   : > { %v2624_v22 = vadd.f32 %v6833_v39, %v2623_v21  ;;  %v2719_v25 = vmax.f32 %v2621_v17, 0.0  ;;  %v6117_v17 = vld [vmem:[%s7578_s1 + $0x2e0] ss:$16 sps:$4 sm:$0xff]   ;;  %v6118_v18 = vld [vmem:[%s7578_s1 + $0x304] ss:$16 sps:$4 sm:$0xff]  }
 0x4c8   : > { %v2722_v24 = vmax.f32 %v2632_v20, 0.0  ;;  %v6120_v20 = vld [vmem:[%s7578_s1 + $0x324] ss:$16 sps:$4 sm:$0xff]   ;;  %v6121_v21 = vld [vmem:[%s7578_s1 + $0x320] ss:$16 sps:$4 sm:$0xff]  }
 0x4c9   : > { %v2720_v26 = vmax.f32 %v2624_v22, 0.0  ;;  %v6122_v22 = vld [vmem:[%s7578_s1 + $0x344] ss:$16 sps:$4 sm:$0xff]  }
 0x4ca   : > { %v2758_v27 = vpack.c.bf16 %v2722_v24, %v2721_v23  ;;  %v6123_v23 = vld [vmem:[%s7578_s1 + $0x340] ss:$16 sps:$4 sm:$0xff]   ;;  %v6124_v24 = vld [vmem:[%s7578_s1 + $0x364] ss:$16 sps:$4 sm:$0xff]  }
 0x4cb   : > { %v2757_v28 = vpack.c.bf16 %v2720_v26, %v2719_v25  ;;  %v6125_v25 = vld [vmem:[%s7578_s1 + $0x360] ss:$16 sps:$4 sm:$0xff]   ;;  %v6126_v26 = vld [vmem:[%s7578_s1 + $0x384] ss:$16 sps:$4 sm:$0xff]  }
 0x4cc   : > { %2884 = vmatmul.mubr.bf16.gmra.mrb[172].mxu0 %v6093_v29  ;;  %v6128_v29 = vld [vmem:[%s7578_s1 + $0x3a4] ss:$16 sps:$4 sm:$0xff]  }
 0x4cd   : > { %3073 = vmatpush1.bf16.msra.mxu0 %v2757_v28  ;;  %2891 = vmatprep.mubr.bf16.mxu0 %v6094_v30  ;;  %v6054_v28 = vld [vmem:[%s7581_s4 + $0x40] sm:$0xff]  }
 0x4ce   : > { %3074 = vmatprep.subr.bf16.mxu0 %v6206_v33  ;;  %5531 = vmatprep.subr.bf16.mxu1 %v6054_v28  ;;  %v6129_v30 = vld [vmem:[%s7578_s1 + $0x3a0] ss:$16 sps:$4 sm:$0xff]  }
 0x4cf   : > { %5539 = vmatpush3.bf16.msra.mxu1 %v6054_v28 }
 0x4d1   : > { %3075 = vmatpush1.bf16.msra.mxu0 %v2758_v27  ;;  %v6127_v27 = vld [vmem:[%s7578_s1 + $0x380] ss:$16 sps:$4 sm:$0xff]  }
 0x4d2   : > { %3076 = vmatprep.subr.bf16.mxu0 %v6206_v33 }
 0x4d3   : > { %v5365_v31 = vpop.f32.mrb[120].mxu0 }
 0x4d4   : > { %v2645_v32 = vadd.f32 %v5365_v31, %v6833_v39  ;;  %v2636_v34 = vpop.f32.mrb[121].mxu0  ;;  %2892 = vmatmul.mubr.bf16.gmra.mrb[176].mxu0 %v6095_v35  ;;  %v6130_v31 = vld [vmem:[%s7578_s1 + $0x3c4] ss:$16 sps:$4 sm:$0xff]   ;;  %v6133_v35 = vld [vmem:[%s7578_s1 + $0x3e0] ss:$16 sps:$4 sm:$0xff]  }
 0x4d5   : > { %v2637_v36 = vadd.f32 %v6833_v39, %v2636_v34  ;;  %v5366_v37 = vpop.f32.mrb[122].mxu0  ;;  %2899 = vmatprep.mubr.bf16.mxu0 %v6096_v38  ;;  %v6132_v34 = vld [vmem:[%s7578_s1 + $0x3e4] ss:$16 sps:$4 sm:$0xff]   ;;  %v6055_v38 = vld [vmem:[%s7581_s4 + $0x48] sm:$0xff]  }
 0x4d6   : > { %v2648_v40 = vadd.f32 %v5366_v37, %v6833_v39  ;;  %v2639_v41 = vpop.f32.mrb[123].mxu0  ;;  %v2725_v44 = vmax.f32 %v2645_v32, 0.0  ;;  %v6131_v32 = vld [vmem:[%s7578_s1 + $0x3c0] ss:$16 sps:$4 sm:$0xff]   ;;  %v6135_v37 = vld [vmem:[%s7578_s1 + $0x8] ss:$16 sps:$4 sm:$0xff]   ;;  %5532 = vmatprep.subr.bf16.mxu1 %v6055_v38 }
 0x4d7   : > { %v2640_v42 = vadd.f32 %v6833_v39, %v2639_v41  ;;  %v2723_v45 = vmax.f32 %v2637_v36, 0.0  ;;  %v6134_v36 = vld [vmem:[%s7578_s1 + $0xc] ss:$16 sps:$4 sm:$0xff]   ;;  %5540 = vmatpush3.bf16.msra.mxu1 %v6055_v38  ;;  %v6137_v41 = vld [vmem:[%s7578_s1 + $0x28] ss:$16 sps:$4 sm:$0xff]  }
 0x4d8   : > { %v2726_v43 = vmax.f32 %v2648_v40, 0.0  ;;  %v6136_v40 = vld [vmem:[%s7578_s1 + $0x2c] ss:$16 sps:$4 sm:$0xff]  }
 0x4d9   : > { %v2724_v46 = vmax.f32 %v2640_v42, 0.0  ;;  %v6138_v42 = vld [vmem:[%s7578_s1 + $0x4c] ss:$16 sps:$4 sm:$0xff]  }
 0x4da   : > { %v2760_v47 = vpack.c.bf16 %v2726_v43, %v2725_v44  ;;  %v6139_v44 = vld [vmem:[%s7578_s1 + $0x48] ss:$16 sps:$4 sm:$0xff]   ;;  %v6140_v43 = vld [vmem:[%s7578_s1 + $0x6c] ss:$16 sps:$4 sm:$0xff]  }
 0x4db   : > { %v2759_v48 = vpack.c.bf16 %v2724_v46, %v2723_v45  ;;  %v6141_v45 = vld [vmem:[%s7578_s1 + $0x68] ss:$16 sps:$4 sm:$0xff]   ;;  %v6142_v46 = vld [vmem:[%s7578_s1 + $0x8c] ss:$16 sps:$4 sm:$0xff]  }
 0x4dc   : > { %2900 = vmatmul.mubr.bf16.gmra.mrb[180].mxu0 %v6097_v49  ;;  %v6144_v49 = vld [vmem:[%s7578_s1 + $0xac] ss:$16 sps:$4 sm:$0xff]  }
 0x4dd   : > { %3077 = vmatpush1.bf16.msra.mxu0 %v2759_v48  ;;  %2907 = vmatprep.mubr.bf16.mxu0 %v6098_v50  ;;  %v6056_v48 = vld [vmem:[%s7581_s4 + $0x50] sm:$0xff]   ;;  %v6145_v50 = vld [vmem:[%s7578_s1 + $0xa8] ss:$16 sps:$4 sm:$0xff]  }
 0x4de   : > { %3078 = vmatprep.subr.bf16.mxu0 %v6206_v33  ;;  %5533 = vmatprep.subr.bf16.mxu1 %v6056_v48 }
 0x4df   : > { %5541 = vmatpush3.bf16.msra.mxu1 %v6056_v48 }
 0x4e1   : > { %3079 = vmatpush1.bf16.msra.mxu0 %v2760_v47  ;;  %v6143_v47 = vld [vmem:[%s7578_s1 + $0x88] ss:$16 sps:$4 sm:$0xff]  }
 0x4e2   : > { %3080 = vmatprep.subr.bf16.mxu0 %v6206_v33 }
 0x4e3   : > { %v5369_v51 = vpop.f32.mrb[124].mxu0 }
 0x4e4   : > { %v2661_v52 = vadd.f32 %v5369_v51, %v6833_v39  ;;  %v2652_v53 = vpop.f32.mrb[125].mxu0  ;;  %2908 = vmatmul.mubr.bf16.gmra.mrb[184].mxu0 %v6099_v54  ;;  %v6146_v51 = vld [vmem:[%s7578_s1 + $0xcc] ss:$16 sps:$4 sm:$0xff]   ;;  %v6149_v54 = vld [vmem:[%s7578_s1 + $0xe8] ss:$16 sps:$4 sm:$0xff]  }
 0x4e5   : > { %v2653_v55 = vadd.f32 %v6833_v39, %v2652_v53  ;;  %v5370_v56 = vpop.f32.mrb[126].mxu0  ;;  %2915 = vmatprep.mubr.bf16.mxu0 %v6100_v57  ;;  %v6148_v53 = vld [vmem:[%s7578_s1 + $0xec] ss:$16 sps:$4 sm:$0xff]  }
 0x4e6   : > { %v2664_v58 = vadd.f32 %v5370_v56, %v6833_v39  ;;  %v2655_v59 = vpop.f32.mrb[127].mxu0  ;;  %v2729_v61 = vmax.f32 %v2661_v52, 0.0  ;;  %v6147_v52 = vld [vmem:[%s7578_s1 + $0xc8] ss:$16 sps:$4 sm:$0xff]  }
 0x4e7   : > { %v2656_v60 = vadd.f32 %v6833_v39, %v2655_v59  ;;  %v2727_v63 = vmax.f32 %v2653_v55, 0.0  ;;  %v6103_v39 = vld [vmem:[%s7578_s1 + $0x200] ss:$16 sps:$4 sm:$0xff]   ;;  %v6150_v55 = vld [vmem:[%s7578_s1 + $0x10c] ss:$16 sps:$4 sm:$0xff]  }
 0x4e8   : > { %v2730_v62 = vmax.f32 %v2664_v58, 0.0  ;;  %v6151_v56 = vld [vmem:[%s7578_s1 + $0x108] ss:$16 sps:$4 sm:$0xff]   ;;  %v6152_v58 = vld [vmem:[%s7578_s1 + $0x12c] ss:$16 sps:$4 sm:$0xff]  }
 0x4e9   : > { %v2728_v0 = vmax.f32 %v2656_v60, 0.0  ;;  %v6057_v57 = vld [vmem:[%s7581_s4 + $0x58] sm:$0xff]  }
 0x4ea   : > { %v2762_v1 = vpack.c.bf16 %v2730_v62, %v2729_v61  ;;  %5534 = vmatprep.subr.bf16.mxu1 %v6057_v57  ;;  %v6153_v59 = vld [vmem:[%s7578_s1 + $0x128] ss:$16 sps:$4 sm:$0xff]   ;;  %v6154_v60 = vld [vmem:[%s7578_s1 + $0x14c] ss:$16 sps:$4 sm:$0xff]  }
 0x4eb   : > { %v2761_v2 = vpack.c.bf16 %v2728_v0, %v2727_v63  ;;  %5542 = vmatpush3.bf16.msra.mxu1 %v6057_v57  ;;  %v6155_v61 = vld [vmem:[%s7578_s1 + $0x148] ss:$16 sps:$4 sm:$0xff]   ;;  %v6156_v62 = vld [vmem:[%s7578_s1 + $0x16c] ss:$16 sps:$4 sm:$0xff]  }
 0x4ec   : > { %2916 = vmatmul.mubr.bf16.gmra.mrb[188].mxu0 %v6101_v3  ;;  %v6157_v63 = vld [vmem:[%s7578_s1 + $0x168] ss:$16 sps:$4 sm:$0xff]   ;;  %v6158_v0 = vld [vmem:[%s7578_s1 + $0x18c] ss:$16 sps:$4 sm:$0xff]  }
 0x4ed   : > { %3081 = vmatpush1.bf16.msra.mxu0 %v2761_v2  ;;  %2923 = vmatprep.mubr.bf16.mxu0 %v6102_v4  ;;  %v6058_v2 = vld [vmem:[%s7581_s4 + $0x60] sm:$0xff]   ;;  %v6160_v3 = vld [vmem:[%s7578_s1 + $0x1ac] ss:$16 sps:$4 sm:$0xff]   ;;  %v6161_v4 = vld [vmem:[%s7578_s1 + $0x1a8] ss:$16 sps:$4 sm:$0xff]  }
 0x4ee   : > { %3082 = vmatprep.subr.bf16.mxu0 %v6206_v33  ;;  %v6106_v33 = vld [vmem:[%s7578_s1 + $0x244] ss:$16 sps:$4 sm:$0xff]   ;;  %5535 = vmatprep.subr.bf16.mxu1 %v6058_v2 }
 0x4ef   : > { %5543 = vmatpush3.bf16.msra.mxu1 %v6058_v2 }
 0x4f1   : > { %3083 = vmatpush1.bf16.msra.mxu0 %v2762_v1  ;;  %v6159_v1 = vld [vmem:[%s7578_s1 + $0x188] ss:$16 sps:$4 sm:$0xff]  }
 0x4f2   : > { %5371 = vmatprep.subr.bf16.mxu0 %v6054_v28 }
 0x4f4   : > { %2924 = vmatmul.mubr.bf16.gmra.mrb[192].mxu0 %v6103_v39  ;;  %v6162_v39 = vld [vmem:[%s7578_s1 + $0x1cc] ss:$16 sps:$4 sm:$0xff]  }
 0x4f5   : > { %2931 = vmatprep.mubr.bf16.mxu0 %v6104_v5  ;;  %v6163_v5 = vld [vmem:[%s7578_s1 + $0x1c8] ss:$16 sps:$4 sm:$0xff]  }
 0x4fc   : > { %2932 = vmatmul.mubr.bf16.gmra.mrb[196].mxu0 %v6105_v6  ;;  %v6164_v6 = vld [vmem:[%s7578_s1 + $0x1ec] ss:$16 sps:$4 sm:$0xff]  }
 0x4fd   : > { %2939 = vmatprep.mubr.bf16.mxu0 %v6106_v33  ;;  %v6059_v33 = vld [vmem:[%s7581_s4 + $0x68] sm:$0xff]  }
 0x4fe   : > { %5536 = vmatprep.subr.bf16.mxu1 %v6059_v33 }
 0x4ff   : > { %5544 = vmatpush3.bf16.msra.mxu1 %v6059_v33 }
 0x504   : > { %2940 = vmatmul.mubr.bf16.gmra.mrb[200].mxu0 %v6107_v7  ;;  %v6060_v7 = vld [vmem:[%s7581_s4 + $0x70] sm:$0xff]  }
 0x505   : > { %2947 = vmatprep.mubr.bf16.mxu0 %v6108_v8  ;;  %v6165_v8 = vld [vmem:[%s7578_s1 + $0x1e8] ss:$16 sps:$4 sm:$0xff]   ;;  %5537 = vmatprep.subr.bf16.mxu1 %v6060_v7 }
 0x506   : > { %5545 = vmatpush3.bf16.msra.mxu1 %v6060_v7 }
 0x50c   : > { %2948 = vmatmul.mubr.bf16.gmra.mrb[204].mxu0 %v6109_v9  ;;  %v6166_v9 = vld [vmem:[%s7578_s1 + $0x20c] ss:$16 sps:$4 sm:$0xff]  }
 0x50d   : > { %2955 = vmatprep.mubr.bf16.mxu0 %v6110_v10  ;;  %v6061_v10 = vld [vmem:[%s7581_s4 + $0x78] sm:$0xff]  }
 0x50e   : > { %5538 = vmatprep.subr.bf16.mxu1 %v6061_v10 }
 0x50f   : > { %5546 = vmatpush3.bf16.msra.mxu1 %v6061_v10 }
 0x514   : > { %2956 = vmatmul.mubr.bf16.gmra.mrb[208].mxu0 %v6111_v11  ;;  %v6167_v11 = vld [vmem:[%s7578_s1 + $0x208] ss:$16 sps:$4 sm:$0xff]  }
 0x515   : > { %2963 = vmatprep.mubr.bf16.mxu0 %v6112_v12  ;;  %v6168_v12 = vld [vmem:[%s7578_s1 + $0x22c] ss:$16 sps:$4 sm:$0xff]  }
 0x51c   : > { %2964 = vmatmul.mubr.bf16.gmra.mrb[212].mxu0 %v6113_v13  ;;  %v6169_v13 = vld [vmem:[%s7578_s1 + $0x228] ss:$16 sps:$4 sm:$0xff]  }
 0x51d   : > { %2971 = vmatprep.mubr.bf16.mxu0 %v6114_v14  ;;  %v6170_v14 = vld [vmem:[%s7578_s1 + $0x24c] ss:$16 sps:$4 sm:$0xff]  }
 0x524   : > { %2972 = vmatmul.mubr.bf16.gmra.mrb[216].mxu0 %v6115_v15  ;;  %v6171_v15 = vld [vmem:[%s7578_s1 + $0x248] ss:$16 sps:$4 sm:$0xff]  }
 0x525   : > { %2979 = vmatprep.mubr.bf16.mxu0 %v6116_v16  ;;  %v6172_v16 = vld [vmem:[%s7578_s1 + $0x26c] ss:$16 sps:$4 sm:$0xff]  }
 0x52c   : > { %2980 = vmatmul.mubr.bf16.gmra.mrb[220].mxu0 %v6117_v17  ;;  %v6173_v17 = vld [vmem:[%s7578_s1 + $0x268] ss:$16 sps:$4 sm:$0xff]  }
 0x52d   : > { %2987 = vmatprep.mubr.bf16.mxu0 %v6118_v18  ;;  %v6174_v18 = vld [vmem:[%s7578_s1 + $0x28c] ss:$16 sps:$4 sm:$0xff]  }
 0x534   : > { %2988 = vmatmul.mubr.bf16.gmra.mrb[224].mxu0 %v6119_v19  ;;  %v6175_v19 = vld [vmem:[%s7578_s1 + $0x288] ss:$16 sps:$4 sm:$0xff]  }
 0x535   : > { %2995 = vmatprep.mubr.bf16.mxu0 %v6120_v20  ;;  %v6176_v20 = vld [vmem:[%s7578_s1 + $0x2ac] ss:$16 sps:$4 sm:$0xff]  }
 0x53c   : > { %2996 = vmatmul.mubr.bf16.gmra.mrb[228].mxu0 %v6121_v21  ;;  %v6177_v21 = vld [vmem:[%s7578_s1 + $0x2a8] ss:$16 sps:$4 sm:$0xff]  }
 0x53d   : > { %3003 = vmatprep.mubr.bf16.mxu0 %v6122_v22  ;;  %v6178_v22 = vld [vmem:[%s7578_s1 + $0x2cc] ss:$16 sps:$4 sm:$0xff]  }
 0x544   : > { %3004 = vmatmul.mubr.bf16.gmra.mrb[232].mxu0 %v6123_v23  ;;  %v6179_v23 = vld [vmem:[%s7578_s1 + $0x2c8] ss:$16 sps:$4 sm:$0xff]  }
 0x545   : > { %3011 = vmatprep.mubr.bf16.mxu0 %v6124_v24  ;;  %v6180_v24 = vld [vmem:[%s7578_s1 + $0x2ec] ss:$16 sps:$4 sm:$0xff]  }
 0x54c   : > { %3012 = vmatmul.mubr.bf16.gmra.mrb[236].mxu0 %v6125_v25  ;;  %v6181_v25 = vld [vmem:[%s7578_s1 + $0x2e8] ss:$16 sps:$4 sm:$0xff]  }
 0x54d   : > { %3019 = vmatprep.mubr.bf16.mxu0 %v6126_v26  ;;  %v6182_v26 = vld [vmem:[%s7578_s1 + $0x30c] ss:$16 sps:$4 sm:$0xff]  }
 0x554   : > { %3020 = vmatmul.mubr.bf16.gmra.mrb[240].mxu0 %v6127_v27  ;;  %v6183_v27 = vld [vmem:[%s7578_s1 + $0x308] ss:$16 sps:$4 sm:$0xff]  }
 0x555   : > { %3027 = vmatprep.mubr.bf16.mxu0 %v6128_v29  ;;  %v6185_v29 = vld [vmem:[%s7578_s1 + $0x328] ss:$16 sps:$4 sm:$0xff]  }
 0x55c   : > { %3028 = vmatmul.mubr.bf16.gmra.mrb[244].mxu0 %v6129_v30  ;;  %v6186_v30 = vld [vmem:[%s7578_s1 + $0x34c] ss:$16 sps:$4 sm:$0xff]  }
 0x55d   : > { %3035 = vmatprep.mubr.bf16.mxu0 %v6130_v31  ;;  %v6187_v31 = vld [vmem:[%s7578_s1 + $0x348] ss:$16 sps:$4 sm:$0xff]  }
 0x564   : > { %3036 = vmatmul.mubr.bf16.gmra.mrb[248].mxu0 %v6131_v32  ;;  %v6188_v32 = vld [vmem:[%s7578_s1 + $0x36c] ss:$16 sps:$4 sm:$0xff]  }
 0x565   : > { %3043 = vmatprep.mubr.bf16.mxu0 %v6132_v34 }
 0x56c   : > { %3044 = vmatmul.mubr.bf16.gmra.mrb[252].mxu0 %v6133_v35 }
 0x56d   : > { %3084 = vmatprep.mubr.bf16.mxu0 %v6134_v36 }
 0x574   : > { %3085 = vmatmul.mubr.bf16.vlgmr.msra.gmra.mrb[128].mxu0 %v6135_v37 }
 0x575   : > { %3092 = vmatprep.mubr.bf16.mxu0 %v6136_v40  ;;  %5372 = vmatpush3.bf16.msra.mxu0 %v6054_v28  ;;  %v6184_v28 = vld [vmem:[%s7578_s1 + $0x32c] ss:$16 sps:$4 sm:$0xff]   ;;  %v6189_v40 = vld [vmem:[%s7578_s1 + $0x368] ss:$16 sps:$4 sm:$0xff]  }
 0x576   : > { %5373 = vmatprep.subr.bf16.mxu0 %v6055_v38 }
 0x579   : > { %5374 = vmatpush3.bf16.msra.mxu0 %v6055_v38 }
 0x57a   : > { %5375 = vmatprep.subr.bf16.mxu0 %v6056_v48 }
 0x57c   : > { %3093 = vmatmul.mubr.bf16.gmra.mrb[132].mxu0 %v6137_v41  ;;  %v6190_v41 = vld [vmem:[%s7578_s1 + $0x38c] ss:$16 sps:$4 sm:$0xff]  }
 0x57d   : > { %3100 = vmatprep.mubr.bf16.mxu0 %v6138_v42  ;;  %5376 = vmatpush3.bf16.msra.mxu0 %v6056_v48  ;;  %v6192_v48 = vld [vmem:[%s7578_s1 + $0x3ac] ss:$16 sps:$4 sm:$0xff]  }
 0x57e   : > { %5377 = vmatprep.subr.bf16.mxu0 %v6057_v57 }
 0x581   : > { %5378 = vmatpush3.bf16.msra.mxu0 %v6057_v57 }
 0x582   : > { %5379 = vmatprep.subr.bf16.mxu0 %v6058_v2 }
 0x584   : > { %3101 = vmatmul.mubr.bf16.gmra.mrb[136].mxu0 %v6139_v44 }
 0x585   : > { %3108 = vmatprep.mubr.bf16.mxu0 %v6140_v43  ;;  %5380 = vmatpush3.bf16.msra.mxu0 %v6058_v2 }
 0x586   : > { %5381 = vmatprep.subr.bf16.mxu0 %v6059_v33 }
 0x589   : > { %5382 = vmatpush3.bf16.msra.mxu0 %v6059_v33 }
 0x58a   : > { %5383 = vmatprep.subr.bf16.mxu0 %v6060_v7 }
 0x58c   : > { %3109 = vmatmul.mubr.bf16.gmra.mrb[140].mxu0 %v6141_v45 }
 0x58d   : > { %3116 = vmatprep.mubr.bf16.mxu0 %v6142_v46  ;;  %5384 = vmatpush3.bf16.msra.mxu0 %v6060_v7 }
 0x58e   : > { %5385 = vmatprep.subr.bf16.mxu0 %v6061_v10 }
 0x591   : > { %5386 = vmatpush3.bf16.msra.mxu0 %v6061_v10 }
 0x594   : > { %3117 = vmatmul.mubr.bf16.gmra.mrb[144].mxu0 %v6143_v47  ;;  %v6191_v47 = vld [vmem:[%s7578_s1 + $0x388] ss:$16 sps:$4 sm:$0xff]  }
 0x595   : > { %3124 = vmatprep.mubr.bf16.mxu0 %v6144_v49 }
 0x59c   : > { %3125 = vmatmul.mubr.bf16.gmra.mrb[148].mxu0 %v6145_v50 }
 0x59d   : > { %3132 = vmatprep.mubr.bf16.mxu0 %v6146_v51 }
 0x5a4   : > { %3133 = vmatmul.mubr.bf16.gmra.mrb[152].mxu0 %v6147_v52 }
 0x5a5   : > { %3140 = vmatprep.mubr.bf16.mxu0 %v6148_v53 }
 0x5ac   : > { %3141 = vmatmul.mubr.bf16.gmra.mrb[156].mxu0 %v6149_v54  ;;  %v6193_v54 = vld [vmem:[%s7578_s1 + $0x3a8] ss:$16 sps:$4 sm:$0xff]  }
 0x5ad   : > { %3148 = vmatprep.mubr.bf16.mxu0 %v6150_v55  ;;  %v6194_v55 = vld [vmem:[%s7578_s1 + $0x3cc] ss:$16 sps:$4 sm:$0xff]  }
 0x5b4   : > { %3149 = vmatmul.mubr.bf16.gmra.mrb[160].mxu0 %v6151_v56 }
 0x5b5   : > { %3156 = vmatprep.mubr.bf16.mxu0 %v6152_v58 }
 0x5bc   : > { %3157 = vmatmul.mubr.bf16.gmra.mrb[164].mxu0 %v6153_v59 }
 0x5bd   : > { %3164 = vmatprep.mubr.bf16.mxu0 %v6154_v60 }
 0x5c4   : > { %3165 = vmatmul.mubr.bf16.gmra.mrb[168].mxu0 %v6155_v61  ;;  %v6195_v61 = vld [vmem:[%s7578_s1 + $0x3c8] ss:$16 sps:$4 sm:$0xff]  }
 0x5c5   : > { %3172 = vmatprep.mubr.bf16.mxu0 %v6156_v62  ;;  %v6196_v62 = vld [vmem:[%s7578_s1 + $0x3ec] ss:$16 sps:$4 sm:$0xff]  }
 0x5cc   : > { %3173 = vmatmul.mubr.bf16.gmra.mrb[172].mxu0 %v6157_v63 }
 0x5cd   : > { %3180 = vmatprep.mubr.bf16.mxu0 %v6158_v0 }
 0x5d4   : > { %3181 = vmatmul.mubr.bf16.gmra.mrb[176].mxu0 %v6159_v1 }
 0x5d5   : > { %3188 = vmatprep.mubr.bf16.mxu0 %v6160_v3 }
 0x5dc   : > { %3189 = vmatmul.mubr.bf16.gmra.mrb[180].mxu0 %v6161_v4  ;;  %v6197_v4 = vld [vmem:[%s7578_s1 + $0x3e8] ss:$16 sps:$4 sm:$0xff]  }
 0x5dd   : > { %3196 = vmatprep.mubr.bf16.mxu0 %v6162_v39 }
 0x5e4   : > { %3197 = vmatmul.mubr.bf16.gmra.mrb[184].mxu0 %v6163_v5 }
 0x5e5   : > { %3204 = vmatprep.mubr.bf16.mxu0 %v6164_v6 }
 0x5ec   : > { %3205 = vmatmul.mubr.bf16.gmra.mrb[188].mxu0 %v6165_v8 }
 0x5ed   : > { %3212 = vmatprep.mubr.bf16.mxu0 %v6166_v9 }
 0x5f4   : > { %3213 = vmatmul.mubr.bf16.gmra.mrb[192].mxu0 %v6167_v11 }
 0x5f5   : > { %3220 = vmatprep.mubr.bf16.mxu0 %v6168_v12 }
 0x5fc   : > { %3221 = vmatmul.mubr.bf16.gmra.mrb[196].mxu0 %v6169_v13 }
 0x5fd   : > { %3228 = vmatprep.mubr.bf16.mxu0 %v6170_v14 }
 0x604   : > { %3229 = vmatmul.mubr.bf16.gmra.mrb[200].mxu0 %v6171_v15 }
 0x605   : > { %3236 = vmatprep.mubr.bf16.mxu0 %v6172_v16 }
 0x60c   : > { %3237 = vmatmul.mubr.bf16.gmra.mrb[204].mxu0 %v6173_v17 }
 0x60d   : > { %3244 = vmatprep.mubr.bf16.mxu0 %v6174_v18 }
 0x614   : > { %3245 = vmatmul.mubr.bf16.gmra.mrb[208].mxu0 %v6175_v19 }
 0x615   : > { %3252 = vmatprep.mubr.bf16.mxu0 %v6176_v20 }
 0x61c   : > { %3253 = vmatmul.mubr.bf16.gmra.mrb[212].mxu0 %v6177_v21 }
 0x61d   : > { %3260 = vmatprep.mubr.bf16.mxu0 %v6178_v22 }
 0x624   : > { %3261 = vmatmul.mubr.bf16.gmra.mrb[216].mxu0 %v6179_v23 }
 0x625   : > { %3268 = vmatprep.mubr.bf16.mxu0 %v6180_v24 }
 0x62c   : > { %3269 = vmatmul.mubr.bf16.gmra.mrb[220].mxu0 %v6181_v25 }
 0x62d   : > { %3276 = vmatprep.mubr.bf16.mxu0 %v6182_v26 }
 0x634   : > { %3277 = vmatmul.mubr.bf16.gmra.mrb[224].mxu0 %v6183_v27 }
 0x635   : > { %3284 = vmatprep.mubr.bf16.mxu0 %v6184_v28 }
 0x63c   : > { %3285 = vmatmul.mubr.bf16.gmra.mrb[228].mxu0 %v6185_v29 }
 0x63d   : > { %3292 = vmatprep.mubr.bf16.mxu0 %v6186_v30 }
 0x644   : > { %3293 = vmatmul.mubr.bf16.gmra.mrb[232].mxu0 %v6187_v31 }
 0x645   : > { %3300 = vmatprep.mubr.bf16.mxu0 %v6188_v32 }
 0x647   : > { %v3086_v34 = vpop.f32.mrb[128].mxu0 }
 0x648   : > { %v3088_v35 = vpop.f32.mrb[129].mxu0 }
 0x649   : > { %v3089_v36 = vpop.f32.mrb[130].mxu0 }
 0x64a   : > { %v3359_v37 = vpack.c.bf16 %v3089_v36, %v3086_v34  ;;  %v3091_v38 = vpop.f32.mrb[131].mxu0 }
 0x64c   : > { %3301 = vmatmul.mubr.bf16.gmra.mrb[236].mxu0 %v6189_v40 }
 0x64d   : > { %3308 = vmatprep.mubr.bf16.mxu0 %v6190_v41 }
 0x64f   : > { %v3094_v42 = vpop.f32.mrb[132].mxu0 }
 0x650   : > { %v3096_v44 = vpop.f32.mrb[133].mxu0 }
 0x651   : > { %v3097_v43 = vpop.f32.mrb[134].mxu0 }
 0x652   : > { %v3360_v45 = vpack.c.bf16 %v3097_v43, %v3094_v42  ;;  %v3099_v46 = vpop.f32.mrb[135].mxu0 }
 0x654   : > { %3309 = vmatmul.mubr.bf16.gmra.mrb[240].mxu0 %v6191_v47  ;;  %v6062_v47 = vld [vmem:[%s7583_s6] sm:$0xff]  }
 0x655   : > { %3316 = vmatprep.mubr.bf16.mxu0 %v6192_v48  ;;  %5451 = vmatprep.subr.bf16.mxu1 %v6062_v47 }
 0x657   : > { %v3102_v49 = vpop.f32.mrb[136].mxu0 }
 0x658   : > { %v3104_v50 = vpop.f32.mrb[137].mxu0 }
 0x659   : > { %v3105_v51 = vpop.f32.mrb[138].mxu0 }
 0x65a   : > { %v3361_v52 = vpack.c.bf16 %v3105_v51, %v3102_v49  ;;  %v3107_v53 = vpop.f32.mrb[139].mxu0  ;;  %v6063_v51 = vld [vmem:[%s7583_s6 + $0x8] sm:$0xff]  }
 0x65c   : > { %3317 = vmatmul.mubr.bf16.gmra.mrb[244].mxu0 %v6193_v54  ;;  %v6064_v54 = vld [vmem:[%s7583_s6 + $0x10] sm:$0xff]  }
 0x65d   : > { %3324 = vmatprep.mubr.bf16.mxu0 %v6194_v55 }
 0x65f   : > { %v3110_v56 = vpop.f32.mrb[140].mxu0 }
 0x660   : > { %v3112_v57 = vpop.f32.mrb[141].mxu0 }
 0x661   : > { %v3113_v58 = vpop.f32.mrb[142].mxu0 }
 0x662   : > { %v3362_v59 = vpack.c.bf16 %v3113_v58, %v3110_v56  ;;  %v3115_v60 = vpop.f32.mrb[143].mxu0  ;;  %v6065_v58 = vld [vmem:[%s7583_s6 + $0x18] sm:$0xff]  }
 0x664   : > { %3325 = vmatmul.mubr.bf16.gmra.mrb[248].mxu0 %v6195_v61  ;;  %v6066_v61 = vld [vmem:[%s7583_s6 + $0x20] sm:$0xff]  }
 0x665   : > { %3332 = vmatprep.mubr.bf16.mxu0 %v6196_v62 }
 0x667   : > { %v3118_v63 = vpop.f32.mrb[144].mxu0 }
 0x668   : > { %v3120_v0 = vpop.f32.mrb[145].mxu0 }
 0x669   : > { %v3121_v1 = vpop.f32.mrb[146].mxu0 }
 0x66a   : > { %v3363_v2 = vpack.c.bf16 %v3121_v1, %v3118_v63  ;;  %v3123_v3 = vpop.f32.mrb[147].mxu0  ;;  %v6067_v1 = vld [vmem:[%s7583_s6 + $0x28] sm:$0xff]  }
 0x66c   : > { %3333 = vmatmul.mubr.bf16.gmra.mrb[252].mxu0 %v6197_v4  ;;  %5395 = vmatprep.mubr.bf16.mxu1 %v3363_v2  ;;  %v6068_v4 = vld [vmem:[%s7583_s6 + $0x30] sm:$0xff]  }
 0x66d   : > { %5387 = vmatprep.mubr.bf16.mxu0 %v3359_v37 }
 0x66f   : > { %v3126_v39 = vpop.f32.mrb[148].mxu0 }
 0x670   : > { %v3128_v5 = vpop.f32.mrb[149].mxu0 }
 0x671   : > { %v3129_v6 = vpop.f32.mrb[150].mxu0 }
 0x672   : > { %v3364_v33 = vpack.c.bf16 %v3129_v6, %v3126_v39  ;;  %v3131_v7 = vpop.f32.mrb[151].mxu0 }
 0x674   : > { %5388 = vmatmul.mubr.bf16.vlgmr.msra.gmra.mrb[0].mxu0 %v3360_v45  ;;  %5396 = vmatmul.mubr.bf16.vlgmr.msra.gmra.mrb[128].mxu1 %v3364_v33  ;;  %v6069_v33 = vld [vmem:[%s7583_s6 + $0x38] sm:$0xff]  }
 0x675   : > { %5391 = vmatprep.mubr.bf16.mxu0 %v3361_v52  ;;  %5452 = vmatpush3.bf16.msra.mxu1 %v6062_v47 }
 0x676   : > { %5453 = vmatprep.subr.bf16.mxu1 %v6063_v51 }
 0x677   : > { %v3134_v8 = vpop.f32.mrb[152].mxu0 }
 0x678   : > { %v3136_v9 = vpop.f32.mrb[153].mxu0 }
 0x679   : > { %v3137_v10 = vpop.f32.mrb[154].mxu0  ;;  %5454 = vmatpush3.bf16.msra.mxu1 %v6063_v51 }
 0x67a   : > { %v3365_v11 = vpack.c.bf16 %v3137_v10, %v3134_v8  ;;  %v3139_v12 = vpop.f32.mrb[155].mxu0  ;;  %5455 = vmatprep.subr.bf16.mxu1 %v6064_v54 }
 0x67c   : > { %5392 = vmatmul.mubr.bf16.gmra.mrb[4].mxu0 %v3362_v59  ;;  %5399 = vmatprep.mubr.bf16.mxu1 %v3365_v11 }
 0x67d   : > { %5456 = vmatpush3.bf16.msra.mxu1 %v6064_v54 }
 0x67e   : > { %5457 = vmatprep.subr.bf16.mxu1 %v6065_v58 }
 0x67f   : > { %v3142_v13 = vpop.f32.mrb[156].mxu0 }
 0x680   : > { %v3144_v14 = vpop.f32.mrb[157].mxu0 }
 0x681   : > { %v3145_v15 = vpop.f32.mrb[158].mxu0  ;;  %5458 = vmatpush3.bf16.msra.mxu1 %v6065_v58 }
 0x682   : > { %v3366_v16 = vpack.c.bf16 %v3145_v15, %v3142_v13  ;;  %v3147_v17 = vpop.f32.mrb[159].mxu0  ;;  %5459 = vmatprep.subr.bf16.mxu1 %v6066_v61 }
 0x684   : > { %5400 = vmatmul.mubr.bf16.gmra.mrb[132].mxu1 %v3366_v16 }
 0x685   : > { %5460 = vmatpush3.bf16.msra.mxu1 %v6066_v61 }
 0x686   : > { %5461 = vmatprep.subr.bf16.mxu1 %v6067_v1 }
 0x687   : > { %v3150_v18 = vpop.f32.mrb[160].mxu0 }
 0x688   : > { %v3152_v19 = vpop.f32.mrb[161].mxu0 }
 0x689   : > { %v3153_v20 = vpop.f32.mrb[162].mxu0  ;;  %5462 = vmatpush3.bf16.msra.mxu1 %v6067_v1 }
 0x68a   : > { %v3367_v21 = vpack.c.bf16 %v3153_v20, %v3150_v18  ;;  %v3155_v22 = vpop.f32.mrb[163].mxu0  ;;  %5463 = vmatprep.subr.bf16.mxu1 %v6068_v4 }
 0x68c   : > { %5403 = vmatprep.mubr.bf16.mxu1 %v3367_v21 }
 0x68d   : > { %5464 = vmatpush3.bf16.msra.mxu1 %v6068_v4 }
 0x68e   : > { %5465 = vmatprep.subr.bf16.mxu1 %v6069_v33 }
 0x68f   : > { %v3158_v23 = vpop.f32.mrb[164].mxu0 }
 0x690   : > { %v3160_v24 = vpop.f32.mrb[165].mxu0 }
 0x691   : > { %v3161_v25 = vpop.f32.mrb[166].mxu0  ;;  %5466 = vmatpush3.bf16.msra.mxu1 %v6069_v33 }
 0x692   : > { %v3368_v26 = vpack.c.bf16 %v3161_v25, %v3158_v23  ;;  %v3163_v27 = vpop.f32.mrb[167].mxu0 }
 0x694   : > { %5404 = vmatmul.mubr.bf16.gmra.mrb[136].mxu1 %v3368_v26 }
 0x697   : > { %v3166_v28 = vpop.f32.mrb[168].mxu0 }
 0x698   : > { %v3168_v29 = vpop.f32.mrb[169].mxu0 }
 0x699   : > { %v3169_v30 = vpop.f32.mrb[170].mxu0 }
 0x69a   : > { %v3369_v31 = vpack.c.bf16 %v3169_v30, %v3166_v28  ;;  %v3171_v32 = vpop.f32.mrb[171].mxu0 }
 0x69c   : > { %5407 = vmatprep.mubr.bf16.mxu1 %v3369_v31 }
 0x69f   : > { %v3174_v34 = vpop.f32.mrb[172].mxu0 }
 0x6a0   : > { %v3176_v35 = vpop.f32.mrb[173].mxu0 }
 0x6a1   : > { %v3177_v36 = vpop.f32.mrb[174].mxu0 }
 0x6a2   : > { %v3370_v37 = vpack.c.bf16 %v3177_v36, %v3174_v34  ;;  %v3179_v38 = vpop.f32.mrb[175].mxu0 }
 0x6a4   : > { %5408 = vmatmul.mubr.bf16.gmra.mrb[140].mxu1 %v3370_v37 }
 0x6a7   : > { %v3182_v40 = vpop.f32.mrb[176].mxu0 }
 0x6a8   : > { %v3184_v41 = vpop.f32.mrb[177].mxu0 }
 0x6a9   : > { %v3185_v42 = vpop.f32.mrb[178].mxu0 }
 0x6aa   : > { %v3371_v44 = vpack.c.bf16 %v3185_v42, %v3182_v40  ;;  %v3187_v43 = vpop.f32.mrb[179].mxu0 }
 0x6ac   : > { %5411 = vmatprep.mubr.bf16.mxu1 %v3371_v44 }
 0x6af   : > { %v3190_v45 = vpop.f32.mrb[180].mxu0 }
 0x6b0   : > { %v3192_v46 = vpop.f32.mrb[181].mxu0 }
 0x6b1   : > { %v3193_v48 = vpop.f32.mrb[182].mxu0 }
 0x6b2   : > { %v3372_v49 = vpack.c.bf16 %v3193_v48, %v3190_v45  ;;  %v3195_v50 = vpop.f32.mrb[183].mxu0 }
 0x6b4   : > { %5412 = vmatmul.mubr.bf16.gmra.mrb[144].mxu1 %v3372_v49 }
 0x6b7   : > { %v3198_v52 = vpop.f32.mrb[184].mxu0 }
 0x6b8   : > { %v3200_v53 = vpop.f32.mrb[185].mxu0 }
 0x6b9   : > { %v3201_v55 = vpop.f32.mrb[186].mxu0 }
 0x6ba   : > { %v3373_v56 = vpack.c.bf16 %v3201_v55, %v3198_v52  ;;  %v3203_v57 = vpop.f32.mrb[187].mxu0 }
 0x6bc   : > { %5415 = vmatprep.mubr.bf16.mxu1 %v3373_v56 }
 0x6bf   : > { %v3206_v59 = vpop.f32.mrb[188].mxu0 }
 0x6c0   : > { %v3208_v60 = vpop.f32.mrb[189].mxu0 }
 0x6c1   : > { %v3209_v62 = vpop.f32.mrb[190].mxu0 }
 0x6c2   : > { %v3374_v63 = vpack.c.bf16 %v3209_v62, %v3206_v59  ;;  %v3211_v0 = vpop.f32.mrb[191].mxu0 }
 0x6c4   : > { %5416 = vmatmul.mubr.bf16.gmra.mrb[148].mxu1 %v3374_v63 }
 0x6c7   : > { %v3214_v2 = vpop.f32.mrb[192].mxu0 }
 0x6c8   : > { %v3216_v3 = vpop.f32.mrb[193].mxu0 }
 0x6c9   : > { %v3217_v39 = vpop.f32.mrb[194].mxu0 }
 0x6ca   : > { %v3375_v5 = vpack.c.bf16 %v3217_v39, %v3214_v2  ;;  %v3219_v6 = vpop.f32.mrb[195].mxu0 }
 0x6cc   : > { %5419 = vmatprep.mubr.bf16.mxu1 %v3375_v5 }
 0x6cf   : > { %v3222_v7 = vpop.f32.mrb[196].mxu0 }
 0x6d0   : > { %v3224_v8 = vpop.f32.mrb[197].mxu0 }
 0x6d1   : > { %v3225_v9 = vpop.f32.mrb[198].mxu0 }
 0x6d2   : > { %v3376_v10 = vpack.c.bf16 %v3225_v9, %v3222_v7  ;;  %v3227_v11 = vpop.f32.mrb[199].mxu0 }
 0x6d4   : > { %5420 = vmatmul.mubr.bf16.gmra.mrb[152].mxu1 %v3376_v10 }
 0x6d7   : > { %v3230_v12 = vpop.f32.mrb[200].mxu0 }
 0x6d8   : > { %v3232_v13 = vpop.f32.mrb[201].mxu0 }
 0x6d9   : > { %v3233_v14 = vpop.f32.mrb[202].mxu0 }
 0x6da   : > { %v3377_v15 = vpack.c.bf16 %v3233_v14, %v3230_v12  ;;  %v3235_v16 = vpop.f32.mrb[203].mxu0 }
 0x6dc   : > { %5423 = vmatprep.mubr.bf16.mxu1 %v3377_v15 }
 0x6df   : > { %v3238_v17 = vpop.f32.mrb[204].mxu0 }
 0x6e0   : > { %v3240_v18 = vpop.f32.mrb[205].mxu0 }
 0x6e1   : > { %v3241_v19 = vpop.f32.mrb[206].mxu0  ;;  %v7365_v18 = vld [vmem:[%s7582_s5 + $0x1] ss:$0 sm:$0xff] }
 0x6e2   : > { %v3378_v20 = vpack.c.bf16 %v3241_v19, %v3238_v17  ;;  %v3243_v21 = vpop.f32.mrb[207].mxu0 }
 0x6e4   : > { %5424 = vmatmul.mubr.bf16.gmra.mrb[156].mxu1 %v3378_v20 }
 0x6e7   : > { %v3246_v22 = vpop.f32.mrb[208].mxu0 }
 0x6e8   : > { %v3248_v23 = vpop.f32.mrb[209].mxu0 }
 0x6e9   : > { %v3249_v24 = vpop.f32.mrb[210].mxu0 }
 0x6ea   : > { %v3379_v25 = vpack.c.bf16 %v3249_v24, %v3246_v22  ;;  %v3251_v26 = vpop.f32.mrb[211].mxu0 }
 0x6ec   : > { %5427 = vmatprep.mubr.bf16.mxu1 %v3379_v25 }
 0x6ef   : > { %v3254_v27 = vpop.f32.mrb[212].mxu0 }
 0x6f0   : > { %v3256_v28 = vpop.f32.mrb[213].mxu0 }
 0x6f1   : > { %v3257_v29 = vpop.f32.mrb[214].mxu0 }
 0x6f2   : > { %v3380_v30 = vpack.c.bf16 %v3257_v29, %v3254_v27  ;;  %v3259_v31 = vpop.f32.mrb[215].mxu0 }
 0x6f4   : > { %5428 = vmatmul.mubr.bf16.gmra.mrb[160].mxu1 %v3380_v30 }
 0x6f7   : > { %v3262_v32 = vpop.f32.mrb[216].mxu0 }
 0x6f8   : > { %v3264_v34 = vpop.f32.mrb[217].mxu0 }
 0x6f9   : > { %v3265_v35 = vpop.f32.mrb[218].mxu0 }
 0x6fa   : > { %v3381_v36 = vpack.c.bf16 %v3265_v35, %v3262_v32  ;;  %v3267_v37 = vpop.f32.mrb[219].mxu0 }
 0x6fc   : > { %5431 = vmatprep.mubr.bf16.mxu1 %v3381_v36 }
 0x6ff   : > { %v3270_v38 = vpop.f32.mrb[220].mxu0 }
 0x700   : > { %v3272_v40 = vpop.f32.mrb[221].mxu0 }
 0x701   : > { %v3273_v41 = vpop.f32.mrb[222].mxu0 }
 0x702   : > { %v3382_v42 = vpack.c.bf16 %v3273_v41, %v3270_v38  ;;  %v3275_v44 = vpop.f32.mrb[223].mxu0 }
 0x704   : > { %5432 = vmatmul.mubr.bf16.gmra.mrb[164].mxu1 %v3382_v42 }
 0x707   : > { %v3278_v43 = vpop.f32.mrb[224].mxu0 }
 0x708   : > { %v3280_v45 = vpop.f32.mrb[225].mxu0 }
 0x709   : > { %v3281_v46 = vpop.f32.mrb[226].mxu0 }
 0x70a   : > { %v3383_v47 = vpack.c.bf16 %v3281_v46, %v3278_v43  ;;  %v3283_v48 = vpop.f32.mrb[227].mxu0 }
 0x70c   : > { %5435 = vmatprep.mubr.bf16.mxu1 %v3383_v47 }
 0x70f   : > { %v3286_v49 = vpop.f32.mrb[228].mxu0 }
 0x710   : > { %v3288_v50 = vpop.f32.mrb[229].mxu0 }
 0x711   : > { %v3289_v51 = vpop.f32.mrb[230].mxu0 }
 0x712   : > { %v3384_v52 = vpack.c.bf16 %v3289_v51, %v3286_v49  ;;  %v3291_v53 = vpop.f32.mrb[231].mxu0 }
 0x714   : > { %5436 = vmatmul.mubr.bf16.gmra.mrb[168].mxu1 %v3384_v52 }
 0x717   : > { %v3294_v54 = vpop.f32.mrb[232].mxu0 }
 0x718   : > { %v3296_v55 = vpop.f32.mrb[233].mxu0 }
 0x719   : > { %v3297_v56 = vpop.f32.mrb[234].mxu0 }
 0x71a   : > { %v3385_v57 = vpack.c.bf16 %v3297_v56, %v3294_v54  ;;  %v3299_v58 = vpop.f32.mrb[235].mxu0 }
 0x71c   : > { %5439 = vmatprep.mubr.bf16.mxu1 %v3385_v57 }
 0x71f   : > { %v3302_v59 = vpop.f32.mrb[236].mxu0 }
 0x720   : > { %v3304_v60 = vpop.f32.mrb[237].mxu0 }
 0x721   : > { %v3305_v61 = vpop.f32.mrb[238].mxu0 }
 0x722   : > { %v3386_v62 = vpack.c.bf16 %v3305_v61, %v3302_v59  ;;  %v3307_v63 = vpop.f32.mrb[239].mxu0 }
 0x724   : > { %5440 = vmatmul.mubr.bf16.gmra.mrb[172].mxu1 %v3386_v62 }
 0x727   : > { %v3310_v0 = vpop.f32.mrb[240].mxu0 }
 0x728   : > { %v3312_v1 = vpop.f32.mrb[241].mxu0 }
 0x729   : > { %v3313_v2 = vpop.f32.mrb[242].mxu0 }
 0x72a   : > { %v3387_v3 = vpack.c.bf16 %v3313_v2, %v3310_v0  ;;  %v3315_v4 = vpop.f32.mrb[243].mxu0 }
 0x72c   : > { %5443 = vmatprep.mubr.bf16.mxu1 %v3387_v3 }
 0x72f   : > { %v3318_v39 = vpop.f32.mrb[244].mxu0 }
 0x730   : > { %v3320_v5 = vpop.f32.mrb[245].mxu0 }
 0x731   : > { %v3321_v6 = vpop.f32.mrb[246].mxu0 }
 0x732   : > { %v3388_v33 = vpack.c.bf16 %v3321_v6, %v3318_v39  ;;  %v3323_v7 = vpop.f32.mrb[247].mxu0 }
 0x734   : > { %5444 = vmatmul.mubr.bf16.gmra.mrb[176].mxu1 %v3388_v33 }
 0x737   : > { %v3326_v8 = vpop.f32.mrb[248].mxu0 }
 0x738   : > { %v3328_v9 = vpop.f32.mrb[249].mxu0 }
 0x739   : > { %v3329_v10 = vpop.f32.mrb[250].mxu0 }
 0x73a   : > { %v3389_v11 = vpack.c.bf16 %v3329_v10, %v3326_v8  ;;  %v3331_v12 = vpop.f32.mrb[251].mxu0 }
 0x73c   : > { %5447 = vmatprep.mubr.bf16.mxu1 %v3389_v11 }
 0x73f   : > { %v3334_v13 = vpop.f32.mrb[252].mxu0 }
 0x740   : > { %v3336_v14 = vpop.f32.mrb[253].mxu0 }
 0x741   : > { %v3337_v15 = vpop.f32.mrb[254].mxu0 }
 0x742   : > { %v3390_v16 = vpack.c.bf16 %v3337_v15, %v3334_v13  ;;  %v3339_v17 = vpop.f32.mrb[255].mxu0 }
 0x744   : > { %5448 = vmatmul.mubr.bf16.gmra.mrb[180].mxu1 %v3390_v16 }
 0x747   : > { %v5389_v19 = vpop.f32.mrb[0].mxu0  ;;  %v5397_v20 = vpop.f32.mrb[128].mxu1 }
 0x748   : > { %v3486_v21 = vadd.f32 %v5389_v19, %v7365_v18  ;;  %v3518_v22 = vadd.f32 %v5397_v20, %v7365_v18  ;;  %v3477_v23 = vpop.f32.mrb[1].mxu0  ;;  %v3509_v24 = vpop.f32.mrb[129].mxu1 }
 0x749   : > { %v3478_v25 = vadd.f32 %v7365_v18, %v3477_v23  ;;  %v3510_v26 = vadd.f32 %v7365_v18, %v3509_v24  ;;  %v5390_v27 = vpop.f32.mrb[2].mxu0  ;;  %v5398_v28 = vpop.f32.mrb[130].mxu1 }
 0x74a   : > { %v3489_v29 = vadd.f32 %v5390_v27, %v7365_v18  ;;  %v3521_v30 = vadd.f32 %v5398_v28, %v7365_v18  ;;  %v3480_v31 = vpop.f32.mrb[3].mxu0  ;;  %v3512_v32 = vpop.f32.mrb[131].mxu1  ;;  %v3734_v36 = vmax.f32 %v3486_v21, 0.0  ;;  %v3742_v37 = vmax.f32 %v3518_v22, 0.0 }
 0x74b   : > { %v3481_v34 = vadd.f32 %v7365_v18, %v3480_v31  ;;  %v3513_v35 = vadd.f32 %v7365_v18, %v3512_v32  ;;  %v3732_v41 = vmax.f32 %v3478_v25, 0.0  ;;  %v3740_v42 = vmax.f32 %v3510_v26, 0.0 }
 0x74c   : > { %v3735_v38 = vmax.f32 %v3489_v29, 0.0  ;;  %v3743_v40 = vmax.f32 %v3521_v30, 0.0 }
 0x74d   : > { %v3733_v44 = vmax.f32 %v3481_v34, 0.0  ;;  %v3741_v43 = vmax.f32 %v3513_v35, 0.0 }
 0x74e   : > { %v3797_v45 = vpack.c.bf16 %v3735_v38, %v3734_v36  ;;  %v3801_v46 = vpack.c.bf16 %v3743_v40, %v3742_v37 }
 0x74f   : > { %v3796_v47 = vpack.c.bf16 %v3733_v44, %v3732_v41  ;;  %v3800_v48 = vpack.c.bf16 %v3741_v43, %v3740_v42  ;;  %v5393_v49 = vpop.f32.mrb[4].mxu0 }
 0x750   : > { %v3502_v50 = vadd.f32 %v5393_v49, %v7365_v18  ;;  %v3493_v51 = vpop.f32.mrb[5].mxu0 }
 0x751   : > { %v3494_v52 = vadd.f32 %v7365_v18, %v3493_v51  ;;  %v5394_v53 = vpop.f32.mrb[6].mxu0  ;;  %5467 = vmatprep.mubr.bf16.mxu1 %v3796_v47 }
 0x752   : > { %v3505_v54 = vadd.f32 %v5394_v53, %v7365_v18  ;;  %v3496_v55 = vpop.f32.mrb[7].mxu0  ;;  %5468 = vmatmul.mubr.bf16.vlgmr.msra.gmra.mrb[184].mxu1 %v3797_v45  ;;  %v3738_v57 = vmax.f32 %v3502_v50, 0.0 }
 0x753   : > { %v3497_v56 = vadd.f32 %v7365_v18, %v3496_v55  ;;  %v3736_v59 = vmax.f32 %v3494_v52, 0.0 }
 0x754   : > { %v3739_v58 = vmax.f32 %v3505_v54, 0.0 }
 0x755   : > { %v3737_v60 = vmax.f32 %v3497_v56, 0.0 }
 0x756   : > { %v3799_v61 = vpack.c.bf16 %v3739_v58, %v3738_v57 }
 0x757   : > { %v3798_v62 = vpack.c.bf16 %v3737_v60, %v3736_v59  ;;  %v5401_v63 = vpop.f32.mrb[132].mxu1 }
 0x758   : > { %v3534_v0 = vadd.f32 %v5401_v63, %v7365_v18  ;;  %v3525_v1 = vpop.f32.mrb[133].mxu1 }
 0x759   : > { %v3526_v2 = vadd.f32 %v7365_v18, %v3525_v1  ;;  %v5402_v3 = vpop.f32.mrb[134].mxu1  ;;  %5471 = vmatprep.mubr.bf16.mxu1 %v3798_v62 }
 0x75a   : > { %v3537_v4 = vadd.f32 %v5402_v3, %v7365_v18  ;;  %v3528_v39 = vpop.f32.mrb[135].mxu1  ;;  %5472 = vmatmul.mubr.bf16.gmra.mrb[188].mxu1 %v3799_v61  ;;  %v3746_v6 = vmax.f32 %v3534_v0, 0.0 }
 0x75b   : > { %v3529_v5 = vadd.f32 %v7365_v18, %v3528_v39  ;;  %5475 = vmatprep.mubr.bf16.mxu1 %v3800_v48  ;;  %v3744_v7 = vmax.f32 %v3526_v2, 0.0 }
 0x75c   : > { %v3747_v33 = vmax.f32 %v3537_v4, 0.0 }
 0x75d   : > { %v3745_v8 = vmax.f32 %v3529_v5, 0.0 }
 0x75e   : > { %v3803_v9 = vpack.c.bf16 %v3747_v33, %v3746_v6 }
 0x75f   : > { %v3802_v10 = vpack.c.bf16 %v3745_v8, %v3744_v7 }
 0x762   : > { %5476 = vmatmul.mubr.bf16.gmra.mrb[192].mxu1 %v3801_v46 }
 0x763   : > { %5479 = vmatprep.mubr.bf16.mxu1 %v3802_v10 }
 0x767   : > { %v5405_v11 = vpop.f32.mrb[136].mxu1 }
 0x768   : > { %v3550_v12 = vadd.f32 %v5405_v11, %v7365_v18  ;;  %v3541_v13 = vpop.f32.mrb[137].mxu1 }
 0x769   : > { %v3542_v14 = vadd.f32 %v7365_v18, %v3541_v13  ;;  %v5406_v15 = vpop.f32.mrb[138].mxu1 }
 0x76a   : > { %v3553_v16 = vadd.f32 %v5406_v15, %v7365_v18  ;;  %v3544_v17 = vpop.f32.mrb[139].mxu1  ;;  %5480 = vmatmul.mubr.bf16.gmra.mrb[196].mxu1 %v3803_v9  ;;  %v3750_v20 = vmax.f32 %v3550_v12, 0.0 }
 0x76b   : > { %v3545_v19 = vadd.f32 %v7365_v18, %v3544_v17  ;;  %v3748_v22 = vmax.f32 %v3542_v14, 0.0 }
 0x76c   : > { %v3751_v21 = vmax.f32 %v3553_v16, 0.0 }
 0x76d   : > { %v3749_v23 = vmax.f32 %v3545_v19, 0.0 }
 0x76e   : > { %v3805_v24 = vpack.c.bf16 %v3751_v21, %v3750_v20 }
 0x76f   : > { %v3804_v25 = vpack.c.bf16 %v3749_v23, %v3748_v22 }
 0x771   : > { %5483 = vmatprep.mubr.bf16.mxu1 %v3804_v25 }
 0x772   : > { %5484 = vmatmul.mubr.bf16.gmra.mrb[200].mxu1 %v3805_v24 }
 0x777   : > { %v5409_v26 = vpop.f32.mrb[140].mxu1 }
 0x778   : > { %v3566_v27 = vadd.f32 %v5409_v26, %v7365_v18  ;;  %v3557_v28 = vpop.f32.mrb[141].mxu1 }
 0x779   : > { %v3558_v29 = vadd.f32 %v7365_v18, %v3557_v28  ;;  %v5410_v30 = vpop.f32.mrb[142].mxu1 }
 0x77a   : > { %v3569_v31 = vadd.f32 %v5410_v30, %v7365_v18  ;;  %v3560_v32 = vpop.f32.mrb[143].mxu1  ;;  %v3754_v35 = vmax.f32 %v3566_v27, 0.0 }
 0x77b   : > { %v3561_v34 = vadd.f32 %v7365_v18, %v3560_v32  ;;  %v3752_v37 = vmax.f32 %v3558_v29, 0.0 }
 0x77c   : > { %v3755_v36 = vmax.f32 %v3569_v31, 0.0 }
 0x77d   : > { %v3753_v38 = vmax.f32 %v3561_v34, 0.0 }
 0x77e   : > { %v3807_v40 = vpack.c.bf16 %v3755_v36, %v3754_v35 }
 0x77f   : > { %v3806_v41 = vpack.c.bf16 %v3753_v38, %v3752_v37 }
 0x781   : > { %5487 = vmatprep.mubr.bf16.mxu1 %v3806_v41 }
 0x782   : > { %5488 = vmatmul.mubr.bf16.gmra.mrb[204].mxu1 %v3807_v40 }
 0x787   : > { %v5413_v42 = vpop.f32.mrb[144].mxu1 }
 0x788   : > { %v3582_v44 = vadd.f32 %v5413_v42, %v7365_v18  ;;  %v3573_v43 = vpop.f32.mrb[145].mxu1 }
 0x789   : > { %v3574_v45 = vadd.f32 %v7365_v18, %v3573_v43  ;;  %v5414_v46 = vpop.f32.mrb[146].mxu1 }
 0x78a   : > { %v3585_v47 = vadd.f32 %v5414_v46, %v7365_v18  ;;  %v3576_v48 = vpop.f32.mrb[147].mxu1  ;;  %v3758_v50 = vmax.f32 %v3582_v44, 0.0 }
 0x78b   : > { %v3577_v49 = vadd.f32 %v7365_v18, %v3576_v48  ;;  %v3756_v52 = vmax.f32 %v3574_v45, 0.0 }
 0x78c   : > { %v3759_v51 = vmax.f32 %v3585_v47, 0.0 }
 0x78d   : > { %v3757_v53 = vmax.f32 %v3577_v49, 0.0 }
 0x78e   : > { %v3809_v54 = vpack.c.bf16 %v3759_v51, %v3758_v50 }
 0x78f   : > { %v3808_v55 = vpack.c.bf16 %v3757_v53, %v3756_v52 }
 0x791   : > { %5491 = vmatprep.mubr.bf16.mxu1 %v3808_v55 }
 0x792   : > { %5492 = vmatmul.mubr.bf16.gmra.mrb[208].mxu1 %v3809_v54 }
 0x797   : > { %v5417_v56 = vpop.f32.mrb[148].mxu1 }
 0x798   : > { %v3598_v57 = vadd.f32 %v5417_v56, %v7365_v18  ;;  %v3589_v58 = vpop.f32.mrb[149].mxu1 }
 0x799   : > { %v3590_v59 = vadd.f32 %v7365_v18, %v3589_v58  ;;  %v5418_v60 = vpop.f32.mrb[150].mxu1 }
 0x79a   : > { %v3601_v61 = vadd.f32 %v5418_v60, %v7365_v18  ;;  %v3592_v62 = vpop.f32.mrb[151].mxu1  ;;  %v3762_v0 = vmax.f32 %v3598_v57, 0.0 }
 0x79b   : > { %v3593_v63 = vadd.f32 %v7365_v18, %v3592_v62  ;;  %v3760_v2 = vmax.f32 %v3590_v59, 0.0 }
 0x79c   : > { %v3763_v1 = vmax.f32 %v3601_v61, 0.0 }
 0x79d   : > { %v3761_v3 = vmax.f32 %v3593_v63, 0.0 }
 0x79e   : > { %v3811_v4 = vpack.c.bf16 %v3763_v1, %v3762_v0 }
 0x79f   : > { %v3810_v39 = vpack.c.bf16 %v3761_v3, %v3760_v2 }
 0x7a1   : > { %5495 = vmatprep.mubr.bf16.mxu1 %v3810_v39 }
 0x7a2   : > { %5496 = vmatmul.mubr.bf16.gmra.mrb[212].mxu1 %v3811_v4 }
 0x7a7   : > { %v5421_v5 = vpop.f32.mrb[152].mxu1 }
 0x7a8   : > { %v3614_v6 = vadd.f32 %v5421_v5, %v7365_v18  ;;  %v3605_v33 = vpop.f32.mrb[153].mxu1 }
 0x7a9   : > { %v3606_v7 = vadd.f32 %v7365_v18, %v3605_v33  ;;  %v5422_v8 = vpop.f32.mrb[154].mxu1 }
 0x7aa   : > { %v3617_v9 = vadd.f32 %v5422_v8, %v7365_v18  ;;  %v3608_v10 = vpop.f32.mrb[155].mxu1  ;;  %v3766_v12 = vmax.f32 %v3614_v6, 0.0 }
 0x7ab   : > { %v3609_v11 = vadd.f32 %v7365_v18, %v3608_v10  ;;  %v3764_v14 = vmax.f32 %v3606_v7, 0.0 }
 0x7ac   : > { %v3767_v13 = vmax.f32 %v3617_v9, 0.0 }
 0x7ad   : > { %v3765_v15 = vmax.f32 %v3609_v11, 0.0 }
 0x7ae   : > { %v3813_v16 = vpack.c.bf16 %v3767_v13, %v3766_v12 }
 0x7af   : > { %v3812_v17 = vpack.c.bf16 %v3765_v15, %v3764_v14 }
 0x7b1   : > { %5499 = vmatprep.mubr.bf16.mxu1 %v3812_v17 }
 0x7b2   : > { %5500 = vmatmul.mubr.bf16.gmra.mrb[216].mxu1 %v3813_v16 }
 0x7b7   : > { %v5425_v19 = vpop.f32.mrb[156].mxu1 }
 0x7b8   : > { %v3630_v20 = vadd.f32 %v5425_v19, %v7365_v18  ;;  %v3621_v21 = vpop.f32.mrb[157].mxu1 }
 0x7b9   : > { %v3622_v22 = vadd.f32 %v7365_v18, %v3621_v21  ;;  %v5426_v23 = vpop.f32.mrb[158].mxu1 }
 0x7ba   : > { %v3633_v24 = vadd.f32 %v5426_v23, %v7365_v18  ;;  %v3624_v25 = vpop.f32.mrb[159].mxu1  ;;  %v3770_v27 = vmax.f32 %v3630_v20, 0.0 }
 0x7bb   : > { %v3625_v26 = vadd.f32 %v7365_v18, %v3624_v25  ;;  %v3768_v29 = vmax.f32 %v3622_v22, 0.0 }
 0x7bc   : > { %v3771_v28 = vmax.f32 %v3633_v24, 0.0 }
 0x7bd   : > { %v3769_v30 = vmax.f32 %v3625_v26, 0.0 }
 0x7be   : > { %v3815_v31 = vpack.c.bf16 %v3771_v28, %v3770_v27 }
 0x7bf   : > { %v3814_v32 = vpack.c.bf16 %v3769_v30, %v3768_v29 }
 0x7c1   : > { %5503 = vmatprep.mubr.bf16.mxu1 %v3814_v32 }
 0x7c2   : > { %5504 = vmatmul.mubr.bf16.gmra.mrb[220].mxu1 %v3815_v31 }
 0x7c7   : > { %v5429_v34 = vpop.f32.mrb[160].mxu1 }
 0x7c8   : > { %v3646_v35 = vadd.f32 %v5429_v34, %v7365_v18  ;;  %v3637_v36 = vpop.f32.mrb[161].mxu1 }
 0x7c9   : > { %v3638_v37 = vadd.f32 %v7365_v18, %v3637_v36  ;;  %v5430_v38 = vpop.f32.mrb[162].mxu1 }
 0x7ca   : > { %v3649_v40 = vadd.f32 %v5430_v38, %v7365_v18  ;;  %v3640_v41 = vpop.f32.mrb[163].mxu1  ;;  %v3774_v44 = vmax.f32 %v3646_v35, 0.0 }
 0x7cb   : > { %v3641_v42 = vadd.f32 %v7365_v18, %v3640_v41  ;;  %v3772_v45 = vmax.f32 %v3638_v37, 0.0 }
 0x7cc   : > { %v3775_v43 = vmax.f32 %v3649_v40, 0.0 }
 0x7cd   : > { %v3773_v46 = vmax.f32 %v3641_v42, 0.0 }
 0x7ce   : > { %v3817_v47 = vpack.c.bf16 %v3775_v43, %v3774_v44 }
 0x7cf   : > { %v3816_v48 = vpack.c.bf16 %v3773_v46, %v3772_v45 }
 0x7d1   : > { %5507 = vmatprep.mubr.bf16.mxu1 %v3816_v48 }
 0x7d2   : > { %5508 = vmatmul.mubr.bf16.gmra.mrb[224].mxu1 %v3817_v47 }
 0x7d7   : > { %v5433_v49 = vpop.f32.mrb[164].mxu1 }
 0x7d8   : > { %v3662_v50 = vadd.f32 %v5433_v49, %v7365_v18  ;;  %v3653_v51 = vpop.f32.mrb[165].mxu1 }
 0x7d9   : > { %v3654_v52 = vadd.f32 %v7365_v18, %v3653_v51  ;;  %v5434_v53 = vpop.f32.mrb[166].mxu1 }
 0x7da   : > { %v3665_v54 = vadd.f32 %v5434_v53, %v7365_v18  ;;  %v3656_v55 = vpop.f32.mrb[167].mxu1  ;;  %v3778_v57 = vmax.f32 %v3662_v50, 0.0 }
 0x7db   : > { %v3657_v56 = vadd.f32 %v7365_v18, %v3656_v55  ;;  %v3776_v59 = vmax.f32 %v3654_v52, 0.0 }
 0x7dc   : > { %v3779_v58 = vmax.f32 %v3665_v54, 0.0 }
 0x7dd   : > { %v3777_v60 = vmax.f32 %v3657_v56, 0.0 }
 0x7de   : > { %v3819_v61 = vpack.c.bf16 %v3779_v58, %v3778_v57 }
 0x7df   : > { %v3818_v62 = vpack.c.bf16 %v3777_v60, %v3776_v59 }
 0x7e1   : > { %5511 = vmatprep.mubr.bf16.mxu1 %v3818_v62 }
 0x7e2   : > { %5512 = vmatmul.mubr.bf16.gmra.mrb[228].mxu1 %v3819_v61 }
 0x7e7   : > { %v5437_v63 = vpop.f32.mrb[168].mxu1 }
 0x7e8   : > { %v3678_v0 = vadd.f32 %v5437_v63, %v7365_v18  ;;  %v3669_v1 = vpop.f32.mrb[169].mxu1 }
 0x7e9   : > { %v3670_v2 = vadd.f32 %v7365_v18, %v3669_v1  ;;  %v5438_v3 = vpop.f32.mrb[170].mxu1 }
 0x7ea   : > { %v3681_v4 = vadd.f32 %v5438_v3, %v7365_v18  ;;  %v3672_v39 = vpop.f32.mrb[171].mxu1  ;;  %v3782_v6 = vmax.f32 %v3678_v0, 0.0 }
 0x7eb   : > { %v3673_v5 = vadd.f32 %v7365_v18, %v3672_v39  ;;  %v3780_v7 = vmax.f32 %v3670_v2, 0.0 }
 0x7ec   : > { %v3783_v33 = vmax.f32 %v3681_v4, 0.0 }
 0x7ed   : > { %v3781_v8 = vmax.f32 %v3673_v5, 0.0 }
 0x7ee   : > { %v3821_v9 = vpack.c.bf16 %v3783_v33, %v3782_v6 }
 0x7ef   : > { %v3820_v10 = vpack.c.bf16 %v3781_v8, %v3780_v7 }
 0x7f1   : > { %5515 = vmatprep.mubr.bf16.mxu1 %v3820_v10 }
 0x7f2   : > { %5516 = vmatmul.mubr.bf16.gmra.mrb[232].mxu1 %v3821_v9 }
 0x7f7   : > { %v5441_v11 = vpop.f32.mrb[172].mxu1 }
 0x7f8   : > { %v3694_v12 = vadd.f32 %v5441_v11, %v7365_v18  ;;  %v3685_v13 = vpop.f32.mrb[173].mxu1 }
 0x7f9   : > { %v3686_v14 = vadd.f32 %v7365_v18, %v3685_v13  ;;  %v5442_v15 = vpop.f32.mrb[174].mxu1 }
 0x7fa   : > { %v3697_v16 = vadd.f32 %v5442_v15, %v7365_v18  ;;  %v3688_v17 = vpop.f32.mrb[175].mxu1  ;;  %v3786_v20 = vmax.f32 %v3694_v12, 0.0 }
 0x7fb   : > { %v3689_v19 = vadd.f32 %v7365_v18, %v3688_v17  ;;  %v3784_v22 = vmax.f32 %v3686_v14, 0.0 }
 0x7fc   : > { %v3787_v21 = vmax.f32 %v3697_v16, 0.0 }
 0x7fd   : > { %v3785_v23 = vmax.f32 %v3689_v19, 0.0 }
 0x7fe   : > { %v3823_v24 = vpack.c.bf16 %v3787_v21, %v3786_v20 }
 0x7ff   : > { %v3822_v25 = vpack.c.bf16 %v3785_v23, %v3784_v22 }
 0x801   : > { %5519 = vmatprep.mubr.bf16.mxu1 %v3822_v25 }
 0x802   : > { %5520 = vmatmul.mubr.bf16.gmra.mrb[236].mxu1 %v3823_v24 }
 0x807   : > { %v5445_v26 = vpop.f32.mrb[176].mxu1 }
 0x808   : > { %v3710_v27 = vadd.f32 %v5445_v26, %v7365_v18  ;;  %v3701_v28 = vpop.f32.mrb[177].mxu1 }
 0x809   : > { %v3702_v29 = vadd.f32 %v7365_v18, %v3701_v28  ;;  %v5446_v30 = vpop.f32.mrb[178].mxu1 }
 0x80a   : > { %v3713_v31 = vadd.f32 %v5446_v30, %v7365_v18  ;;  %v3704_v32 = vpop.f32.mrb[179].mxu1  ;;  %v3790_v35 = vmax.f32 %v3710_v27, 0.0 }
 0x80b   : > { %v3705_v34 = vadd.f32 %v7365_v18, %v3704_v32  ;;  %v3788_v37 = vmax.f32 %v3702_v29, 0.0 }
 0x80c   : > { %v3791_v36 = vmax.f32 %v3713_v31, 0.0 }
 0x80d   : > { %v3789_v38 = vmax.f32 %v3705_v34, 0.0 }
 0x80e   : > { %v3825_v40 = vpack.c.bf16 %v3791_v36, %v3790_v35 }
 0x80f   : > { %v3824_v41 = vpack.c.bf16 %v3789_v38, %v3788_v37  ;;  %v4437_v37 = vlaneseq }
 0x811   : > { %5523 = vmatprep.mubr.bf16.mxu1 %v3824_v41  ;;  %v4438_v41 = vand.u32 127, %v4437_v37 }
 0x812   : > { %5524 = vmatmul.mubr.bf16.gmra.mrb[240].mxu1 %v3825_v40 }
 0x817   : > { %v5449_v42 = vpop.f32.mrb[180].mxu1 }
 0x818   : > { %v3726_v44 = vadd.f32 %v5449_v42, %v7365_v18  ;;  %v3717_v43 = vpop.f32.mrb[181].mxu1 }
 0x819   : > { %v3718_v45 = vadd.f32 %v7365_v18, %v3717_v43  ;;  %v5450_v46 = vpop.f32.mrb[182].mxu1 }
 0x81a   : > { %v3729_v47 = vadd.f32 %v5450_v46, %v7365_v18  ;;  %v3720_v48 = vpop.f32.mrb[183].mxu1  ;;  %v3794_v50 = vmax.f32 %v3726_v44, 0.0  ;;  %v4443_v44 = vadd.s32 4294967288, %v4438_v41 }
 0x81b   : > { %v3721_v49 = vadd.f32 %v7365_v18, %v3720_v48  ;;  %v3792_v52 = vmax.f32 %v3718_v45, 0.0  ;;  %v4440_v45 = vshrl.u32 %v4437_v37, 7 }
 0x81c   : > { %v3795_v51 = vmax.f32 %v3729_v47, 0.0 }
 0x81d   : > { %v3793_v53 = vmax.f32 %v3721_v49, 0.0  ;;  %v7431_v47 = vsub.s32 %v4443_v44, %v4440_v45  ;;  %v7433_v49 = vsub.s32 %v4438_v41, %v4440_v45 }
 0x81e   : > { %v3827_v54 = vpack.c.bf16 %v3795_v51, %v3794_v50 }
 0x81f   : > { %v3826_v55 = vpack.c.bf16 %v3793_v53, %v3792_v52 }
 0x821   : > { %5527 = vmatprep.mubr.bf16.mxu1 %v3826_v55 }
 0x822   : > { %5528 = vmatmul.mubr.bf16.gmra.mrb[244].mxu1 %v3827_v54 }
 0x825   : > { %v5469_v56 = vpop.f32.mrb[184].mxu1 }
 0x826   : > { %4252 = vperm.xlu1 %5812, %v5469_v56   ;;  %v3926_v57 = vpop.f32.mrb[185].mxu1 }
 0x827   : > { %4246 = vperm.xlu0 %5813, %v3926_v57   ;;  %v5470_v58 = vpop.f32.mrb[186].mxu1 }
 0x828   : > { %v3929_v59 = vpop.f32.mrb[187].mxu1 }
 0x82a   : > { %4255 = vperm.xlu1 %5812, %v5470_v58  }
 0x82b   : > { %4249 = vperm.xlu0 %5813, %v3929_v59  }
 0x82d   : > { %v5473_v60 = vpop.f32.mrb[188].mxu1 }
 0x82e   : > { %v3942_v61 = vpop.f32.mrb[189].mxu1 }
 0x82f   : > { %4264 = vperm.xlu0 %5813, %v5473_v60   ;;  %v5474_v18 = vpop.f32.mrb[190].mxu1 }
 0x830   : > { %4267 = vperm.xlu1 %5812, %v5474_v18   ;;  %v3945_v62 = vpop.f32.mrb[191].mxu1 }
 0x833   : > { %4258 = vperm.xlu0 %5813, %v3942_v61  }
 0x834   : > { %4261 = vperm.xlu1 %5812, %v3945_v62  }
 0x835   : > { %v5477_v63 = vpop.f32.mrb[192].mxu1 }
 0x836   : > { %v3958_v0 = vpop.f32.mrb[193].mxu1 }
 0x837   : > { %4276 = vperm.xlu0 %5813, %v5477_v63   ;;  %v5478_v1 = vpop.f32.mrb[194].mxu1 }
 0x838   : > { %4279 = vperm.xlu1 %5812, %v5478_v1   ;;  %v3961_v2 = vpop.f32.mrb[195].mxu1 }
 0x83b   : > { %4270 = vperm.xlu0 %5813, %v3958_v0  }
 0x83c   : > { %4273 = vperm.xlu1 %5812, %v3961_v2  }
 0x83d   : > { %v5481_v3 = vpop.f32.mrb[196].mxu1 }
 0x83e   : > { %v3974_v4 = vpop.f32.mrb[197].mxu1 }
 0x83f   : > { %4288 = vperm.xlu0 %5813, %v5481_v3   ;;  %v5482_v39 = vpop.f32.mrb[198].mxu1 }
 0x840   : > { %4291 = vperm.xlu1 %5812, %v5482_v39   ;;  %v3977_v5 = vpop.f32.mrb[199].mxu1 }
 0x843   : > { %4282 = vperm.xlu0 %5813, %v3974_v4  }
 0x844   : > { %4285 = vperm.xlu1 %5812, %v3977_v5  }
 0x845   : > { %v5485_v6 = vpop.f32.mrb[200].mxu1 }
 0x846   : > { %v3990_v33 = vpop.f32.mrb[201].mxu1 }
 0x847   : > { %4300 = vperm.xlu0 %5813, %v5485_v6   ;;  %v5486_v7 = vpop.f32.mrb[202].mxu1 }
 0x848   : > { %4303 = vperm.xlu1 %5812, %v5486_v7   ;;  %v3993_v8 = vpop.f32.mrb[203].mxu1 }
 0x84b   : > { %4294 = vperm.xlu0 %5813, %v3990_v33  }
 0x84c   : > { %4297 = vperm.xlu1 %5812, %v3993_v8  }
 0x855   : > { %v5489_v9 = vpop.f32.mrb[204].mxu1 }
 0x856   : > { %4312 = vperm.xlu0 %5813, %v5489_v9   ;;  %v4006_v10 = vpop.f32.mrb[205].mxu1 }
 0x857   : > { %v5490_v11 = vpop.f32.mrb[206].mxu1 }
 0x858   : > { %4315 = vperm.xlu1 %5812, %v5490_v11   ;;  %v4009_v12 = vpop.f32.mrb[207].mxu1 }
 0x85a   : > { %4306 = vperm.xlu0 %5813, %v4006_v10  }
 0x85c   : > { %4309 = vperm.xlu1 %5812, %v4009_v12  }
 0x865   : > { %v5493_v13 = vpop.f32.mrb[208].mxu1 }
 0x866   : > { %4324 = vperm.xlu0 %5813, %v5493_v13   ;;  %v4022_v14 = vpop.f32.mrb[209].mxu1 }
 0x867   : > { %v5494_v15 = vpop.f32.mrb[210].mxu1 }
 0x868   : > { %4327 = vperm.xlu1 %5812, %v5494_v15   ;;  %v4025_v16 = vpop.f32.mrb[211].mxu1 }
 0x86a   : > { %4318 = vperm.xlu0 %5813, %v4022_v14  }
 0x86c   : > { %4321 = vperm.xlu1 %5812, %v4025_v16  }
 0x875   : > { %v5497_v17 = vpop.f32.mrb[212].mxu1 }
 0x876   : > { %4336 = vperm.xlu0 %5813, %v5497_v17   ;;  %v4038_v19 = vpop.f32.mrb[213].mxu1 }
 0x877   : > { %v5498_v20 = vpop.f32.mrb[214].mxu1 }
 0x878   : > { %4339 = vperm.xlu1 %5812, %v5498_v20   ;;  %v4041_v21 = vpop.f32.mrb[215].mxu1 }
 0x87a   : > { %4330 = vperm.xlu0 %5813, %v4038_v19  }
 0x87c   : > { %4333 = vperm.xlu1 %5812, %v4041_v21  }
 0x885   : > { %v5501_v22 = vpop.f32.mrb[216].mxu1 }
 0x886   : > { %4348 = vperm.xlu0 %5813, %v5501_v22   ;;  %v4054_v23 = vpop.f32.mrb[217].mxu1 }
 0x887   : > { %v5502_v24 = vpop.f32.mrb[218].mxu1 }
 0x888   : > { %4351 = vperm.xlu1 %5812, %v5502_v24   ;;  %v4057_v25 = vpop.f32.mrb[219].mxu1 }
 0x88a   : > { %4342 = vperm.xlu0 %5813, %v4054_v23  }
 0x88c   : > { %4345 = vperm.xlu1 %5812, %v4057_v25  }
 0x895   : > { %v5505_v26 = vpop.f32.mrb[220].mxu1 }
 0x896   : > { %4360 = vperm.xlu0 %5813, %v5505_v26   ;;  %v4070_v27 = vpop.f32.mrb[221].mxu1 }
 0x897   : > { %v5506_v28 = vpop.f32.mrb[222].mxu1 }
 0x898   : > { %4363 = vperm.xlu1 %5812, %v5506_v28   ;;  %v4073_v29 = vpop.f32.mrb[223].mxu1 }
 0x89a   : > { %4354 = vperm.xlu0 %5813, %v4070_v27  }
 0x89c   : > { %4357 = vperm.xlu1 %5812, %v4073_v29  }
 0x8a5   : > { %v4253_v30 = vpop.permute.xlu1 %4252  ;;  %v5509_v31 = vpop.f32.mrb[224].mxu1 }
 0x8a6   : > { %v4247_v32 = vpop.permute.xlu0 %4246  ;;  %4372 = vperm.xlu0 %5813, %v5509_v31   ;;  %v4086_v34 = vpop.f32.mrb[225].mxu1  ;;  %v4453_v60 = vrot.slane %v4253_v30, %v7433_v49 }
 0x8a7   : > { %v5510_v35 = vpop.f32.mrb[226].mxu1  ;;  %v4442_v61 = vrot.slane %v4247_v32, %v7433_v49 }
 0x8a8   : > { %4375 = vperm.xlu1 %5812, %v5510_v35   ;;  %v4089_v36 = vpop.f32.mrb[227].mxu1 }
 0x8a9   : > { %v4256_v40 = vpop.permute.xlu1 %4255 }
 0x8aa   : > { %v4250_v38 = vpop.permute.xlu0 %4249  ;;  %4366 = vperm.xlu0 %5813, %v4086_v34   ;;  %v4457_v53 = vrot.slane %v4256_v40, %v7431_v47 }
 0x8ab   : > { %v4447_v54 = vrot.slane %v4250_v38, %v7431_v47 }
 0x8ac   : > { %4369 = vperm.xlu1 %5812, %v4089_v36   ;;  %v4458_v62 = vsel %vm4448_vm0, %v4457_v53, %v4453_v60 }
 0x8ad   : > { %v4449_v63 = vsel %vm4448_vm0, %v4447_v54, %v4442_v61 }
 0x8ae   : > { %v4265_v42 = vpop.permute.xlu0 %4264  ;;  %v4730_v5 = vsel %vm4729_vm1, %v4458_v62, %v4449_v63 }
 0x8af   : > { %v4268_v43 = vpop.permute.xlu1 %4267  ;;  %v4471_v4 = vrot.slane %v4265_v42, %v7433_v49 }
 0x8b0   : > { %v4475_v39 = vrot.slane %v4268_v43, %v7431_v47 }
 0x8b2   : > { %v4259_v46 = vpop.permute.xlu0 %4258  ;;  %v4476_v9 = vsel %vm4448_vm0, %v4475_v39, %v4471_v4 }
 0x8b3   : > { %v4262_v48 = vpop.permute.xlu1 %4261  ;;  %v4462_v57 = vrot.slane %v4259_v46, %v7433_v49 }
 0x8b4   : > { %v4466_v58 = vrot.slane %v4262_v48, %v7431_v47 }
 0x8b5   : > { %v5513_v50 = vpop.f32.mrb[228].mxu1 }
 0x8b6   : > { %v4277_v51 = vpop.permute.xlu0 %4276  ;;  %4384 = vperm.xlu0 %5813, %v5513_v50   ;;  %v4102_v52 = vpop.f32.mrb[229].mxu1  ;;  %v4467_v1 = vsel %vm4448_vm0, %v4466_v58, %v4462_v57 }
 0x8b7   : > { %v4280_v55 = vpop.permute.xlu1 %4279  ;;  %v5514_v56 = vpop.f32.mrb[230].mxu1  ;;  %v4732_v33 = vsel %vm4731_vm2, %v4467_v1, %v4730_v5  ;;  %v4489_v10 = vrot.slane %v4277_v51, %v7433_v49 }
 0x8b8   : > { %4387 = vperm.xlu1 %5812, %v5514_v56   ;;  %v4105_v59 = vpop.f32.mrb[231].mxu1  ;;  %v4493_v11 = vrot.slane %v4280_v55, %v7431_v47  ;;  %v4734_v12 = vsel %vm4733_vm3, %v4476_v9, %v4732_v33 }
 0x8ba   : > { %v4271_v18 = vpop.permute.xlu0 %4270  ;;  %4378 = vperm.xlu0 %5813, %v4102_v52   ;;  %v4494_v21 = vsel %vm4448_vm0, %v4493_v11, %v4489_v10 }
 0x8bb   : > { %v4274_v0 = vpop.permute.xlu1 %4273  ;;  %v4480_v2 = vrot.slane %v4271_v18, %v7433_v49 }
 0x8bc   : > { %v4484_v3 = vrot.slane %v4274_v0, %v7431_v47  ;;  %4381 = vperm.xlu1 %5812, %v4105_v59  }
 0x8be   : > { %v4289_v6 = vpop.permute.xlu0 %4288  ;;  %v4485_v8 = vsel %vm4448_vm0, %v4484_v3, %v4480_v2 }
 0x8bf   : > { %v4292_v7 = vpop.permute.xlu1 %4291  ;;  %v4736_v14 = vsel %vm4735_vm4, %v4485_v8, %v4734_v12  ;;  %v4507_v15 = vrot.slane %v4289_v6, %v7433_v49 }
 0x8c0   : > { %v4511_v16 = vrot.slane %v4292_v7, %v7431_v47  ;;  %v4738_v23 = vsel %vm4737_vm5, %v4494_v21, %v4736_v14 }
 0x8c2   : > { %v4283_v13 = vpop.permute.xlu0 %4282  ;;  %v4512_v26 = vsel %vm4448_vm0, %v4511_v16, %v4507_v15 }
 0x8c3   : > { %v4498_v17 = vrot.slane %v4283_v13, %v7433_v49  ;;  %v4286_v19 = vpop.permute.xlu1 %4285 }
 0x8c4   : > { %v4502_v20 = vrot.slane %v4286_v19, %v7431_v47 }
 0x8c5   : > { %v5517_v22 = vpop.f32.mrb[232].mxu1 }
 0x8c6   : > { %v4503_v24 = vsel %vm4448_vm0, %v4502_v20, %v4498_v17  ;;  %4396 = vperm.xlu0 %5813, %v5517_v22   ;;  %v4118_v25 = vpop.f32.mrb[233].mxu1  ;;  %v4301_v32 = vpop.permute.xlu0 %4300 }
 0x8c7   : > { %v4740_v27 = vsel %vm4739_vm6, %v4503_v24, %v4738_v23  ;;  %v5518_v28 = vpop.f32.mrb[234].mxu1  ;;  %v4304_v35 = vpop.permute.xlu1 %4303  ;;  %v4525_v56 = vrot.slane %v4301_v32, %v7433_v49 }
 0x8c8   : > { %v4742_v29 = vsel %vm4741_vm7, %v4512_v26, %v4740_v27  ;;  %4399 = vperm.xlu1 %5812, %v5518_v28   ;;  %v4121_v30 = vpop.f32.mrb[235].mxu1  ;;  %v4529_v57 = vrot.slane %v4304_v35, %v7431_v47 }
 0x8c9   : > { %4769 = vst.msk [vmem:[%s7466_s28] sm:$0xff] %vm4768_vm8, %v4742_v29 }
 0x8ca   : > { %4390 = vperm.xlu0 %5813, %v4118_v25   ;;  %v4295_v38 = vpop.permute.xlu0 %4294  ;;  %v4530_v63 = vsel %vm4448_vm0, %v4529_v57, %v4525_v56 }
 0x8cb   : > { %v4298_v40 = vpop.permute.xlu1 %4297  ;;  %v4516_v53 = vrot.slane %v4295_v38, %v7433_v49 }
 0x8cc   : > { %4393 = vperm.xlu1 %5812, %v4121_v30   ;;  %v4520_v54 = vrot.slane %v4298_v40, %v7431_v47 }
 0x8ce   : > { %v4521_v61 = vsel %vm4448_vm0, %v4520_v54, %v4516_v53 }
 0x8cf   : > { %v4743_v3 = vsel %vm4729_vm1, %v4530_v63, %v4521_v61 }
 0x8d5   : > { %v5521_v31 = vpop.f32.mrb[236].mxu1  ;;  %v4313_v41 = vpop.permute.xlu0 %4312 }
 0x8d6   : > { %4408 = vperm.xlu0 %5813, %v5521_v31   ;;  %v4134_v34 = vpop.f32.mrb[237].mxu1  ;;  %v4543_v5 = vrot.slane %v4313_v41, %v7433_v49 }
 0x8d7   : > { %v5522_v36 = vpop.f32.mrb[238].mxu1  ;;  %v4316_v42 = vpop.permute.xlu1 %4315 }
 0x8d8   : > { %4411 = vperm.xlu1 %5812, %v5522_v36   ;;  %v4137_v37 = vpop.f32.mrb[239].mxu1  ;;  %v4547_v0 = vrot.slane %v4316_v42, %v7431_v47 }
 0x8d9   : > { %v4307_v43 = vpop.permute.xlu0 %4306 }
 0x8da   : > { %4402 = vperm.xlu0 %5813, %v4134_v34   ;;  %v4534_v60 = vrot.slane %v4307_v43, %v7433_v49  ;;  %v4548_v10 = vsel %vm4448_vm0, %v4547_v0, %v4543_v5 }
 0x8db   : > { %v4310_v46 = vpop.permute.xlu1 %4309 }
 0x8dc   : > { %4405 = vperm.xlu1 %5812, %v4137_v37   ;;  %v4538_v55 = vrot.slane %v4310_v46, %v7431_v47 }
 0x8de   : > { %v4539_v18 = vsel %vm4448_vm0, %v4538_v55, %v4534_v60 }
 0x8df   : > { %v4744_v6 = vsel %vm4731_vm2, %v4539_v18, %v4743_v3 }
 0x8e0   : > { %v4745_v13 = vsel %vm4733_vm3, %v4548_v10, %v4744_v6 }
 0x8e5   : > { %v5525_v44 = vpop.f32.mrb[240].mxu1  ;;  %v4325_v51 = vpop.permute.xlu0 %4324 }
 0x8e6   : > { %4420 = vperm.xlu0 %5813, %v5525_v44   ;;  %v4150_v45 = vpop.f32.mrb[241].mxu1  ;;  %v4561_v14 = vrot.slane %v4325_v51, %v7433_v49 }
 0x8e7   : > { %v5526_v48 = vpop.f32.mrb[242].mxu1  ;;  %v4328_v52 = vpop.permute.xlu1 %4327 }
 0x8e8   : > { %4423 = vperm.xlu1 %5812, %v5526_v48   ;;  %v4153_v50 = vpop.f32.mrb[243].mxu1  ;;  %v4565_v11 = vrot.slane %v4328_v52, %v7431_v47 }
 0x8e9   : > { %v4319_v58 = vpop.permute.xlu0 %4318 }
 0x8ea   : > { %4414 = vperm.xlu0 %5813, %v4150_v45   ;;  %v4552_v4 = vrot.slane %v4319_v58, %v7433_v49  ;;  %v4566_v21 = vsel %vm4448_vm0, %v4565_v11, %v4561_v14 }
 0x8eb   : > { %v4322_v59 = vpop.permute.xlu1 %4321 }
 0x8ec   : > { %4417 = vperm.xlu1 %5812, %v4153_v50   ;;  %v4556_v62 = vrot.slane %v4322_v59, %v7431_v47 }
 0x8ee   : > { %v4557_v8 = vsel %vm4448_vm0, %v4556_v62, %v4552_v4 }
 0x8ef   : > { %v4746_v15 = vsel %vm4735_vm4, %v4557_v8, %v4745_v13 }
 0x8f0   : > { %v4747_v23 = vsel %vm4737_vm5, %v4566_v21, %v4746_v15 }
 0x8f5   : > { %v4337_v1 = vpop.permute.xlu0 %4336  ;;  %v5529_v2 = vpop.f32.mrb[244].mxu1 }
 0x8f6   : > { %v4166_v39 = vpop.f32.mrb[245].mxu1  ;;  %v4579_v22 = vrot.slane %v4337_v1, %v7433_v49 }
 0x8f7   : > { %v4340_v33 = vpop.permute.xlu1 %4339  ;;  %4426 = vperm.xlu0 %5813, %v4166_v39   ;;  %v5530_v7 = vpop.f32.mrb[246].mxu1 }
 0x8f8   : > { %v4169_v9 = vpop.f32.mrb[247].mxu1  ;;  %v4583_v16 = vrot.slane %v4340_v33, %v7431_v47 }
 0x8f9   : > { %v4331_v12 = vpop.permute.xlu0 %4330  ;;  %4429 = vperm.xlu1 %5812, %v4169_v9  }
 0x8fa   : > { %v4570_v19 = vrot.slane %v4331_v12, %v7433_v49  ;;  %v4584_v25 = vsel %vm4448_vm0, %v4583_v16, %v4579_v22 }
 0x8fb   : > { %v4334_v17 = vpop.permute.xlu1 %4333  ;;  %4432 = vperm.xlu0 %5813, %v5529_v2  }
 0x8fc   : > { %v4574_v20 = vrot.slane %v4334_v17, %v7431_v47 }
 0x8fd   : > { %4435 = vperm.xlu1 %5812, %v5530_v7  }
 0x8fe   : > { %v4575_v24 = vsel %vm4448_vm0, %v4574_v20, %v4570_v19 }
 0x8ff   : > { %v4748_v26 = vsel %vm4739_vm6, %v4575_v24, %v4747_v23 }
 0x900   : > { %v4749_v27 = vsel %vm4741_vm7, %v4584_v25, %v4748_v26 }
 0x901   : > { %4770 = vst.msk [vmem:[%s7466_s28 + $0x8] sm:$0xff] %vm4768_vm8, %v4749_v27 }
 0x905   : > { %v4349_v28 = vpop.permute.xlu0 %4348 }
 0x906   : > { %v4597_v48 = vrot.slane %v4349_v28, %v7433_v49 }
 0x907   : > { %v4352_v29 = vpop.permute.xlu1 %4351 }
 0x908   : > { %v4601_v42 = vrot.slane %v4352_v29, %v7431_v47 }
 0x909   : > { %v4343_v30 = vpop.permute.xlu0 %4342 }
 0x90a   : > { %v4588_v44 = vrot.slane %v4343_v30, %v7433_v49  ;;  %v4602_v53 = vsel %vm4448_vm0, %v4601_v42, %v4597_v48 }
 0x90b   : > { %v4346_v31 = vpop.permute.xlu1 %4345 }
 0x90c   : > { %v4592_v40 = vrot.slane %v4346_v31, %v7431_v47 }
 0x90e   : > { %v4593_v50 = vsel %vm4448_vm0, %v4592_v40, %v4588_v44 }
 0x90f   : > { %v4750_v56 = vsel %vm4729_vm1, %v4602_v53, %v4593_v50 }
 0x915   : > { %v4361_v32 = vpop.permute.xlu0 %4360 }
 0x916   : > { %v4615_v58 = vrot.slane %v4361_v32, %v7433_v49 }
 0x917   : > { %v4364_v34 = vpop.permute.xlu1 %4363 }
 0x918   : > { %v4619_v54 = vrot.slane %v4364_v34, %v7431_v47 }
 0x919   : > { %v4355_v35 = vpop.permute.xlu0 %4354 }
 0x91a   : > { %v4606_v46 = vrot.slane %v4355_v35, %v7433_v49  ;;  %v4620_v18 = vsel %vm4448_vm0, %v4619_v54, %v4615_v58 }
 0x91b   : > { %v4358_v36 = vpop.permute.xlu1 %4357 }
 0x91c   : > { %v4610_v41 = vrot.slane %v4358_v36, %v7431_v47 }
 0x91e   : > { %v4611_v51 = vsel %vm4448_vm0, %v4610_v41, %v4606_v46 }
 0x91f   : > { %v4751_v59 = vsel %vm4731_vm2, %v4611_v51, %v4750_v56 }
 0x920   : > { %v4752_v0 = vsel %vm4733_vm3, %v4620_v18, %v4751_v59 }
 0x925   : > { %v4373_v37 = vpop.permute.xlu0 %4372 }
 0x926   : > { %v4633_v1 = vrot.slane %v4373_v37, %v7433_v49 }
 0x927   : > { %v4376_v38 = vpop.permute.xlu1 %4375 }
 0x928   : > { %v4637_v62 = vrot.slane %v4376_v38, %v7431_v47 }
 0x929   : > { %v4367_v43 = vpop.permute.xlu0 %4366 }
 0x92a   : > { %v4624_v57 = vrot.slane %v4367_v43, %v7433_v49  ;;  %v4638_v6 = vsel %vm4448_vm0, %v4637_v62, %v4633_v1 }
 0x92b   : > { %v4370_v45 = vpop.permute.xlu1 %4369 }
 0x92c   : > { %v4628_v52 = vrot.slane %v4370_v45, %v7431_v47 }
 0x92e   : > { %v4629_v61 = vsel %vm4448_vm0, %v4628_v52, %v4624_v57 }
 0x92f   : > { %v4753_v2 = vsel %vm4735_vm4, %v4629_v61, %v4752_v0 }
 0x930   : > { %v4754_v7 = vsel %vm4737_vm5, %v4638_v6, %v4753_v2 }
 0x935   : > { %v4385_v55 = vpop.permute.xlu0 %4384 }
 0x936   : > { %v4651_v33 = vrot.slane %v4385_v55, %v7433_v49 }
 0x937   : > { %v4388_v60 = vpop.permute.xlu1 %4387 }
 0x938   : > { %v4655_v3 = vrot.slane %v4388_v60, %v7431_v47 }
 0x939   : > { %v4379_v63 = vpop.permute.xlu0 %4378 }
 0x93a   : > { %v4642_v39 = vrot.slane %v4379_v63, %v7433_v49  ;;  %v4656_v9 = vsel %vm4448_vm0, %v4655_v3, %v4651_v33 }
 0x93b   : > { %v4382_v4 = vpop.permute.xlu1 %4381 }
 0x93c   : > { %v4646_v5 = vrot.slane %v4382_v4, %v7431_v47 }
 0x93e   : > { %v4647_v8 = vsel %vm4448_vm0, %v4646_v5, %v4642_v39 }
 0x93f   : > { %v4755_v10 = vsel %vm4739_vm6, %v4647_v8, %v4754_v7 }
 0x940   : > { %v4756_v11 = vsel %vm4741_vm7, %v4656_v9, %v4755_v10 }
 0x941   : > { %4771 = vst.msk [vmem:[%s7466_s28 + $0x10] sm:$0xff] %vm4768_vm8, %v4756_v11 }
 0x945   : > { %v4397_v13 = vpop.permute.xlu0 %4396 }
 0x946   : > { %v4669_v30 = vrot.slane %v4397_v13, %v7433_v49 }
 0x947   : > { %v4400_v12 = vpop.permute.xlu1 %4399 }
 0x948   : > { %v4673_v25 = vrot.slane %v4400_v12, %v7431_v47 }
 0x949   : > { %v4391_v15 = vpop.permute.xlu0 %4390 }
 0x94a   : > { %v4660_v26 = vrot.slane %v4391_v15, %v7433_v49  ;;  %v4674_v35 = vsel %vm4448_vm0, %v4673_v25, %v4669_v30 }
 0x94b   : > { %v4394_v14 = vpop.permute.xlu1 %4393 }
 0x94c   : > { %v4664_v23 = vrot.slane %v4394_v14, %v7431_v47 }
 0x94e   : > { %v4665_v31 = vsel %vm4448_vm0, %v4664_v23, %v4660_v26 }
 0x94f   : > { %v4757_v37 = vsel %vm4729_vm1, %v4674_v35, %v4665_v31 }
 0x955   : > { %v4409_v17 = vpop.permute.xlu0 %4408 }
 0x956   : > { %v4687_v41 = vrot.slane %v4409_v17, %v7433_v49 }
 0x957   : > { %v4412_v16 = vpop.permute.xlu1 %4411 }
 0x958   : > { %v4691_v36 = vrot.slane %v4412_v16, %v7431_v47 }
 0x959   : > { %v4403_v20 = vpop.permute.xlu0 %4402 }
 0x95a   : > { %v4678_v28 = vrot.slane %v4403_v20, %v7433_v49  ;;  %v4692_v45 = vsel %vm4448_vm0, %v4691_v36, %v4687_v41 }
 0x95b   : > { %v4406_v19 = vpop.permute.xlu1 %4405 }
 0x95c   : > { %v4682_v24 = vrot.slane %v4406_v19, %v7431_v47 }
 0x95e   : > { %v4683_v32 = vsel %vm4448_vm0, %v4682_v24, %v4678_v28 }
 0x95f   : > { %v4758_v42 = vsel %vm4731_vm2, %v4683_v32, %v4757_v37 }
 0x960   : > { %v4759_v50 = vsel %vm4733_vm3, %v4692_v45, %v4758_v42 }
 0x965   : > { %v4421_v22 = vpop.permute.xlu0 %4420 }
 0x966   : > { %v4705_v53 = vrot.slane %v4421_v22, %v7433_v49 }
 0x967   : > { %v4424_v21 = vpop.permute.xlu1 %4423 }
 0x968   : > { %v4709_v46 = vrot.slane %v4424_v21, %v7431_v47 }
 0x969   : > { %v4415_v29 = vpop.permute.xlu0 %4414 }
 0x96a   : > { %v4696_v38 = vrot.slane %v4415_v29, %v7433_v49  ;;  %v4710_v57 = vsel %vm4448_vm0, %v4709_v46, %v4705_v53 }
 0x96b   : > { %v4418_v27 = vpop.permute.xlu1 %4417 }
 0x96c   : > { %v4700_v34 = vrot.slane %v4418_v27, %v7431_v47 }
 0x96e   : > { %v4701_v44 = vsel %vm4448_vm0, %v4700_v34, %v4696_v38 }
 0x96f   : > { %v4760_v54 = vsel %vm4735_vm4, %v4701_v44, %v4759_v50 }
 0x970   : > { %v4761_v60 = vsel %vm4737_vm5, %v4710_v57, %v4760_v54 }
 0x976   : > { %v4427_v40 = vpop.permute.xlu0 %4426 }
 0x977   : > { %v4714_v51 = vrot.slane %v4427_v40, %v7433_v49 }
 0x978   : > { %v4430_v43 = vpop.permute.xlu1 %4429 }
 0x979   : > { %v4718_v48 = vrot.slane %v4430_v43, %v7431_v47 }
 0x97a   : > { %v4433_v52 = vpop.permute.xlu0 %4432 }
 0x97b   : > { %v4719_v55 = vsel %vm4448_vm0, %v4718_v48, %v4714_v51  ;;  %v4723_v58 = vrot.slane %v4433_v52, %v7433_v49 }
 0x97c   : > { %v4436_v56 = vpop.permute.xlu1 %4435  ;;  %v4762_v61 = vsel %vm4739_vm6, %v4719_v55, %v4761_v60 }
 0x97d   : > { %v4727_v59 = vrot.slane %v4436_v56, %v7431_v47 }
 0x97f   : > { %v4728_v18 = vsel %vm4448_vm0, %v4727_v59, %v4723_v58 }
 0x980   : > { %v4763_v62 = vsel %vm4741_vm7, %v4728_v18, %v4762_v61 }
 0x981   : > { %4772 = vst.msk [vmem:[%s7466_s28 + $0x18] sm:$0xff] %vm4768_vm8, %v4763_v62 }
 0x982 PF: > { %s17_s24 = sadd.s32 1, %s6204_s24  }
 0x983   : > { %p14_p5 = scmp.ge.s32.totalorder %s17_s24, 4  }
 0x985   :  { %16 = sbr.rel (!%p14_p5) target bundleno = 1 (0x1), region = 79 }

</bundles_post_ra>
